<compile_context>
chip_gen: v7x
topology: tpu7x:2x2x1
jax: 0.10.0
libtpu: 0.0.40
codegen_flags: <defaults>
</compile_context>

<pallas_src>
import functools

import jax
import jax.numpy as jnp
from jax.experimental import pallas as pl
from jax.experimental.pallas import tpu as pltpu


# ----------------------------------------------------------------------------
# Pallas kernels
# ----------------------------------------------------------------------------
def _gemm_bias_act_kernel(a_ref, w_ref, b_ref, o_ref, *, act):
    """out = act(a @ w + b).  bf16 operands, f32 accumulate/epilogue."""
    acc = jnp.dot(a_ref[...], w_ref[...], preferred_element_type=jnp.float32)
    acc = acc + b_ref[...]                       # (1, N) broadcast over rows
    if act == "relu":
        acc = jnp.maximum(acc, 0.0)
    elif act == "tanh":
        acc = jnp.tanh(acc)
    o_ref[...] = acc


def _pick_tm(M):
    for tm in (512, 256, 128):
        if M % tm == 0 and M > tm:
            return tm
    return M


def matmul_bias_act(a, w, b, act="none"):
    """act(a @ w + b);  a:(M,K) w:(K,N) b:(N,).  M-tiled, M axis 'parallel'."""
    M, K = a.shape
    N = w.shape[1]
    tm = _pick_tm(M)
    kernel = functools.partial(_gemm_bias_act_kernel, act=act)
    return pl.pallas_call(
        kernel,
        out_shape=jax.ShapeDtypeStruct((M, N), jnp.float32),
        grid=(M // tm,),
        in_specs=[
            pl.BlockSpec((tm, K), lambda i: (i, 0)),
            pl.BlockSpec((K, N), lambda i: (0, 0)),
            pl.BlockSpec((1, N), lambda i: (0, 0)),
        ],
        out_specs=pl.BlockSpec((tm, N), lambda i: (i, 0)),
        compiler_params=pltpu.CompilerParams(dimension_semantics=("parallel",)),
    )(a.astype(jnp.bfloat16), w.astype(jnp.bfloat16),
      b.reshape(1, N).astype(jnp.float32))


def _gemm_bn_relu_kernel(a_ref, w_ref, b_ref, g_ref, bt_ref, o_ref,
                         *, n_groups, rows, eps):
    """Grouped GEMM (P groups) + bias, then BatchNorm (batch stats over all
    P*rows positions per channel, one-pass sum/sumsq) + ReLU, all fused."""
    n_out = o_ref.shape[-1]
    ssum = jnp.zeros((1, n_out), jnp.float32)
    ssq = jnp.zeros((1, n_out), jnp.float32)
    ys = []
    for p in range(n_groups):                    # static unroll (P <= 4)
        y = jnp.dot(a_ref[p], w_ref[p], preferred_element_type=jnp.float32)
        y = y + b_ref[...]
        ys.append(y)
        ssum = ssum + jnp.sum(y, axis=0, keepdims=True)
        ssq = ssq + jnp.sum(y * y, axis=0, keepdims=True)
    inv_n = 1.0 / float(n_groups * rows)
    mean = ssum * inv_n
    var = jnp.maximum(ssq * inv_n - mean * mean, 0.0)   # biased var, clamped
    scale = g_ref[...] * jax.lax.rsqrt(var + eps)
    shift = bt_ref[...] - mean * scale
    for p in range(n_groups):
        o_ref[p] = jnp.maximum(ys[p] * scale + shift, 0.0)


def grouped_gemm_bn_relu(a, w, b, gamma, beta, eps=1e-5):
    """a:(P,M,K) w:(P,K,N) -> relu(batchnorm(a@w + b)) : (P,M,N)."""
    P, M, K = a.shape
    N = w.shape[-1]
    kernel = functools.partial(_gemm_bn_relu_kernel, n_groups=P, rows=M, eps=eps)
    return pl.pallas_call(
        kernel,
        out_shape=jax.ShapeDtypeStruct((P, M, N), jnp.float32),
        grid=(1,),
        in_specs=[
            pl.BlockSpec((P, M, K), lambda i: (0, 0, 0)),
            pl.BlockSpec((P, K, N), lambda i: (0, 0, 0)),
            pl.BlockSpec((1, N), lambda i: (0, 0)),
            pl.BlockSpec((1, N), lambda i: (0, 0)),
            pl.BlockSpec((1, N), lambda i: (0, 0)),
        ],
        out_specs=pl.BlockSpec((P, M, N), lambda i: (0, 0, 0)),
        compiler_params=pltpu.CompilerParams(dimension_semantics=("arbitrary",)),
    )(a.astype(jnp.bfloat16), w.astype(jnp.bfloat16),
      b.reshape(1, N).astype(jnp.float32),
      gamma.reshape(1, N).astype(jnp.float32),
      beta.reshape(1, N).astype(jnp.float32))


def _encoder_head_kernel(x_ref, w1_ref, b1_ref, w2_ref, b2_ref, eps_ref,
                         z_ref, kld_ref, *, latent):
    """fc1(ReLU) -> fc2 -> chunk(mu, log_sigma) -> reparam + KLD, fused."""
    h = jnp.dot(x_ref[...], w1_ref[...], preferred_element_type=jnp.float32)
    h = jnp.maximum(h + b1_ref[...], 0.0)
    h2 = jnp.dot(h.astype(jnp.bfloat16), w2_ref[...],
                 preferred_element_type=jnp.float32) + b2_ref[...]
    mu = h2[:, :latent]
    ls = h2[:, latent:]
    sigma = jnp.exp(ls)
    z_ref[...] = mu + sigma * eps_ref[...]
    # 0.5*(sigma^2 + mu^2 - log(sigma^2) - 1) with log(sigma^2) == 2*ls (stable)
    kld_ref[...] = 0.5 * (jnp.exp(2.0 * ls) + mu * mu - 2.0 * ls - 1.0)


def encoder_head(x, w1, b1, w2, b2, eps_noise, latent):
    B, F = x.shape
    H2 = w1.shape[1]
    kernel = functools.partial(_encoder_head_kernel, latent=latent)
    z, kld = pl.pallas_call(
        kernel,
        out_shape=(jax.ShapeDtypeStruct((B, latent), jnp.float32),
                   jax.ShapeDtypeStruct((B, latent), jnp.float32)),
        grid=(1,),
        in_specs=[
            pl.BlockSpec((B, F), lambda i: (0, 0)),
            pl.BlockSpec((F, H2), lambda i: (0, 0)),
            pl.BlockSpec((1, H2), lambda i: (0, 0)),
            pl.BlockSpec((H2, H2), lambda i: (0, 0)),
            pl.BlockSpec((1, H2), lambda i: (0, 0)),
            pl.BlockSpec((B, latent), lambda i: (0, 0)),
        ],
        out_specs=(pl.BlockSpec((B, latent), lambda i: (0, 0)),
                   pl.BlockSpec((B, latent), lambda i: (0, 0))),
        compiler_params=pltpu.CompilerParams(dimension_semantics=("arbitrary",)),
    )(x.astype(jnp.bfloat16), w1.astype(jnp.bfloat16),
      b1.reshape(1, H2).astype(jnp.float32),
      w2.astype(jnp.bfloat16), b2.reshape(1, H2).astype(jnp.float32),
      eps_noise.astype(jnp.float32))
    return z, kld


def _fc_chain_kernel(x_ref, w1_ref, b1_ref, w2_ref, b2_ref, o_ref):
    """relu(relu(x@w1+b1) @ w2 + b2), fused (decoder fc head)."""
    h = jnp.dot(x_ref[...], w1_ref[...], preferred_element_type=jnp.float32)
    h = jnp.maximum(h + b1_ref[...], 0.0)
    h2 = jnp.dot(h.astype(jnp.bfloat16), w2_ref[...],
                 preferred_element_type=jnp.float32) + b2_ref[...]
    o_ref[...] = jnp.maximum(h2, 0.0)


def decoder_fc(x, w1, b1, w2, b2):
    B, F = x.shape
    H1 = w1.shape[1]
    N = w2.shape[1]
    return pl.pallas_call(
        _fc_chain_kernel,
        out_shape=jax.ShapeDtypeStruct((B, N), jnp.float32),
        grid=(1,),
        in_specs=[
            pl.BlockSpec((B, F), lambda i: (0, 0)),
            pl.BlockSpec((F, H1), lambda i: (0, 0)),
            pl.BlockSpec((1, H1), lambda i: (0, 0)),
            pl.BlockSpec((H1, N), lambda i: (0, 0)),
            pl.BlockSpec((1, N), lambda i: (0, 0)),
        ],
        out_specs=pl.BlockSpec((B, N), lambda i: (0, 0)),
        compiler_params=pltpu.CompilerParams(dimension_semantics=("arbitrary",)),
    )(x.astype(jnp.bfloat16), w1.astype(jnp.bfloat16),
      b1.reshape(1, H1).astype(jnp.float32),
      w2.astype(jnp.bfloat16), b2.reshape(1, N).astype(jnp.float32))


# ----------------------------------------------------------------------------
# Convolution glue (channels-last; patch extraction in JAX, GEMM in Pallas)
# TODO(synk): gather the conv window inside the kernel (strided VMEM slices)
# so the im2col patch matrix is never materialized in HBM.
# ----------------------------------------------------------------------------
def _im2col_nhwc(x, kh, kw, stride, pad):
    """x: (B,H,W,C) -> patches (B*OH*OW, kh*kw*C), K ordered (kh, kw, C)."""
    B, H, W, C = x.shape
    xp = jnp.pad(x, ((0, 0), (pad, pad), (pad, pad), (0, 0)))
    OH = (H + 2 * pad - kh) // stride + 1
    OW = (W + 2 * pad - kw) // stride + 1
    taps = []
    for i in range(kh):
        for j in range(kw):
            taps.append(xp[:, i:i + stride * (OH - 1) + 1:stride,
                           j:j + stride * (OW - 1) + 1:stride, :])
    patches = jnp.concatenate(taps, axis=-1) if len(taps) > 1 else taps[0]
    return patches.reshape(B * OH * OW, kh * kw * C), (B, OH, OW)


def conv2d_act(x, w, b, stride, pad, act="none"):
    """PyTorch-semantics Conv2d + activation.  x NHWC, w (Cout,Cin,kh,kw)."""
    Cout, Cin, kh, kw = w.shape
    patches, (B, OH, OW) = _im2col_nhwc(x, kh, kw, stride, pad)
    wm = w.transpose(2, 3, 1, 0).reshape(kh * kw * Cin, Cout)  # (kh,kw,Cin)->K
    out = matmul_bias_act(patches, wm, b, act=act)             # (M, Cout)
    return out.reshape(B, OH, OW, Cout)


def conv2d_bn_relu(x, w, b, gamma, beta, stride, pad, eps=1e-5):
    """Conv2d -> BatchNorm2d(train) -> ReLU, fused into one Pallas kernel."""
    Cout, Cin, kh, kw = w.shape
    patches, (B, OH, OW) = _im2col_nhwc(x, kh, kw, stride, pad)
    wm = w.transpose(2, 3, 1, 0).reshape(kh * kw * Cin, Cout)
    out = grouped_gemm_bn_relu(patches[None], wm[None], b, gamma, beta, eps)
    return out.reshape(B, OH, OW, Cout)


def _convT_phase_patches(x):
    """4-phase sub-pixel patches for ConvTranspose2d(k=4,s=2,p=1).
    Returns (4, B*H*W, 4*Cin), phases ordered (py, px), K ordered (dy,dx,Cin)."""
    B, H, W, C = x.shape
    xp = jnp.pad(x, ((0, 0), (1, 1), (1, 1), (0, 0)))
    phases = []
    for py in range(2):
        for px in range(2):
            taps = []
            for dy in range(2):
                for dx in range(2):
                    taps.append(xp[:, py + dy:py + dy + H,
                                   px + dx:px + dx + W, :])
            p = jnp.concatenate(taps, axis=-1)          # (B,H,W,4*C)
            phases.append(p.reshape(B * H * W, 4 * C))
    return jnp.stack(phases, axis=0)                     # (4, M, 4*C)


def _convT_phase_weights(w):
    """w: PyTorch (Cin,Cout,4,4) -> (4, 4*Cin, Cout) matching phase patches."""
    Cin, Cout = w.shape[0], w.shape[1]
    phases = []
    for py in range(2):
        for px in range(2):
            taps = []
            for dy in range(2):
                for dx in range(2):
                    taps.append(w[:, :, 3 - py - 2 * dy, 3 - px - 2 * dx])
            wp = jnp.stack(taps, axis=0).reshape(4 * Cin, Cout)
            phases.append(wp)
    return jnp.stack(phases, axis=0)                     # (4, 4*Cin, Cout)


def conv_transpose2d_bn_relu(x, w, b, gamma, beta, eps=1e-5):
    """ConvTranspose2d(4, stride=2, padding=1) -> BN(train) -> ReLU, via
    sub-pixel phase decomposition (no zero-dilated GEMM)."""
    B, H, W, Cin = x.shape
    Cout = w.shape[1]
    patches = _convT_phase_patches(x)                    # (4, M, 4*Cin)
    wm = _convT_phase_weights(w)                         # (4, 4*Cin, Cout)
    out = grouped_gemm_bn_relu(patches, wm, b, gamma, beta, eps)   # (4, M, Cout)
    out = out.reshape(2, 2, B, H, W, Cout).transpose(2, 3, 0, 4, 1, 5)
    return out.reshape(B, 2 * H, 2 * W, Cout)


# ----------------------------------------------------------------------------
# Parameter init (deterministic, PyTorch-default-style uniform bounds,
# PyTorch weight layouts)
# ----------------------------------------------------------------------------
def _uinit(key, shape, fan_in):
    bound = 1.0 / jnp.sqrt(float(fan_in))
    return jax.random.uniform(key, shape, jnp.float32, -bound, bound)


def init_params(key, img_size, downsamplings, latent_size, down_channels, up_channels):
    keys = iter(jax.random.split(key, 64))
    p = {"enc": {}, "dec": {}}
    sc, ec = down_channels, up_channels

    # ---- Encoder ----
    p["enc"]["stem_w"] = _uinit(next(keys), (sc, 3, 1, 1), 3)          # 1x1 conv
    p["enc"]["stem_b"] = _uinit(next(keys), (sc,), 3)
    for i in range(downsamplings):
        cin, cout = 2 ** i * sc, 2 ** (i + 1) * sc
        fan = cin * 9
        p["enc"][f"down{i}_w"] = _uinit(next(keys), (cout, cin, 3, 3), fan)
        p["enc"][f"down{i}_b"] = _uinit(next(keys), (cout,), fan)
        p["enc"][f"bn{i}_g"] = jnp.ones((cout,), jnp.float32)
        p["enc"][f"bn{i}_b"] = jnp.zeros((cout,), jnp.float32)
    flat = sc * img_size ** 2 // 2 ** downsamplings
    p["enc"]["fc1_w"] = _uinit(next(keys), (flat, 2 * latent_size), flat)
    p["enc"]["fc1_b"] = _uinit(next(keys), (2 * latent_size,), flat)
    p["enc"]["fc2_w"] = _uinit(next(keys), (2 * latent_size, 2 * latent_size), 2 * latent_size)
    p["enc"]["fc2_b"] = _uinit(next(keys), (2 * latent_size,), 2 * latent_size)

    # ---- Decoder ----
    p["dec"]["fc1_w"] = _uinit(next(keys), (latent_size, 2 * latent_size), latent_size)
    p["dec"]["fc1_b"] = _uinit(next(keys), (2 * latent_size,), latent_size)
    dflat = ec * img_size ** 2 // 2 ** downsamplings
    p["dec"]["fc2_w"] = _uinit(next(keys), (2 * latent_size, dflat), 2 * latent_size)
    p["dec"]["fc2_b"] = _uinit(next(keys), (dflat,), 2 * latent_size)
    for i in reversed(range(downsamplings)):
        cin, cout = 2 ** (i + 1) * ec, 2 ** i * ec
        fan = cin * 16
        p["dec"][f"convt{i}_w"] = _uinit(next(keys), (cin, cout, 4, 4), fan)
        p["dec"][f"convt{i}_b"] = _uinit(next(keys), (cout,), fan)
        p["dec"][f"bn{i}_g"] = jnp.ones((cout,), jnp.float32)
        p["dec"][f"bn{i}_b"] = jnp.zeros((cout,), jnp.float32)
    p["dec"]["convout_w"] = _uinit(next(keys), (3, ec, 1, 1), ec)
    p["dec"]["convout_b"] = _uinit(next(keys), (3,), ec)
    return p


# ----------------------------------------------------------------------------
# VAE forward
# ----------------------------------------------------------------------------
def make_vae_forward(img_size, downsamplings, latent_size, down_channels, up_channels):
    ec = up_channels

    def forward(params, x_nchw, eps_noise):
        enc, dec = params["enc"], params["dec"]
        x = x_nchw.transpose(0, 2, 3, 1)                       # NCHW -> NHWC

        # ----- Encoder -----
        h = conv2d_act(x, enc["stem_w"], enc["stem_b"], stride=1, pad=0, act="relu")
        for i in range(downsamplings):
            h = conv2d_bn_relu(h, enc[f"down{i}_w"], enc[f"down{i}_b"],
                               enc[f"bn{i}_g"], enc[f"bn{i}_b"], stride=2, pad=1)
        B = h.shape[0]
        # nn.Flatten uses PyTorch NCHW order
        flat = h.transpose(0, 3, 1, 2).reshape(B, -1)
        z, kld = encoder_head(flat, enc["fc1_w"], enc["fc1_b"],
                              enc["fc2_w"], enc["fc2_b"], eps_noise, latent_size)

        # ----- Decoder -----
        d = decoder_fc(z, dec["fc1_w"], dec["fc1_b"], dec["fc2_w"], dec["fc2_b"])
        start_channels = 2 ** downsamplings * ec
        size = img_size // 2 ** downsamplings
        d = d.reshape(B, start_channels, size, size).transpose(0, 2, 3, 1)  # NHWC
        for i in reversed(range(downsamplings)):
            d = conv_transpose2d_bn_relu(d, dec[f"convt{i}_w"], dec[f"convt{i}_b"],
                                         dec[f"bn{i}_g"], dec[f"bn{i}_b"])
        x_pred = conv2d_act(d, dec["convout_w"], dec["convout_b"],
                            stride=1, pad=0, act="tanh")
        return x_pred.transpose(0, 3, 1, 2), kld               # NHWC -> NCHW

    return forward


# ----------------------------------------------------------------------------
if __name__ == "__main__":
    # Small config consistent with the module's constructor contract.
    IMG, DOWN, LATENT, DCH, UCH, BATCH = 16, 2, 32, 4, 4, 2

    key = jax.random.PRNGKey(0)
    k_param, k_x, k_eps = jax.random.split(key, 3)

    params = init_params(k_param, IMG, DOWN, LATENT, DCH, UCH)
    x = jax.random.normal(k_x, (BATCH, 3, IMG, IMG), jnp.float32)       # NCHW
    eps_noise = jax.random.normal(k_eps, (BATCH, LATENT), jnp.float32)  # randn_like(mu)

    vae_forward = jax.jit(make_vae_forward(IMG, DOWN, LATENT, DCH, UCH))
    x_pred, kld = vae_forward(params, x, eps_noise)
    jax.block_until_ready((x_pred, kld))

    assert x_pred.shape == (BATCH, 3, IMG, IMG), x_pred.shape
    assert kld.shape == (BATCH, LATENT), kld.shape
    assert bool(jnp.isfinite(x_pred).all()) and bool(jnp.isfinite(kld).all())
    print("KERNEL_OK")
</pallas_src>

<mosaic_0001>
module attributes {stable_mosaic.version = 11 : i64} {
  func.func @_gemm_bias_act_kernel(%arg0: i32, %arg1: memref<256x3xbf16, #tpu.memory_space<vmem>>, %arg2: memref<3x4xbf16, #tpu.memory_space<vmem>>, %arg3: memref<1x4xf32, #tpu.memory_space<vmem>>, %arg4: memref<256x4xf32, #tpu.memory_space<vmem>>) attributes {dimension_semantics = [#tpu.dimension_semantics<parallel>], iteration_bounds = array<i64: 2>, scalar_prefetch = 0 : i64, scratch_operands = 0 : i64, tpu.core_type = #tpu.core_type<tc>, window_params = [{transform_indices = @transform_0, window_bounds = array<i64: 256, 3>}, {pipeline_mode = #tpu.pipeline_mode<synchronous>, transform_indices = @transform_1, window_bounds = array<i64: 3, 4>}, {pipeline_mode = #tpu.pipeline_mode<synchronous>, transform_indices = @transform_2, window_bounds = array<i64: 1, 4>}, {transform_indices = @transform_3, window_bounds = array<i64: 256, 4>}]} {
    %c0 = arith.constant 0 : index
    %c0_0 = arith.constant 0 : index
    %0 = vector.load %arg1[%c0, %c0_0] : memref<256x3xbf16, #tpu.memory_space<vmem>>, vector<256x3xbf16>
    %c0_1 = arith.constant 0 : index
    %c0_2 = arith.constant 0 : index
    %1 = vector.load %arg2[%c0_1, %c0_2] : memref<3x4xbf16, #tpu.memory_space<vmem>>, vector<3x4xbf16>
    %cst = arith.constant dense<0.000000e+00> : vector<256x4xf32>
    %2 = tpu.matmul %0, %1, %cst {dimension_numbers = #tpu.dot_dimension_numbers<[1], [0], [0], [1], [0, 0, 1, 1], [], []>} : vector<256x3xbf16>, vector<3x4xbf16>, vector<256x4xf32> -> vector<256x4xf32>
    %c0_3 = arith.constant 0 : index
    %c0_4 = arith.constant 0 : index
    %3 = vector.load %arg3[%c0_3, %c0_4] : memref<1x4xf32, #tpu.memory_space<vmem>>, vector<1x4xf32>
    %4 = vector.broadcast %3 : vector<1x4xf32> to vector<256x4xf32>
    %5 = arith.addf %2, %4 : vector<256x4xf32>
    %cst_5 = arith.constant 0.000000e+00 : f32
    %6 = vector.broadcast %cst_5 : f32 to vector<256x4xf32>
    %7 = arith.maximumf %5, %6 : vector<256x4xf32>
    %c0_6 = arith.constant 0 : index
    %c0_7 = arith.constant 0 : index
    %8 = vector.load %arg4[%c0_6, %c0_7] : memref<256x4xf32, #tpu.memory_space<vmem>>, vector<256x4xf32>
    tpu.vector_store %arg4[%c0_6, %c0_7], %7 {strides = array<i32>} : memref<256x4xf32, #tpu.memory_space<vmem>>, vector<256x4xf32>,
    return
  }
  func.func @transform_0(%arg0: i32) -> (i32, i32) {
    %c0_i32 = arith.constant 0 : i32
    %c0_i32_0 = arith.constant 0 : i32
    return %arg0, %c0_i32 : i32, i32
  }
  func.func @transform_1(%arg0: i32) -> (i32, i32) {
    %c0_i32 = arith.constant 0 : i32
    %c0_i32_0 = arith.constant 0 : i32
    %c0_i32_1 = arith.constant 0 : i32
    return %c0_i32, %c0_i32_0 : i32, i32
  }
  func.func @transform_2(%arg0: i32) -> (i32, i32) {
    %c0_i32 = arith.constant 0 : i32
    %c0_i32_0 = arith.constant 0 : i32
    %c0_i32_1 = arith.constant 0 : i32
    return %c0_i32, %c0_i32_0 : i32, i32
  }
  func.func @transform_3(%arg0: i32) -> (i32, i32) {
    %c0_i32 = arith.constant 0 : i32
    %c0_i32_0 = arith.constant 0 : i32
    return %arg0, %c0_i32 : i32, i32
  }
}

module attributes {stable_mosaic.version = 11 : i64} {
  func.func @_gemm_bn_relu_kernel(%arg0: i32, %arg1: memref<1x128x36xbf16, #tpu.memory_space<vmem>>, %arg2: memref<1x36x8xbf16, #tpu.memory_space<vmem>>, %arg3: memref<1x8xf32, #tpu.memory_space<vmem>>, %arg4: memref<1x8xf32, #tpu.memory_space<vmem>>, %arg5: memref<1x8xf32, #tpu.memory_space<vmem>>, %arg6: memref<1x128x8xf32, #tpu.memory_space<vmem>>) attributes {dimension_semantics = [#tpu.dimension_semantics<arbitrary>], iteration_bounds = array<i64: 1>, scalar_prefetch = 0 : i64, scratch_operands = 0 : i64, tpu.core_type = #tpu.core_type<tc>, window_params = [{pipeline_mode = #tpu.pipeline_mode<synchronous>, transform_indices = @transform_0, window_bounds = array<i64: 1, 128, 36>}, {pipeline_mode = #tpu.pipeline_mode<synchronous>, transform_indices = @transform_1, window_bounds = array<i64: 1, 36, 8>}, {pipeline_mode = #tpu.pipeline_mode<synchronous>, transform_indices = @transform_2, window_bounds = array<i64: 1, 8>}, {pipeline_mode = #tpu.pipeline_mode<synchronous>, transform_indices = @transform_3, window_bounds = array<i64: 1, 8>}, {pipeline_mode = #tpu.pipeline_mode<synchronous>, transform_indices = @transform_4, window_bounds = array<i64: 1, 8>}, {pipeline_mode = #tpu.pipeline_mode<synchronous>, transform_indices = @transform_5, window_bounds = array<i64: 1, 128, 8>}]} {
    %cst = arith.constant 0.000000e+00 : f32
    %0 = vector.broadcast %cst : f32 to vector<1x8xf32>
    %cst_0 = arith.constant 0.000000e+00 : f32
    %1 = vector.broadcast %cst_0 : f32 to vector<1x8xf32>
    %c0 = arith.constant 0 : index
    %c0_1 = arith.constant 0 : index
    %c0_2 = arith.constant 0 : index
    %2 = vector.load %arg1[%c0, %c0_1, %c0_2] : memref<1x128x36xbf16, #tpu.memory_space<vmem>>, vector<1x128x36xbf16>
    %3 = vector.shape_cast %2 : vector<1x128x36xbf16> to vector<128x36xbf16>
    %c0_3 = arith.constant 0 : index
    %c0_4 = arith.constant 0 : index
    %c0_5 = arith.constant 0 : index
    %4 = vector.load %arg2[%c0_3, %c0_4, %c0_5] : memref<1x36x8xbf16, #tpu.memory_space<vmem>>, vector<1x36x8xbf16>
    %5 = vector.shape_cast %4 : vector<1x36x8xbf16> to vector<36x8xbf16>
    %cst_6 = arith.constant dense<0.000000e+00> : vector<128x8xf32>
    %6 = tpu.matmul %3, %5, %cst_6 {dimension_numbers = #tpu.dot_dimension_numbers<[1], [0], [0], [1], [0, 0, 1, 1], [], []>} : vector<128x36xbf16>, vector<36x8xbf16>, vector<128x8xf32> -> vector<128x8xf32>
    %c0_7 = arith.constant 0 : index
    %c0_8 = arith.constant 0 : index
    %7 = vector.load %arg3[%c0_7, %c0_8] : memref<1x8xf32, #tpu.memory_space<vmem>>, vector<1x8xf32>
    %8 = vector.broadcast %7 : vector<1x8xf32> to vector<128x8xf32>
    %9 = arith.addf %6, %8 : vector<128x8xf32>
    %cst_9 = arith.constant dense<0.000000e+00> : vector<8xf32>
    %10 = vector.multi_reduction <add>, %9, %cst_9 [0] : vector<128x8xf32> to vector<8xf32>
    %11 = vector.shape_cast %10 : vector<8xf32> to vector<1x8xf32>
    %12 = arith.addf %0, %11 : vector<1x8xf32>
    %13 = arith.mulf %9, %9 : vector<128x8xf32>
    %cst_10 = arith.constant dense<0.000000e+00> : vector<8xf32>
    %14 = vector.multi_reduction <add>, %13, %cst_10 [0] : vector<128x8xf32> to vector<8xf32>
    %15 = vector.shape_cast %14 : vector<8xf32> to vector<1x8xf32>
    %16 = arith.addf %1, %15 : vector<1x8xf32>
    %cst_11 = arith.constant 7.812500e-03 : f32
    %17 = vector.broadcast %cst_11 : f32 to vector<1x8xf32>
    %18 = arith.mulf %12, %17 : vector<1x8xf32>
    %cst_12 = arith.constant 7.812500e-03 : f32
    %19 = vector.broadcast %cst_12 : f32 to vector<1x8xf32>
    %20 = arith.mulf %16, %19 : vector<1x8xf32>
    %21 = arith.mulf %18, %18 : vector<1x8xf32>
    %22 = arith.subf %20, %21 : vector<1x8xf32>
    %cst_13 = arith.constant 0.000000e+00 : f32
    %23 = vector.broadcast %cst_13 : f32 to vector<1x8xf32>
    %24 = arith.maximumf %22, %23 : vector<1x8xf32>
    %c0_14 = arith.constant 0 : index
    %c0_15 = arith.constant 0 : index
    %25 = vector.load %arg4[%c0_14, %c0_15] : memref<1x8xf32, #tpu.memory_space<vmem>>, vector<1x8xf32>
    %cst_16 = arith.constant 9.99999974E-6 : f32
    %26 = vector.broadcast %cst_16 : f32 to vector<1x8xf32>
    %27 = arith.addf %24, %26 : vector<1x8xf32>
    %28 = math.rsqrt %27 : vector<1x8xf32>
    %29 = arith.mulf %25, %28 : vector<1x8xf32>
    %c0_17 = arith.constant 0 : index
    %c0_18 = arith.constant 0 : index
    %30 = vector.load %arg5[%c0_17, %c0_18] : memref<1x8xf32, #tpu.memory_space<vmem>>, vector<1x8xf32>
    %31 = arith.mulf %18, %29 : vector<1x8xf32>
    %32 = arith.subf %30, %31 : vector<1x8xf32>
    %33 = vector.broadcast %29 : vector<1x8xf32> to vector<128x8xf32>
    %34 = arith.mulf %9, %33 : vector<128x8xf32>
    %35 = vector.broadcast %32 : vector<1x8xf32> to vector<128x8xf32>
    %36 = arith.addf %34, %35 : vector<128x8xf32>
    %cst_19 = arith.constant 0.000000e+00 : f32
    %37 = vector.broadcast %cst_19 : f32 to vector<128x8xf32>
    %38 = arith.maximumf %36, %37 : vector<128x8xf32>
    %c0_20 = arith.constant 0 : index
    %c0_21 = arith.constant 0 : index
    %c0_22 = arith.constant 0 : index
    %39 = vector.load %arg6[%c0_20, %c0_21, %c0_22] : memref<1x128x8xf32, #tpu.memory_space<vmem>>, vector<1x128x8xf32>
    %40 = vector.shape_cast %39 : vector<1x128x8xf32> to vector<128x8xf32>
    %41 = vector.shape_cast %38 : vector<128x8xf32> to vector<1x128x8xf32>
    tpu.vector_store %arg6[%c0_20, %c0_21, %c0_22], %41 {strides = array<i32>} : memref<1x128x8xf32, #tpu.memory_space<vmem>>, vector<1x128x8xf32>,
    return
  }
  func.func @transform_0(%arg0: i32) -> (i32, i32, i32) {
    %c0_i32 = arith.constant 0 : i32
    %c0_i32_0 = arith.constant 0 : i32
    %c0_i32_1 = arith.constant 0 : i32
    %c0_i32_2 = arith.constant 0 : i32
    return %c0_i32, %c0_i32_0, %c0_i32_1 : i32, i32, i32
  }
  func.func @transform_1(%arg0: i32) -> (i32, i32, i32) {
    %c0_i32 = arith.constant 0 : i32
    %c0_i32_0 = arith.constant 0 : i32
    %c0_i32_1 = arith.constant 0 : i32
    %c0_i32_2 = arith.constant 0 : i32
    return %c0_i32, %c0_i32_0, %c0_i32_1 : i32, i32, i32
  }
  func.func @transform_2(%arg0: i32) -> (i32, i32) {
    %c0_i32 = arith.constant 0 : i32
    %c0_i32_0 = arith.constant 0 : i32
    %c0_i32_1 = arith.constant 0 : i32
    return %c0_i32, %c0_i32_0 : i32, i32
  }
  func.func @transform_3(%arg0: i32) -> (i32, i32) {
    %c0_i32 = arith.constant 0 : i32
    %c0_i32_0 = arith.constant 0 : i32
    %c0_i32_1 = arith.constant 0 : i32
    return %c0_i32, %c0_i32_0 : i32, i32
  }
  func.func @transform_4(%arg0: i32) -> (i32, i32) {
    %c0_i32 = arith.constant 0 : i32
    %c0_i32_0 = arith.constant 0 : i32
    %c0_i32_1 = arith.constant 0 : i32
    return %c0_i32, %c0_i32_0 : i32, i32
  }
  func.func @transform_5(%arg0: i32) -> (i32, i32, i32) {
    %c0_i32 = arith.constant 0 : i32
    %c0_i32_0 = arith.constant 0 : i32
    %c0_i32_1 = arith.constant 0 : i32
    %c0_i32_2 = arith.constant 0 : i32
    return %c0_i32, %c0_i32_0, %c0_i32_1 : i32, i32, i32
  }
}

module attributes {stable_mosaic.version = 11 : i64} {
  func.func @_gemm_bn_relu_kernel(%arg0: i32, %arg1: memref<1x32x72xbf16, #tpu.memory_space<vmem>>, %arg2: memref<1x72x16xbf16, #tpu.memory_space<vmem>>, %arg3: memref<1x16xf32, #tpu.memory_space<vmem>>, %arg4: memref<1x16xf32, #tpu.memory_space<vmem>>, %arg5: memref<1x16xf32, #tpu.memory_space<vmem>>, %arg6: memref<1x32x16xf32, #tpu.memory_space<vmem>>) attributes {dimension_semantics = [#tpu.dimension_semantics<arbitrary>], iteration_bounds = array<i64: 1>, scalar_prefetch = 0 : i64, scratch_operands = 0 : i64, tpu.core_type = #tpu.core_type<tc>, window_params = [{pipeline_mode = #tpu.pipeline_mode<synchronous>, transform_indices = @transform_0, window_bounds = array<i64: 1, 32, 72>}, {pipeline_mode = #tpu.pipeline_mode<synchronous>, transform_indices = @transform_1, window_bounds = array<i64: 1, 72, 16>}, {pipeline_mode = #tpu.pipeline_mode<synchronous>, transform_indices = @transform_2, window_bounds = array<i64: 1, 16>}, {pipeline_mode = #tpu.pipeline_mode<synchronous>, transform_indices = @transform_3, window_bounds = array<i64: 1, 16>}, {pipeline_mode = #tpu.pipeline_mode<synchronous>, transform_indices = @transform_4, window_bounds = array<i64: 1, 16>}, {pipeline_mode = #tpu.pipeline_mode<synchronous>, transform_indices = @transform_5, window_bounds = array<i64: 1, 32, 16>}]} {
    %cst = arith.constant 0.000000e+00 : f32
    %0 = vector.broadcast %cst : f32 to vector<1x16xf32>
    %cst_0 = arith.constant 0.000000e+00 : f32
    %1 = vector.broadcast %cst_0 : f32 to vector<1x16xf32>
    %c0 = arith.constant 0 : index
    %c0_1 = arith.constant 0 : index
    %c0_2 = arith.constant 0 : index
    %2 = vector.load %arg1[%c0, %c0_1, %c0_2] : memref<1x32x72xbf16, #tpu.memory_space<vmem>>, vector<1x32x72xbf16>
    %3 = vector.shape_cast %2 : vector<1x32x72xbf16> to vector<32x72xbf16>
    %c0_3 = arith.constant 0 : index
    %c0_4 = arith.constant 0 : index
    %c0_5 = arith.constant 0 : index
    %4 = vector.load %arg2[%c0_3, %c0_4, %c0_5] : memref<1x72x16xbf16, #tpu.memory_space<vmem>>, vector<1x72x16xbf16>
    %5 = vector.shape_cast %4 : vector<1x72x16xbf16> to vector<72x16xbf16>
    %cst_6 = arith.constant dense<0.000000e+00> : vector<32x16xf32>
    %6 = tpu.matmul %3, %5, %cst_6 {dimension_numbers = #tpu.dot_dimension_numbers<[1], [0], [0], [1], [0, 0, 1, 1], [], []>} : vector<32x72xbf16>, vector<72x16xbf16>, vector<32x16xf32> -> vector<32x16xf32>
    %c0_7 = arith.constant 0 : index
    %c0_8 = arith.constant 0 : index
    %7 = vector.load %arg3[%c0_7, %c0_8] : memref<1x16xf32, #tpu.memory_space<vmem>>, vector<1x16xf32>
    %8 = vector.broadcast %7 : vector<1x16xf32> to vector<32x16xf32>
    %9 = arith.addf %6, %8 : vector<32x16xf32>
    %cst_9 = arith.constant dense<0.000000e+00> : vector<16xf32>
    %10 = vector.multi_reduction <add>, %9, %cst_9 [0] : vector<32x16xf32> to vector<16xf32>
    %11 = vector.shape_cast %10 : vector<16xf32> to vector<1x16xf32>
    %12 = arith.addf %0, %11 : vector<1x16xf32>
    %13 = arith.mulf %9, %9 : vector<32x16xf32>
    %cst_10 = arith.constant dense<0.000000e+00> : vector<16xf32>
    %14 = vector.multi_reduction <add>, %13, %cst_10 [0] : vector<32x16xf32> to vector<16xf32>
    %15 = vector.shape_cast %14 : vector<16xf32> to vector<1x16xf32>
    %16 = arith.addf %1, %15 : vector<1x16xf32>
    %cst_11 = arith.constant 3.125000e-02 : f32
    %17 = vector.broadcast %cst_11 : f32 to vector<1x16xf32>
    %18 = arith.mulf %12, %17 : vector<1x16xf32>
    %cst_12 = arith.constant 3.125000e-02 : f32
    %19 = vector.broadcast %cst_12 : f32 to vector<1x16xf32>
    %20 = arith.mulf %16, %19 : vector<1x16xf32>
    %21 = arith.mulf %18, %18 : vector<1x16xf32>
    %22 = arith.subf %20, %21 : vector<1x16xf32>
    %cst_13 = arith.constant 0.000000e+00 : f32
    %23 = vector.broadcast %cst_13 : f32 to vector<1x16xf32>
    %24 = arith.maximumf %22, %23 : vector<1x16xf32>
    %c0_14 = arith.constant 0 : index
    %c0_15 = arith.constant 0 : index
    %25 = vector.load %arg4[%c0_14, %c0_15] : memref<1x16xf32, #tpu.memory_space<vmem>>, vector<1x16xf32>
    %cst_16 = arith.constant 9.99999974E-6 : f32
    %26 = vector.broadcast %cst_16 : f32 to vector<1x16xf32>
    %27 = arith.addf %24, %26 : vector<1x16xf32>
    %28 = math.rsqrt %27 : vector<1x16xf32>
    %29 = arith.mulf %25, %28 : vector<1x16xf32>
    %c0_17 = arith.constant 0 : index
    %c0_18 = arith.constant 0 : index
    %30 = vector.load %arg5[%c0_17, %c0_18] : memref<1x16xf32, #tpu.memory_space<vmem>>, vector<1x16xf32>
    %31 = arith.mulf %18, %29 : vector<1x16xf32>
    %32 = arith.subf %30, %31 : vector<1x16xf32>
    %33 = vector.broadcast %29 : vector<1x16xf32> to vector<32x16xf32>
    %34 = arith.mulf %9, %33 : vector<32x16xf32>
    %35 = vector.broadcast %32 : vector<1x16xf32> to vector<32x16xf32>
    %36 = arith.addf %34, %35 : vector<32x16xf32>
    %cst_19 = arith.constant 0.000000e+00 : f32
    %37 = vector.broadcast %cst_19 : f32 to vector<32x16xf32>
    %38 = arith.maximumf %36, %37 : vector<32x16xf32>
    %c0_20 = arith.constant 0 : index
    %c0_21 = arith.constant 0 : index
    %c0_22 = arith.constant 0 : index
    %39 = vector.load %arg6[%c0_20, %c0_21, %c0_22] : memref<1x32x16xf32, #tpu.memory_space<vmem>>, vector<1x32x16xf32>
    %40 = vector.shape_cast %39 : vector<1x32x16xf32> to vector<32x16xf32>
    %41 = vector.shape_cast %38 : vector<32x16xf32> to vector<1x32x16xf32>
    tpu.vector_store %arg6[%c0_20, %c0_21, %c0_22], %41 {strides = array<i32>} : memref<1x32x16xf32, #tpu.memory_space<vmem>>, vector<1x32x16xf32>,
    return
  }
  func.func @transform_0(%arg0: i32) -> (i32, i32, i32) {
    %c0_i32 = arith.constant 0 : i32
    %c0_i32_0 = arith.constant 0 : i32
    %c0_i32_1 = arith.constant 0 : i32
    %c0_i32_2 = arith.constant 0 : i32
    return %c0_i32, %c0_i32_0, %c0_i32_1 : i32, i32, i32
  }
  func.func @transform_1(%arg0: i32) -> (i32, i32, i32) {
    %c0_i32 = arith.constant 0 : i32
    %c0_i32_0 = arith.constant 0 : i32
    %c0_i32_1 = arith.constant 0 : i32
    %c0_i32_2 = arith.constant 0 : i32
    return %c0_i32, %c0_i32_0, %c0_i32_1 : i32, i32, i32
  }
  func.func @transform_2(%arg0: i32) -> (i32, i32) {
    %c0_i32 = arith.constant 0 : i32
    %c0_i32_0 = arith.constant 0 : i32
    %c0_i32_1 = arith.constant 0 : i32
    return %c0_i32, %c0_i32_0 : i32, i32
  }
  func.func @transform_3(%arg0: i32) -> (i32, i32) {
    %c0_i32 = arith.constant 0 : i32
    %c0_i32_0 = arith.constant 0 : i32
    %c0_i32_1 = arith.constant 0 : i32
    return %c0_i32, %c0_i32_0 : i32, i32
  }
  func.func @transform_4(%arg0: i32) -> (i32, i32) {
    %c0_i32 = arith.constant 0 : i32
    %c0_i32_0 = arith.constant 0 : i32
    %c0_i32_1 = arith.constant 0 : i32
    return %c0_i32, %c0_i32_0 : i32, i32
  }
  func.func @transform_5(%arg0: i32) -> (i32, i32, i32) {
    %c0_i32 = arith.constant 0 : i32
    %c0_i32_0 = arith.constant 0 : i32
    %c0_i32_1 = arith.constant 0 : i32
    %c0_i32_2 = arith.constant 0 : i32
    return %c0_i32, %c0_i32_0, %c0_i32_1 : i32, i32, i32
  }
}

module attributes {stable_mosaic.version = 11 : i64} {
  func.func @_encoder_head_kernel(%arg0: i32, %arg1: memref<2x256xbf16, #tpu.memory_space<vmem>>, %arg2: memref<256x64xbf16, #tpu.memory_space<vmem>>, %arg3: memref<1x64xf32, #tpu.memory_space<vmem>>, %arg4: memref<64x64xbf16, #tpu.memory_space<vmem>>, %arg5: memref<1x64xf32, #tpu.memory_space<vmem>>, %arg6: memref<2x32xf32, #tpu.memory_space<vmem>>, %arg7: memref<2x32xf32, #tpu.memory_space<vmem>>, %arg8: memref<2x32xf32, #tpu.memory_space<vmem>>) attributes {dimension_semantics = [#tpu.dimension_semantics<arbitrary>], iteration_bounds = array<i64: 1>, scalar_prefetch = 0 : i64, scratch_operands = 0 : i64, tpu.core_type = #tpu.core_type<tc>, window_params = [{pipeline_mode = #tpu.pipeline_mode<synchronous>, transform_indices = @transform_0, window_bounds = array<i64: 2, 256>}, {pipeline_mode = #tpu.pipeline_mode<synchronous>, transform_indices = @transform_1, window_bounds = array<i64: 256, 64>}, {pipeline_mode = #tpu.pipeline_mode<synchronous>, transform_indices = @transform_2, window_bounds = array<i64: 1, 64>}, {pipeline_mode = #tpu.pipeline_mode<synchronous>, transform_indices = @transform_3, window_bounds = array<i64: 64, 64>}, {pipeline_mode = #tpu.pipeline_mode<synchronous>, transform_indices = @transform_4, window_bounds = array<i64: 1, 64>}, {pipeline_mode = #tpu.pipeline_mode<synchronous>, transform_indices = @transform_5, window_bounds = array<i64: 2, 32>}, {pipeline_mode = #tpu.pipeline_mode<synchronous>, transform_indices = @transform_6, window_bounds = array<i64: 2, 32>}, {pipeline_mode = #tpu.pipeline_mode<synchronous>, transform_indices = @transform_7, window_bounds = array<i64: 2, 32>}]} {
    %c0 = arith.constant 0 : index
    %c0_0 = arith.constant 0 : index
    %0 = vector.load %arg1[%c0, %c0_0] : memref<2x256xbf16, #tpu.memory_space<vmem>>, vector<2x256xbf16>
    %c0_1 = arith.constant 0 : index
    %c0_2 = arith.constant 0 : index
    %1 = vector.load %arg2[%c0_1, %c0_2] : memref<256x64xbf16, #tpu.memory_space<vmem>>, vector<256x64xbf16>
    %cst = arith.constant dense<0.000000e+00> : vector<2x64xf32>
    %2 = tpu.matmul %0, %1, %cst {dimension_numbers = #tpu.dot_dimension_numbers<[1], [0], [0], [1], [0, 0, 1, 1], [], []>} : vector<2x256xbf16>, vector<256x64xbf16>, vector<2x64xf32> -> vector<2x64xf32>
    %c0_3 = arith.constant 0 : index
    %c0_4 = arith.constant 0 : index
    %3 = vector.load %arg3[%c0_3, %c0_4] : memref<1x64xf32, #tpu.memory_space<vmem>>, vector<1x64xf32>
    %4 = vector.broadcast %3 : vector<1x64xf32> to vector<2x64xf32>
    %5 = arith.addf %2, %4 : vector<2x64xf32>
    %cst_5 = arith.constant 0.000000e+00 : f32
    %6 = vector.broadcast %cst_5 : f32 to vector<2x64xf32>
    %7 = arith.maximumf %5, %6 : vector<2x64xf32>
    %8 = arith.truncf %7 : vector<2x64xf32> to vector<2x64xbf16>
    %c0_6 = arith.constant 0 : index
    %c0_7 = arith.constant 0 : index
    %9 = vector.load %arg4[%c0_6, %c0_7] : memref<64x64xbf16, #tpu.memory_space<vmem>>, vector<64x64xbf16>
    %cst_8 = arith.constant dense<0.000000e+00> : vector<2x64xf32>
    %10 = tpu.matmul %8, %9, %cst_8 {dimension_numbers = #tpu.dot_dimension_numbers<[1], [0], [0], [1], [0, 0, 1, 1], [], []>} : vector<2x64xbf16>, vector<64x64xbf16>, vector<2x64xf32> -> vector<2x64xf32>
    %c0_9 = arith.constant 0 : index
    %c0_10 = arith.constant 0 : index
    %11 = vector.load %arg5[%c0_9, %c0_10] : memref<1x64xf32, #tpu.memory_space<vmem>>, vector<1x64xf32>
    %12 = vector.broadcast %11 : vector<1x64xf32> to vector<2x64xf32>
    %13 = arith.addf %10, %12 : vector<2x64xf32>
    %14 = vector.extract_strided_slice %13 {offsets = [0, 0], sizes = [2, 32], strides = [1, 1]} : vector<2x64xf32> to vector<2x32xf32>
    %15 = vector.extract_strided_slice %13 {offsets = [0, 32], sizes = [2, 32], strides = [1, 1]} : vector<2x64xf32> to vector<2x32xf32>
    %16 = math.exp %15 : vector<2x32xf32>
    %c0_11 = arith.constant 0 : index
    %c0_12 = arith.constant 0 : index
    %17 = vector.load %arg6[%c0_11, %c0_12] : memref<2x32xf32, #tpu.memory_space<vmem>>, vector<2x32xf32>
    %18 = arith.mulf %16, %17 : vector<2x32xf32>
    %19 = arith.addf %14, %18 : vector<2x32xf32>
    %c0_13 = arith.constant 0 : index
    %c0_14 = arith.constant 0 : index
    %20 = vector.load %arg7[%c0_13, %c0_14] : memref<2x32xf32, #tpu.memory_space<vmem>>, vector<2x32xf32>
    tpu.vector_store %arg7[%c0_13, %c0_14], %19 {strides = array<i32>} : memref<2x32xf32, #tpu.memory_space<vmem>>, vector<2x32xf32>,
    %cst_15 = arith.constant 2.000000e+00 : f32
    %21 = vector.broadcast %cst_15 : f32 to vector<2x32xf32>
    %22 = arith.mulf %21, %15 : vector<2x32xf32>
    %23 = math.exp %22 : vector<2x32xf32>
    %24 = arith.mulf %14, %14 : vector<2x32xf32>
    %25 = arith.addf %23, %24 : vector<2x32xf32>
    %cst_16 = arith.constant 2.000000e+00 : f32
    %26 = vector.broadcast %cst_16 : f32 to vector<2x32xf32>
    %27 = arith.mulf %26, %15 : vector<2x32xf32>
    %28 = arith.subf %25, %27 : vector<2x32xf32>
    %cst_17 = arith.constant 1.000000e+00 : f32
    %29 = vector.broadcast %cst_17 : f32 to vector<2x32xf32>
    %30 = arith.subf %28, %29 : vector<2x32xf32>
    %cst_18 = arith.constant 5.000000e-01 : f32
    %31 = vector.broadcast %cst_18 : f32 to vector<2x32xf32>
    %32 = arith.mulf %31, %30 : vector<2x32xf32>
    %c0_19 = arith.constant 0 : index
    %c0_20 = arith.constant 0 : index
    %33 = vector.load %arg8[%c0_19, %c0_20] : memref<2x32xf32, #tpu.memory_space<vmem>>, vector<2x32xf32>
    tpu.vector_store %arg8[%c0_19, %c0_20], %32 {strides = array<i32>} : memref<2x32xf32, #tpu.memory_space<vmem>>, vector<2x32xf32>,
    return
  }
  func.func @transform_0(%arg0: i32) -> (i32, i32) {
    %c0_i32 = arith.constant 0 : i32
    %c0_i32_0 = arith.constant 0 : i32
    %c0_i32_1 = arith.constant 0 : i32
    return %c0_i32, %c0_i32_0 : i32, i32
  }
  func.func @transform_1(%arg0: i32) -> (i32, i32) {
    %c0_i32 = arith.constant 0 : i32
    %c0_i32_0 = arith.constant 0 : i32
    %c0_i32_1 = arith.constant 0 : i32
    return %c0_i32, %c0_i32_0 : i32, i32
  }
  func.func @transform_2(%arg0: i32) -> (i32, i32) {
    %c0_i32 = arith.constant 0 : i32
    %c0_i32_0 = arith.constant 0 : i32
    %c0_i32_1 = arith.constant 0 : i32
    return %c0_i32, %c0_i32_0 : i32, i32
  }
  func.func @transform_3(%arg0: i32) -> (i32, i32) {
    %c0_i32 = arith.constant 0 : i32
    %c0_i32_0 = arith.constant 0 : i32
    %c0_i32_1 = arith.constant 0 : i32
    return %c0_i32, %c0_i32_0 : i32, i32
  }
  func.func @transform_4(%arg0: i32) -> (i32, i32) {
    %c0_i32 = arith.constant 0 : i32
    %c0_i32_0 = arith.constant 0 : i32
    %c0_i32_1 = arith.constant 0 : i32
    return %c0_i32, %c0_i32_0 : i32, i32
  }
  func.func @transform_5(%arg0: i32) -> (i32, i32) {
    %c0_i32 = arith.constant 0 : i32
    %c0_i32_0 = arith.constant 0 : i32
    %c0_i32_1 = arith.constant 0 : i32
    return %c0_i32, %c0_i32_0 : i32, i32
  }
  func.func @transform_6(%arg0: i32) -> (i32, i32) {
    %c0_i32 = arith.constant 0 : i32
    %c0_i32_0 = arith.constant 0 : i32
    %c0_i32_1 = arith.constant 0 : i32
    return %c0_i32, %c0_i32_0 : i32, i32
  }
  func.func @transform_7(%arg0: i32) -> (i32, i32) {
    %c0_i32 = arith.constant 0 : i32
    %c0_i32_0 = arith.constant 0 : i32
    %c0_i32_1 = arith.constant 0 : i32
    return %c0_i32, %c0_i32_0 : i32, i32
  }
}

module attributes {stable_mosaic.version = 11 : i64} {
  func.func @_fc_chain_kernel(%arg0: i32, %arg1: memref<2x32xbf16, #tpu.memory_space<vmem>>, %arg2: memref<32x64xbf16, #tpu.memory_space<vmem>>, %arg3: memref<1x64xf32, #tpu.memory_space<vmem>>, %arg4: memref<64x256xbf16, #tpu.memory_space<vmem>>, %arg5: memref<1x256xf32, #tpu.memory_space<vmem>>, %arg6: memref<2x256xf32, #tpu.memory_space<vmem>>) attributes {dimension_semantics = [#tpu.dimension_semantics<arbitrary>], iteration_bounds = array<i64: 1>, scalar_prefetch = 0 : i64, scratch_operands = 0 : i64, tpu.core_type = #tpu.core_type<tc>, window_params = [{pipeline_mode = #tpu.pipeline_mode<synchronous>, transform_indices = @transform_0, window_bounds = array<i64: 2, 32>}, {pipeline_mode = #tpu.pipeline_mode<synchronous>, transform_indices = @transform_1, window_bounds = array<i64: 32, 64>}, {pipeline_mode = #tpu.pipeline_mode<synchronous>, transform_indices = @transform_2, window_bounds = array<i64: 1, 64>}, {pipeline_mode = #tpu.pipeline_mode<synchronous>, transform_indices = @transform_3, window_bounds = array<i64: 64, 256>}, {pipeline_mode = #tpu.pipeline_mode<synchronous>, transform_indices = @transform_4, window_bounds = array<i64: 1, 256>}, {pipeline_mode = #tpu.pipeline_mode<synchronous>, transform_indices = @transform_5, window_bounds = array<i64: 2, 256>}]} {
    %c0 = arith.constant 0 : index
    %c0_0 = arith.constant 0 : index
    %0 = vector.load %arg1[%c0, %c0_0] : memref<2x32xbf16, #tpu.memory_space<vmem>>, vector<2x32xbf16>
    %c0_1 = arith.constant 0 : index
    %c0_2 = arith.constant 0 : index
    %1 = vector.load %arg2[%c0_1, %c0_2] : memref<32x64xbf16, #tpu.memory_space<vmem>>, vector<32x64xbf16>
    %cst = arith.constant dense<0.000000e+00> : vector<2x64xf32>
    %2 = tpu.matmul %0, %1, %cst {dimension_numbers = #tpu.dot_dimension_numbers<[1], [0], [0], [1], [0, 0, 1, 1], [], []>} : vector<2x32xbf16>, vector<32x64xbf16>, vector<2x64xf32> -> vector<2x64xf32>
    %c0_3 = arith.constant 0 : index
    %c0_4 = arith.constant 0 : index
    %3 = vector.load %arg3[%c0_3, %c0_4] : memref<1x64xf32, #tpu.memory_space<vmem>>, vector<1x64xf32>
    %4 = vector.broadcast %3 : vector<1x64xf32> to vector<2x64xf32>
    %5 = arith.addf %2, %4 : vector<2x64xf32>
    %cst_5 = arith.constant 0.000000e+00 : f32
    %6 = vector.broadcast %cst_5 : f32 to vector<2x64xf32>
    %7 = arith.maximumf %5, %6 : vector<2x64xf32>
    %8 = arith.truncf %7 : vector<2x64xf32> to vector<2x64xbf16>
    %c0_6 = arith.constant 0 : index
    %c0_7 = arith.constant 0 : index
    %9 = vector.load %arg4[%c0_6, %c0_7] : memref<64x256xbf16, #tpu.memory_space<vmem>>, vector<64x256xbf16>
    %cst_8 = arith.constant dense<0.000000e+00> : vector<2x256xf32>
    %10 = tpu.matmul %8, %9, %cst_8 {dimension_numbers = #tpu.dot_dimension_numbers<[1], [0], [0], [1], [0, 0, 1, 1], [], []>} : vector<2x64xbf16>, vector<64x256xbf16>, vector<2x256xf32> -> vector<2x256xf32>
    %c0_9 = arith.constant 0 : index
    %c0_10 = arith.constant 0 : index
    %11 = vector.load %arg5[%c0_9, %c0_10] : memref<1x256xf32, #tpu.memory_space<vmem>>, vector<1x256xf32>
    %12 = vector.broadcast %11 : vector<1x256xf32> to vector<2x256xf32>
    %13 = arith.addf %10, %12 : vector<2x256xf32>
    %cst_11 = arith.constant 0.000000e+00 : f32
    %14 = vector.broadcast %cst_11 : f32 to vector<2x256xf32>
    %15 = arith.maximumf %13, %14 : vector<2x256xf32>
    %c0_12 = arith.constant 0 : index
    %c0_13 = arith.constant 0 : index
    %16 = vector.load %arg6[%c0_12, %c0_13] : memref<2x256xf32, #tpu.memory_space<vmem>>, vector<2x256xf32>
    tpu.vector_store %arg6[%c0_12, %c0_13], %15 {strides = array<i32>} : memref<2x256xf32, #tpu.memory_space<vmem>>, vector<2x256xf32>,
    return
  }
  func.func @transform_0(%arg0: i32) -> (i32, i32) {
    %c0_i32 = arith.constant 0 : i32
    %c0_i32_0 = arith.constant 0 : i32
    %c0_i32_1 = arith.constant 0 : i32
    return %c0_i32, %c0_i32_0 : i32, i32
  }
  func.func @transform_1(%arg0: i32) -> (i32, i32) {
    %c0_i32 = arith.constant 0 : i32
    %c0_i32_0 = arith.constant 0 : i32
    %c0_i32_1 = arith.constant 0 : i32
    return %c0_i32, %c0_i32_0 : i32, i32
  }
  func.func @transform_2(%arg0: i32) -> (i32, i32) {
    %c0_i32 = arith.constant 0 : i32
    %c0_i32_0 = arith.constant 0 : i32
    %c0_i32_1 = arith.constant 0 : i32
    return %c0_i32, %c0_i32_0 : i32, i32
  }
  func.func @transform_3(%arg0: i32) -> (i32, i32) {
    %c0_i32 = arith.constant 0 : i32
    %c0_i32_0 = arith.constant 0 : i32
    %c0_i32_1 = arith.constant 0 : i32
    return %c0_i32, %c0_i32_0 : i32, i32
  }
  func.func @transform_4(%arg0: i32) -> (i32, i32) {
    %c0_i32 = arith.constant 0 : i32
    %c0_i32_0 = arith.constant 0 : i32
    %c0_i32_1 = arith.constant 0 : i32
    return %c0_i32, %c0_i32_0 : i32, i32
  }
  func.func @transform_5(%arg0: i32) -> (i32, i32) {
    %c0_i32 = arith.constant 0 : i32
    %c0_i32_0 = arith.constant 0 : i32
    %c0_i32_1 = arith.constant 0 : i32
    return %c0_i32, %c0_i32_0 : i32, i32
  }
}

module attributes {stable_mosaic.version = 11 : i64} {
  func.func @_gemm_bn_relu_kernel(%arg0: i32, %arg1: memref<4x32x64xbf16, #tpu.memory_space<vmem>>, %arg2: memref<4x64x8xbf16, #tpu.memory_space<vmem>>, %arg3: memref<1x8xf32, #tpu.memory_space<vmem>>, %arg4: memref<1x8xf32, #tpu.memory_space<vmem>>, %arg5: memref<1x8xf32, #tpu.memory_space<vmem>>, %arg6: memref<4x32x8xf32, #tpu.memory_space<vmem>>) attributes {dimension_semantics = [#tpu.dimension_semantics<arbitrary>], iteration_bounds = array<i64: 1>, scalar_prefetch = 0 : i64, scratch_operands = 0 : i64, tpu.core_type = #tpu.core_type<tc>, window_params = [{pipeline_mode = #tpu.pipeline_mode<synchronous>, transform_indices = @transform_0, window_bounds = array<i64: 4, 32, 64>}, {pipeline_mode = #tpu.pipeline_mode<synchronous>, transform_indices = @transform_1, window_bounds = array<i64: 4, 64, 8>}, {pipeline_mode = #tpu.pipeline_mode<synchronous>, transform_indices = @transform_2, window_bounds = array<i64: 1, 8>}, {pipeline_mode = #tpu.pipeline_mode<synchronous>, transform_indices = @transform_3, window_bounds = array<i64: 1, 8>}, {pipeline_mode = #tpu.pipeline_mode<synchronous>, transform_indices = @transform_4, window_bounds = array<i64: 1, 8>}, {pipeline_mode = #tpu.pipeline_mode<synchronous>, transform_indices = @transform_5, window_bounds = array<i64: 4, 32, 8>}]} {
    %cst = arith.constant 0.000000e+00 : f32
    %0 = vector.broadcast %cst : f32 to vector<1x8xf32>
    %cst_0 = arith.constant 0.000000e+00 : f32
    %1 = vector.broadcast %cst_0 : f32 to vector<1x8xf32>
    %c0 = arith.constant 0 : index
    %c0_1 = arith.constant 0 : index
    %c0_2 = arith.constant 0 : index
    %2 = vector.load %arg1[%c0, %c0_1, %c0_2] : memref<4x32x64xbf16, #tpu.memory_space<vmem>>, vector<1x32x64xbf16>
    %3 = vector.shape_cast %2 : vector<1x32x64xbf16> to vector<32x64xbf16>
    %c0_3 = arith.constant 0 : index
    %c0_4 = arith.constant 0 : index
    %c0_5 = arith.constant 0 : index
    %4 = vector.load %arg2[%c0_3, %c0_4, %c0_5] : memref<4x64x8xbf16, #tpu.memory_space<vmem>>, vector<1x64x8xbf16>
    %5 = vector.shape_cast %4 : vector<1x64x8xbf16> to vector<64x8xbf16>
    %cst_6 = arith.constant dense<0.000000e+00> : vector<32x8xf32>
    %6 = tpu.matmul %3, %5, %cst_6 {dimension_numbers = #tpu.dot_dimension_numbers<[1], [0], [0], [1], [0, 0, 1, 1], [], []>} : vector<32x64xbf16>, vector<64x8xbf16>, vector<32x8xf32> -> vector<32x8xf32>
    %c0_7 = arith.constant 0 : index
    %c0_8 = arith.constant 0 : index
    %7 = vector.load %arg3[%c0_7, %c0_8] : memref<1x8xf32, #tpu.memory_space<vmem>>, vector<1x8xf32>
    %8 = vector.broadcast %7 : vector<1x8xf32> to vector<32x8xf32>
    %9 = arith.addf %6, %8 : vector<32x8xf32>
    %cst_9 = arith.constant dense<0.000000e+00> : vector<8xf32>
    %10 = vector.multi_reduction <add>, %9, %cst_9 [0] : vector<32x8xf32> to vector<8xf32>
    %11 = vector.shape_cast %10 : vector<8xf32> to vector<1x8xf32>
    %12 = arith.addf %0, %11 : vector<1x8xf32>
    %13 = arith.mulf %9, %9 : vector<32x8xf32>
    %cst_10 = arith.constant dense<0.000000e+00> : vector<8xf32>
    %14 = vector.multi_reduction <add>, %13, %cst_10 [0] : vector<32x8xf32> to vector<8xf32>
    %15 = vector.shape_cast %14 : vector<8xf32> to vector<1x8xf32>
    %16 = arith.addf %1, %15 : vector<1x8xf32>
    %c1 = arith.constant 1 : index
    %c0_11 = arith.constant 0 : index
    %c0_12 = arith.constant 0 : index
    %17 = vector.load %arg1[%c1, %c0_11, %c0_12] : memref<4x32x64xbf16, #tpu.memory_space<vmem>>, vector<1x32x64xbf16>
    %18 = vector.shape_cast %17 : vector<1x32x64xbf16> to vector<32x64xbf16>
    %c1_13 = arith.constant 1 : index
    %c0_14 = arith.constant 0 : index
    %c0_15 = arith.constant 0 : index
    %19 = vector.load %arg2[%c1_13, %c0_14, %c0_15] : memref<4x64x8xbf16, #tpu.memory_space<vmem>>, vector<1x64x8xbf16>
    %20 = vector.shape_cast %19 : vector<1x64x8xbf16> to vector<64x8xbf16>
    %cst_16 = arith.constant dense<0.000000e+00> : vector<32x8xf32>
    %21 = tpu.matmul %18, %20, %cst_16 {dimension_numbers = #tpu.dot_dimension_numbers<[1], [0], [0], [1], [0, 0, 1, 1], [], []>} : vector<32x64xbf16>, vector<64x8xbf16>, vector<32x8xf32> -> vector<32x8xf32>
    %c0_17 = arith.constant 0 : index
    %c0_18 = arith.constant 0 : index
    %22 = vector.load %arg3[%c0_17, %c0_18] : memref<1x8xf32, #tpu.memory_space<vmem>>, vector<1x8xf32>
    %23 = vector.broadcast %22 : vector<1x8xf32> to vector<32x8xf32>
    %24 = arith.addf %21, %23 : vector<32x8xf32>
    %cst_19 = arith.constant dense<0.000000e+00> : vector<8xf32>
    %25 = vector.multi_reduction <add>, %24, %cst_19 [0] : vector<32x8xf32> to vector<8xf32>
    %26 = vector.shape_cast %25 : vector<8xf32> to vector<1x8xf32>
    %27 = arith.addf %12, %26 : vector<1x8xf32>
    %28 = arith.mulf %24, %24 : vector<32x8xf32>
    %cst_20 = arith.constant dense<0.000000e+00> : vector<8xf32>
    %29 = vector.multi_reduction <add>, %28, %cst_20 [0] : vector<32x8xf32> to vector<8xf32>
    %30 = vector.shape_cast %29 : vector<8xf32> to vector<1x8xf32>
    %31 = arith.addf %16, %30 : vector<1x8xf32>
    %c2 = arith.constant 2 : index
    %c0_21 = arith.constant 0 : index
    %c0_22 = arith.constant 0 : index
    %32 = vector.load %arg1[%c2, %c0_21, %c0_22] : memref<4x32x64xbf16, #tpu.memory_space<vmem>>, vector<1x32x64xbf16>
    %33 = vector.shape_cast %32 : vector<1x32x64xbf16> to vector<32x64xbf16>
    %c2_23 = arith.constant 2 : index
    %c0_24 = arith.constant 0 : index
    %c0_25 = arith.constant 0 : index
    %34 = vector.load %arg2[%c2_23, %c0_24, %c0_25] : memref<4x64x8xbf16, #tpu.memory_space<vmem>>, vector<1x64x8xbf16>
    %35 = vector.shape_cast %34 : vector<1x64x8xbf16> to vector<64x8xbf16>
    %cst_26 = arith.constant dense<0.000000e+00> : vector<32x8xf32>
    %36 = tpu.matmul %33, %35, %cst_26 {dimension_numbers = #tpu.dot_dimension_numbers<[1], [0], [0], [1], [0, 0, 1, 1], [], []>} : vector<32x64xbf16>, vector<64x8xbf16>, vector<32x8xf32> -> vector<32x8xf32>
    %c0_27 = arith.constant 0 : index
    %c0_28 = arith.constant 0 : index
    %37 = vector.load %arg3[%c0_27, %c0_28] : memref<1x8xf32, #tpu.memory_space<vmem>>, vector<1x8xf32>
    %38 = vector.broadcast %37 : vector<1x8xf32> to vector<32x8xf32>
    %39 = arith.addf %36, %38 : vector<32x8xf32>
    %cst_29 = arith.constant dense<0.000000e+00> : vector<8xf32>
    %40 = vector.multi_reduction <add>, %39, %cst_29 [0] : vector<32x8xf32> to vector<8xf32>
    %41 = vector.shape_cast %40 : vector<8xf32> to vector<1x8xf32>
    %42 = arith.addf %27, %41 : vector<1x8xf32>
    %43 = arith.mulf %39, %39 : vector<32x8xf32>
    %cst_30 = arith.constant dense<0.000000e+00> : vector<8xf32>
    %44 = vector.multi_reduction <add>, %43, %cst_30 [0] : vector<32x8xf32> to vector<8xf32>
    %45 = vector.shape_cast %44 : vector<8xf32> to vector<1x8xf32>
    %46 = arith.addf %31, %45 : vector<1x8xf32>
    %c3 = arith.constant 3 : index
    %c0_31 = arith.constant 0 : index
    %c0_32 = arith.constant 0 : index
    %47 = vector.load %arg1[%c3, %c0_31, %c0_32] : memref<4x32x64xbf16, #tpu.memory_space<vmem>>, vector<1x32x64xbf16>
    %48 = vector.shape_cast %47 : vector<1x32x64xbf16> to vector<32x64xbf16>
    %c3_33 = arith.constant 3 : index
    %c0_34 = arith.constant 0 : index
    %c0_35 = arith.constant 0 : index
    %49 = vector.load %arg2[%c3_33, %c0_34, %c0_35] : memref<4x64x8xbf16, #tpu.memory_space<vmem>>, vector<1x64x8xbf16>
    %50 = vector.shape_cast %49 : vector<1x64x8xbf16> to vector<64x8xbf16>
    %cst_36 = arith.constant dense<0.000000e+00> : vector<32x8xf32>
    %51 = tpu.matmul %48, %50, %cst_36 {dimension_numbers = #tpu.dot_dimension_numbers<[1], [0], [0], [1], [0, 0, 1, 1], [], []>} : vector<32x64xbf16>, vector<64x8xbf16>, vector<32x8xf32> -> vector<32x8xf32>
    %c0_37 = arith.constant 0 : index
    %c0_38 = arith.constant 0 : index
    %52 = vector.load %arg3[%c0_37, %c0_38] : memref<1x8xf32, #tpu.memory_space<vmem>>, vector<1x8xf32>
    %53 = vector.broadcast %52 : vector<1x8xf32> to vector<32x8xf32>
    %54 = arith.addf %51, %53 : vector<32x8xf32>
    %cst_39 = arith.constant dense<0.000000e+00> : vector<8xf32>
    %55 = vector.multi_reduction <add>, %54, %cst_39 [0] : vector<32x8xf32> to vector<8xf32>
    %56 = vector.shape_cast %55 : vector<8xf32> to vector<1x8xf32>
    %57 = arith.addf %42, %56 : vector<1x8xf32>
    %58 = arith.mulf %54, %54 : vector<32x8xf32>
    %cst_40 = arith.constant dense<0.000000e+00> : vector<8xf32>
    %59 = vector.multi_reduction <add>, %58, %cst_40 [0] : vector<32x8xf32> to vector<8xf32>
    %60 = vector.shape_cast %59 : vector<8xf32> to vector<1x8xf32>
    %61 = arith.addf %46, %60 : vector<1x8xf32>
    %cst_41 = arith.constant 7.812500e-03 : f32
    %62 = vector.broadcast %cst_41 : f32 to vector<1x8xf32>
    %63 = arith.mulf %57, %62 : vector<1x8xf32>
    %cst_42 = arith.constant 7.812500e-03 : f32
    %64 = vector.broadcast %cst_42 : f32 to vector<1x8xf32>
    %65 = arith.mulf %61, %64 : vector<1x8xf32>
    %66 = arith.mulf %63, %63 : vector<1x8xf32>
    %67 = arith.subf %65, %66 : vector<1x8xf32>
    %cst_43 = arith.constant 0.000000e+00 : f32
    %68 = vector.broadcast %cst_43 : f32 to vector<1x8xf32>
    %69 = arith.maximumf %67, %68 : vector<1x8xf32>
    %c0_44 = arith.constant 0 : index
    %c0_45 = arith.constant 0 : index
    %70 = vector.load %arg4[%c0_44, %c0_45] : memref<1x8xf32, #tpu.memory_space<vmem>>, vector<1x8xf32>
    %cst_46 = arith.constant 9.99999974E-6 : f32
    %71 = vector.broadcast %cst_46 : f32 to vector<1x8xf32>
    %72 = arith.addf %69, %71 : vector<1x8xf32>
    %73 = math.rsqrt %72 : vector<1x8xf32>
    %74 = arith.mulf %70, %73 : vector<1x8xf32>
    %c0_47 = arith.constant 0 : index
    %c0_48 = arith.constant 0 : index
    %75 = vector.load %arg5[%c0_47, %c0_48] : memref<1x8xf32, #tpu.memory_space<vmem>>, vector<1x8xf32>
    %76 = arith.mulf %63, %74 : vector<1x8xf32>
    %77 = arith.subf %75, %76 : vector<1x8xf32>
    %78 = vector.broadcast %74 : vector<1x8xf32> to vector<32x8xf32>
    %79 = arith.mulf %9, %78 : vector<32x8xf32>
    %80 = vector.broadcast %77 : vector<1x8xf32> to vector<32x8xf32>
    %81 = arith.addf %79, %80 : vector<32x8xf32>
    %cst_49 = arith.constant 0.000000e+00 : f32
    %82 = vector.broadcast %cst_49 : f32 to vector<32x8xf32>
    %83 = arith.maximumf %81, %82 : vector<32x8xf32>
    %c0_50 = arith.constant 0 : index
    %c0_51 = arith.constant 0 : index
    %c0_52 = arith.constant 0 : index
    %84 = vector.load %arg6[%c0_50, %c0_51, %c0_52] : memref<4x32x8xf32, #tpu.memory_space<vmem>>, vector<1x32x8xf32>
    %85 = vector.shape_cast %84 : vector<1x32x8xf32> to vector<32x8xf32>
    %86 = vector.shape_cast %83 : vector<32x8xf32> to vector<1x32x8xf32>
    tpu.vector_store %arg6[%c0_50, %c0_51, %c0_52], %86 {strides = array<i32>} : memref<4x32x8xf32, #tpu.memory_space<vmem>>, vector<1x32x8xf32>,
    %87 = vector.broadcast %74 : vector<1x8xf32> to vector<32x8xf32>
    %88 = arith.mulf %24, %87 : vector<32x8xf32>
    %89 = vector.broadcast %77 : vector<1x8xf32> to vector<32x8xf32>
    %90 = arith.addf %88, %89 : vector<32x8xf32>
    %cst_53 = arith.constant 0.000000e+00 : f32
    %91 = vector.broadcast %cst_53 : f32 to vector<32x8xf32>
    %92 = arith.maximumf %90, %91 : vector<32x8xf32>
    %c1_54 = arith.constant 1 : index
    %c0_55 = arith.constant 0 : index
    %c0_56 = arith.constant 0 : index
    %93 = vector.load %arg6[%c1_54, %c0_55, %c0_56] : memref<4x32x8xf32, #tpu.memory_space<vmem>>, vector<1x32x8xf32>
    %94 = vector.shape_cast %93 : vector<1x32x8xf32> to vector<32x8xf32>
    %95 = vector.shape_cast %92 : vector<32x8xf32> to vector<1x32x8xf32>
    tpu.vector_store %arg6[%c1_54, %c0_55, %c0_56], %95 {strides = array<i32>} : memref<4x32x8xf32, #tpu.memory_space<vmem>>, vector<1x32x8xf32>,
    %96 = vector.broadcast %74 : vector<1x8xf32> to vector<32x8xf32>
    %97 = arith.mulf %39, %96 : vector<32x8xf32>
    %98 = vector.broadcast %77 : vector<1x8xf32> to vector<32x8xf32>
    %99 = arith.addf %97, %98 : vector<32x8xf32>
    %cst_57 = arith.constant 0.000000e+00 : f32
    %100 = vector.broadcast %cst_57 : f32 to vector<32x8xf32>
    %101 = arith.maximumf %99, %100 : vector<32x8xf32>
    %c2_58 = arith.constant 2 : index
    %c0_59 = arith.constant 0 : index
    %c0_60 = arith.constant 0 : index
    %102 = vector.load %arg6[%c2_58, %c0_59, %c0_60] : memref<4x32x8xf32, #tpu.memory_space<vmem>>, vector<1x32x8xf32>
    %103 = vector.shape_cast %102 : vector<1x32x8xf32> to vector<32x8xf32>
    %104 = vector.shape_cast %101 : vector<32x8xf32> to vector<1x32x8xf32>
    tpu.vector_store %arg6[%c2_58, %c0_59, %c0_60], %104 {strides = array<i32>} : memref<4x32x8xf32, #tpu.memory_space<vmem>>, vector<1x32x8xf32>,
    %105 = vector.broadcast %74 : vector<1x8xf32> to vector<32x8xf32>
    %106 = arith.mulf %54, %105 : vector<32x8xf32>
    %107 = vector.broadcast %77 : vector<1x8xf32> to vector<32x8xf32>
    %108 = arith.addf %106, %107 : vector<32x8xf32>
    %cst_61 = arith.constant 0.000000e+00 : f32
    %109 = vector.broadcast %cst_61 : f32 to vector<32x8xf32>
    %110 = arith.maximumf %108, %109 : vector<32x8xf32>
    %c3_62 = arith.constant 3 : index
    %c0_63 = arith.constant 0 : index
    %c0_64 = arith.constant 0 : index
    %111 = vector.load %arg6[%c3_62, %c0_63, %c0_64] : memref<4x32x8xf32, #tpu.memory_space<vmem>>, vector<1x32x8xf32>
    %112 = vector.shape_cast %111 : vector<1x32x8xf32> to vector<32x8xf32>
    %113 = vector.shape_cast %110 : vector<32x8xf32> to vector<1x32x8xf32>
    tpu.vector_store %arg6[%c3_62, %c0_63, %c0_64], %113 {strides = array<i32>} : memref<4x32x8xf32, #tpu.memory_space<vmem>>, vector<1x32x8xf32>,
    return
  }
  func.func @transform_0(%arg0: i32) -> (i32, i32, i32) {
    %c0_i32 = arith.constant 0 : i32
    %c0_i32_0 = arith.constant 0 : i32
    %c0_i32_1 = arith.constant 0 : i32
    %c0_i32_2 = arith.constant 0 : i32
    return %c0_i32, %c0_i32_0, %c0_i32_1 : i32, i32, i32
  }
  func.func @transform_1(%arg0: i32) -> (i32, i32, i32) {
    %c0_i32 = arith.constant 0 : i32
    %c0_i32_0 = arith.constant 0 : i32
    %c0_i32_1 = arith.constant 0 : i32
    %c0_i32_2 = arith.constant 0 : i32
    return %c0_i32, %c0_i32_0, %c0_i32_1 : i32, i32, i32
  }
  func.func @transform_2(%arg0: i32) -> (i32, i32) {
    %c0_i32 = arith.constant 0 : i32
    %c0_i32_0 = arith.constant 0 : i32
    %c0_i32_1 = arith.constant 0 : i32
    return %c0_i32, %c0_i32_0 : i32, i32
  }
  func.func @transform_3(%arg0: i32) -> (i32, i32) {
    %c0_i32 = arith.constant 0 : i32
    %c0_i32_0 = arith.constant 0 : i32
    %c0_i32_1 = arith.constant 0 : i32
    return %c0_i32, %c0_i32_0 : i32, i32
  }
  func.func @transform_4(%arg0: i32) -> (i32, i32) {
    %c0_i32 = arith.constant 0 : i32
    %c0_i32_0 = arith.constant 0 : i32
    %c0_i32_1 = arith.constant 0 : i32
    return %c0_i32, %c0_i32_0 : i32, i32
  }
  func.func @transform_5(%arg0: i32) -> (i32, i32, i32) {
    %c0_i32 = arith.constant 0 : i32
    %c0_i32_0 = arith.constant 0 : i32
    %c0_i32_1 = arith.constant 0 : i32
    %c0_i32_2 = arith.constant 0 : i32
    return %c0_i32, %c0_i32_0, %c0_i32_1 : i32, i32, i32
  }
}

module attributes {stable_mosaic.version = 11 : i64} {
  func.func @_gemm_bn_relu_kernel(%arg0: i32, %arg1: memref<4x128x32xbf16, #tpu.memory_space<vmem>>, %arg2: memref<4x32x4xbf16, #tpu.memory_space<vmem>>, %arg3: memref<1x4xf32, #tpu.memory_space<vmem>>, %arg4: memref<1x4xf32, #tpu.memory_space<vmem>>, %arg5: memref<1x4xf32, #tpu.memory_space<vmem>>, %arg6: memref<4x128x4xf32, #tpu.memory_space<vmem>>) attributes {dimension_semantics = [#tpu.dimension_semantics<arbitrary>], iteration_bounds = array<i64: 1>, scalar_prefetch = 0 : i64, scratch_operands = 0 : i64, tpu.core_type = #tpu.core_type<tc>, window_params = [{pipeline_mode = #tpu.pipeline_mode<synchronous>, transform_indices = @transform_0, window_bounds = array<i64: 4, 128, 32>}, {pipeline_mode = #tpu.pipeline_mode<synchronous>, transform_indices = @transform_1, window_bounds = array<i64: 4, 32, 4>}, {pipeline_mode = #tpu.pipeline_mode<synchronous>, transform_indices = @transform_2, window_bounds = array<i64: 1, 4>}, {pipeline_mode = #tpu.pipeline_mode<synchronous>, transform_indices = @transform_3, window_bounds = array<i64: 1, 4>}, {pipeline_mode = #tpu.pipeline_mode<synchronous>, transform_indices = @transform_4, window_bounds = array<i64: 1, 4>}, {pipeline_mode = #tpu.pipeline_mode<synchronous>, transform_indices = @transform_5, window_bounds = array<i64: 4, 128, 4>}]} {
    %cst = arith.constant 0.000000e+00 : f32
    %0 = vector.broadcast %cst : f32 to vector<1x4xf32>
    %cst_0 = arith.constant 0.000000e+00 : f32
    %1 = vector.broadcast %cst_0 : f32 to vector<1x4xf32>
    %c0 = arith.constant 0 : index
    %c0_1 = arith.constant 0 : index
    %c0_2 = arith.constant 0 : index
    %2 = vector.load %arg1[%c0, %c0_1, %c0_2] : memref<4x128x32xbf16, #tpu.memory_space<vmem>>, vector<1x128x32xbf16>
    %3 = vector.shape_cast %2 : vector<1x128x32xbf16> to vector<128x32xbf16>
    %c0_3 = arith.constant 0 : index
    %c0_4 = arith.constant 0 : index
    %c0_5 = arith.constant 0 : index
    %4 = vector.load %arg2[%c0_3, %c0_4, %c0_5] : memref<4x32x4xbf16, #tpu.memory_space<vmem>>, vector<1x32x4xbf16>
    %5 = vector.shape_cast %4 : vector<1x32x4xbf16> to vector<32x4xbf16>
    %cst_6 = arith.constant dense<0.000000e+00> : vector<128x4xf32>
    %6 = tpu.matmul %3, %5, %cst_6 {dimension_numbers = #tpu.dot_dimension_numbers<[1], [0], [0], [1], [0, 0, 1, 1], [], []>} : vector<128x32xbf16>, vector<32x4xbf16>, vector<128x4xf32> -> vector<128x4xf32>
    %c0_7 = arith.constant 0 : index
    %c0_8 = arith.constant 0 : index
    %7 = vector.load %arg3[%c0_7, %c0_8] : memref<1x4xf32, #tpu.memory_space<vmem>>, vector<1x4xf32>
    %8 = vector.broadcast %7 : vector<1x4xf32> to vector<128x4xf32>
    %9 = arith.addf %6, %8 : vector<128x4xf32>
    %cst_9 = arith.constant dense<0.000000e+00> : vector<4xf32>
    %10 = vector.multi_reduction <add>, %9, %cst_9 [0] : vector<128x4xf32> to vector<4xf32>
    %11 = vector.shape_cast %10 : vector<4xf32> to vector<1x4xf32>
    %12 = arith.addf %0, %11 : vector<1x4xf32>
    %13 = arith.mulf %9, %9 : vector<128x4xf32>
    %cst_10 = arith.constant dense<0.000000e+00> : vector<4xf32>
    %14 = vector.multi_reduction <add>, %13, %cst_10 [0] : vector<128x4xf32> to vector<4xf32>
    %15 = vector.shape_cast %14 : vector<4xf32> to vector<1x4xf32>
    %16 = arith.addf %1, %15 : vector<1x4xf32>
    %c1 = arith.constant 1 : index
    %c0_11 = arith.constant 0 : index
    %c0_12 = arith.constant 0 : index
    %17 = vector.load %arg1[%c1, %c0_11, %c0_12] : memref<4x128x32xbf16, #tpu.memory_space<vmem>>, vector<1x128x32xbf16>
    %18 = vector.shape_cast %17 : vector<1x128x32xbf16> to vector<128x32xbf16>
    %c1_13 = arith.constant 1 : index
    %c0_14 = arith.constant 0 : index
    %c0_15 = arith.constant 0 : index
    %19 = vector.load %arg2[%c1_13, %c0_14, %c0_15] : memref<4x32x4xbf16, #tpu.memory_space<vmem>>, vector<1x32x4xbf16>
    %20 = vector.shape_cast %19 : vector<1x32x4xbf16> to vector<32x4xbf16>
    %cst_16 = arith.constant dense<0.000000e+00> : vector<128x4xf32>
    %21 = tpu.matmul %18, %20, %cst_16 {dimension_numbers = #tpu.dot_dimension_numbers<[1], [0], [0], [1], [0, 0, 1, 1], [], []>} : vector<128x32xbf16>, vector<32x4xbf16>, vector<128x4xf32> -> vector<128x4xf32>
    %c0_17 = arith.constant 0 : index
    %c0_18 = arith.constant 0 : index
    %22 = vector.load %arg3[%c0_17, %c0_18] : memref<1x4xf32, #tpu.memory_space<vmem>>, vector<1x4xf32>
    %23 = vector.broadcast %22 : vector<1x4xf32> to vector<128x4xf32>
    %24 = arith.addf %21, %23 : vector<128x4xf32>
    %cst_19 = arith.constant dense<0.000000e+00> : vector<4xf32>
    %25 = vector.multi_reduction <add>, %24, %cst_19 [0] : vector<128x4xf32> to vector<4xf32>
    %26 = vector.shape_cast %25 : vector<4xf32> to vector<1x4xf32>
    %27 = arith.addf %12, %26 : vector<1x4xf32>
    %28 = arith.mulf %24, %24 : vector<128x4xf32>
    %cst_20 = arith.constant dense<0.000000e+00> : vector<4xf32>
    %29 = vector.multi_reduction <add>, %28, %cst_20 [0] : vector<128x4xf32> to vector<4xf32>
    %30 = vector.shape_cast %29 : vector<4xf32> to vector<1x4xf32>
    %31 = arith.addf %16, %30 : vector<1x4xf32>
    %c2 = arith.constant 2 : index
    %c0_21 = arith.constant 0 : index
    %c0_22 = arith.constant 0 : index
    %32 = vector.load %arg1[%c2, %c0_21, %c0_22] : memref<4x128x32xbf16, #tpu.memory_space<vmem>>, vector<1x128x32xbf16>
    %33 = vector.shape_cast %32 : vector<1x128x32xbf16> to vector<128x32xbf16>
    %c2_23 = arith.constant 2 : index
    %c0_24 = arith.constant 0 : index
    %c0_25 = arith.constant 0 : index
    %34 = vector.load %arg2[%c2_23, %c0_24, %c0_25] : memref<4x32x4xbf16, #tpu.memory_space<vmem>>, vector<1x32x4xbf16>
    %35 = vector.shape_cast %34 : vector<1x32x4xbf16> to vector<32x4xbf16>
    %cst_26 = arith.constant dense<0.000000e+00> : vector<128x4xf32>
    %36 = tpu.matmul %33, %35, %cst_26 {dimension_numbers = #tpu.dot_dimension_numbers<[1], [0], [0], [1], [0, 0, 1, 1], [], []>} : vector<128x32xbf16>, vector<32x4xbf16>, vector<128x4xf32> -> vector<128x4xf32>
    %c0_27 = arith.constant 0 : index
    %c0_28 = arith.constant 0 : index
    %37 = vector.load %arg3[%c0_27, %c0_28] : memref<1x4xf32, #tpu.memory_space<vmem>>, vector<1x4xf32>
    %38 = vector.broadcast %37 : vector<1x4xf32> to vector<128x4xf32>
    %39 = arith.addf %36, %38 : vector<128x4xf32>
    %cst_29 = arith.constant dense<0.000000e+00> : vector<4xf32>
    %40 = vector.multi_reduction <add>, %39, %cst_29 [0] : vector<128x4xf32> to vector<4xf32>
    %41 = vector.shape_cast %40 : vector<4xf32> to vector<1x4xf32>
    %42 = arith.addf %27, %41 : vector<1x4xf32>
    %43 = arith.mulf %39, %39 : vector<128x4xf32>
    %cst_30 = arith.constant dense<0.000000e+00> : vector<4xf32>
    %44 = vector.multi_reduction <add>, %43, %cst_30 [0] : vector<128x4xf32> to vector<4xf32>
    %45 = vector.shape_cast %44 : vector<4xf32> to vector<1x4xf32>
    %46 = arith.addf %31, %45 : vector<1x4xf32>
    %c3 = arith.constant 3 : index
    %c0_31 = arith.constant 0 : index
    %c0_32 = arith.constant 0 : index
    %47 = vector.load %arg1[%c3, %c0_31, %c0_32] : memref<4x128x32xbf16, #tpu.memory_space<vmem>>, vector<1x128x32xbf16>
    %48 = vector.shape_cast %47 : vector<1x128x32xbf16> to vector<128x32xbf16>
    %c3_33 = arith.constant 3 : index
    %c0_34 = arith.constant 0 : index
    %c0_35 = arith.constant 0 : index
    %49 = vector.load %arg2[%c3_33, %c0_34, %c0_35] : memref<4x32x4xbf16, #tpu.memory_space<vmem>>, vector<1x32x4xbf16>
    %50 = vector.shape_cast %49 : vector<1x32x4xbf16> to vector<32x4xbf16>
    %cst_36 = arith.constant dense<0.000000e+00> : vector<128x4xf32>
    %51 = tpu.matmul %48, %50, %cst_36 {dimension_numbers = #tpu.dot_dimension_numbers<[1], [0], [0], [1], [0, 0, 1, 1], [], []>} : vector<128x32xbf16>, vector<32x4xbf16>, vector<128x4xf32> -> vector<128x4xf32>
    %c0_37 = arith.constant 0 : index
    %c0_38 = arith.constant 0 : index
    %52 = vector.load %arg3[%c0_37, %c0_38] : memref<1x4xf32, #tpu.memory_space<vmem>>, vector<1x4xf32>
    %53 = vector.broadcast %52 : vector<1x4xf32> to vector<128x4xf32>
    %54 = arith.addf %51, %53 : vector<128x4xf32>
    %cst_39 = arith.constant dense<0.000000e+00> : vector<4xf32>
    %55 = vector.multi_reduction <add>, %54, %cst_39 [0] : vector<128x4xf32> to vector<4xf32>
    %56 = vector.shape_cast %55 : vector<4xf32> to vector<1x4xf32>
    %57 = arith.addf %42, %56 : vector<1x4xf32>
    %58 = arith.mulf %54, %54 : vector<128x4xf32>
    %cst_40 = arith.constant dense<0.000000e+00> : vector<4xf32>
    %59 = vector.multi_reduction <add>, %58, %cst_40 [0] : vector<128x4xf32> to vector<4xf32>
    %60 = vector.shape_cast %59 : vector<4xf32> to vector<1x4xf32>
    %61 = arith.addf %46, %60 : vector<1x4xf32>
    %cst_41 = arith.constant 0.001953125 : f32
    %62 = vector.broadcast %cst_41 : f32 to vector<1x4xf32>
    %63 = arith.mulf %57, %62 : vector<1x4xf32>
    %cst_42 = arith.constant 0.001953125 : f32
    %64 = vector.broadcast %cst_42 : f32 to vector<1x4xf32>
    %65 = arith.mulf %61, %64 : vector<1x4xf32>
    %66 = arith.mulf %63, %63 : vector<1x4xf32>
    %67 = arith.subf %65, %66 : vector<1x4xf32>
    %cst_43 = arith.constant 0.000000e+00 : f32
    %68 = vector.broadcast %cst_43 : f32 to vector<1x4xf32>
    %69 = arith.maximumf %67, %68 : vector<1x4xf32>
    %c0_44 = arith.constant 0 : index
    %c0_45 = arith.constant 0 : index
    %70 = vector.load %arg4[%c0_44, %c0_45] : memref<1x4xf32, #tpu.memory_space<vmem>>, vector<1x4xf32>
    %cst_46 = arith.constant 9.99999974E-6 : f32
    %71 = vector.broadcast %cst_46 : f32 to vector<1x4xf32>
    %72 = arith.addf %69, %71 : vector<1x4xf32>
    %73 = math.rsqrt %72 : vector<1x4xf32>
    %74 = arith.mulf %70, %73 : vector<1x4xf32>
    %c0_47 = arith.constant 0 : index
    %c0_48 = arith.constant 0 : index
    %75 = vector.load %arg5[%c0_47, %c0_48] : memref<1x4xf32, #tpu.memory_space<vmem>>, vector<1x4xf32>
    %76 = arith.mulf %63, %74 : vector<1x4xf32>
    %77 = arith.subf %75, %76 : vector<1x4xf32>
    %78 = vector.broadcast %74 : vector<1x4xf32> to vector<128x4xf32>
    %79 = arith.mulf %9, %78 : vector<128x4xf32>
    %80 = vector.broadcast %77 : vector<1x4xf32> to vector<128x4xf32>
    %81 = arith.addf %79, %80 : vector<128x4xf32>
    %cst_49 = arith.constant 0.000000e+00 : f32
    %82 = vector.broadcast %cst_49 : f32 to vector<128x4xf32>
    %83 = arith.maximumf %81, %82 : vector<128x4xf32>
    %c0_50 = arith.constant 0 : index
    %c0_51 = arith.constant 0 : index
    %c0_52 = arith.constant 0 : index
    %84 = vector.load %arg6[%c0_50, %c0_51, %c0_52] : memref<4x128x4xf32, #tpu.memory_space<vmem>>, vector<1x128x4xf32>
    %85 = vector.shape_cast %84 : vector<1x128x4xf32> to vector<128x4xf32>
    %86 = vector.shape_cast %83 : vector<128x4xf32> to vector<1x128x4xf32>
    tpu.vector_store %arg6[%c0_50, %c0_51, %c0_52], %86 {strides = array<i32>} : memref<4x128x4xf32, #tpu.memory_space<vmem>>, vector<1x128x4xf32>,
    %87 = vector.broadcast %74 : vector<1x4xf32> to vector<128x4xf32>
    %88 = arith.mulf %24, %87 : vector<128x4xf32>
    %89 = vector.broadcast %77 : vector<1x4xf32> to vector<128x4xf32>
    %90 = arith.addf %88, %89 : vector<128x4xf32>
    %cst_53 = arith.constant 0.000000e+00 : f32
    %91 = vector.broadcast %cst_53 : f32 to vector<128x4xf32>
    %92 = arith.maximumf %90, %91 : vector<128x4xf32>
    %c1_54 = arith.constant 1 : index
    %c0_55 = arith.constant 0 : index
    %c0_56 = arith.constant 0 : index
    %93 = vector.load %arg6[%c1_54, %c0_55, %c0_56] : memref<4x128x4xf32, #tpu.memory_space<vmem>>, vector<1x128x4xf32>
    %94 = vector.shape_cast %93 : vector<1x128x4xf32> to vector<128x4xf32>
    %95 = vector.shape_cast %92 : vector<128x4xf32> to vector<1x128x4xf32>
    tpu.vector_store %arg6[%c1_54, %c0_55, %c0_56], %95 {strides = array<i32>} : memref<4x128x4xf32, #tpu.memory_space<vmem>>, vector<1x128x4xf32>,
    %96 = vector.broadcast %74 : vector<1x4xf32> to vector<128x4xf32>
    %97 = arith.mulf %39, %96 : vector<128x4xf32>
    %98 = vector.broadcast %77 : vector<1x4xf32> to vector<128x4xf32>
    %99 = arith.addf %97, %98 : vector<128x4xf32>
    %cst_57 = arith.constant 0.000000e+00 : f32
    %100 = vector.broadcast %cst_57 : f32 to vector<128x4xf32>
    %101 = arith.maximumf %99, %100 : vector<128x4xf32>
    %c2_58 = arith.constant 2 : index
    %c0_59 = arith.constant 0 : index
    %c0_60 = arith.constant 0 : index
    %102 = vector.load %arg6[%c2_58, %c0_59, %c0_60] : memref<4x128x4xf32, #tpu.memory_space<vmem>>, vector<1x128x4xf32>
    %103 = vector.shape_cast %102 : vector<1x128x4xf32> to vector<128x4xf32>
    %104 = vector.shape_cast %101 : vector<128x4xf32> to vector<1x128x4xf32>
    tpu.vector_store %arg6[%c2_58, %c0_59, %c0_60], %104 {strides = array<i32>} : memref<4x128x4xf32, #tpu.memory_space<vmem>>, vector<1x128x4xf32>,
    %105 = vector.broadcast %74 : vector<1x4xf32> to vector<128x4xf32>
    %106 = arith.mulf %54, %105 : vector<128x4xf32>
    %107 = vector.broadcast %77 : vector<1x4xf32> to vector<128x4xf32>
    %108 = arith.addf %106, %107 : vector<128x4xf32>
    %cst_61 = arith.constant 0.000000e+00 : f32
    %109 = vector.broadcast %cst_61 : f32 to vector<128x4xf32>
    %110 = arith.maximumf %108, %109 : vector<128x4xf32>
    %c3_62 = arith.constant 3 : index
    %c0_63 = arith.constant 0 : index
    %c0_64 = arith.constant 0 : index
    %111 = vector.load %arg6[%c3_62, %c0_63, %c0_64] : memref<4x128x4xf32, #tpu.memory_space<vmem>>, vector<1x128x4xf32>
    %112 = vector.shape_cast %111 : vector<1x128x4xf32> to vector<128x4xf32>
    %113 = vector.shape_cast %110 : vector<128x4xf32> to vector<1x128x4xf32>
    tpu.vector_store %arg6[%c3_62, %c0_63, %c0_64], %113 {strides = array<i32>} : memref<4x128x4xf32, #tpu.memory_space<vmem>>, vector<1x128x4xf32>,
    return
  }
  func.func @transform_0(%arg0: i32) -> (i32, i32, i32) {
    %c0_i32 = arith.constant 0 : i32
    %c0_i32_0 = arith.constant 0 : i32
    %c0_i32_1 = arith.constant 0 : i32
    %c0_i32_2 = arith.constant 0 : i32
    return %c0_i32, %c0_i32_0, %c0_i32_1 : i32, i32, i32
  }
  func.func @transform_1(%arg0: i32) -> (i32, i32, i32) {
    %c0_i32 = arith.constant 0 : i32
    %c0_i32_0 = arith.constant 0 : i32
    %c0_i32_1 = arith.constant 0 : i32
    %c0_i32_2 = arith.constant 0 : i32
    return %c0_i32, %c0_i32_0, %c0_i32_1 : i32, i32, i32
  }
  func.func @transform_2(%arg0: i32) -> (i32, i32) {
    %c0_i32 = arith.constant 0 : i32
    %c0_i32_0 = arith.constant 0 : i32
    %c0_i32_1 = arith.constant 0 : i32
    return %c0_i32, %c0_i32_0 : i32, i32
  }
  func.func @transform_3(%arg0: i32) -> (i32, i32) {
    %c0_i32 = arith.constant 0 : i32
    %c0_i32_0 = arith.constant 0 : i32
    %c0_i32_1 = arith.constant 0 : i32
    return %c0_i32, %c0_i32_0 : i32, i32
  }
  func.func @transform_4(%arg0: i32) -> (i32, i32) {
    %c0_i32 = arith.constant 0 : i32
    %c0_i32_0 = arith.constant 0 : i32
    %c0_i32_1 = arith.constant 0 : i32
    return %c0_i32, %c0_i32_0 : i32, i32
  }
  func.func @transform_5(%arg0: i32) -> (i32, i32, i32) {
    %c0_i32 = arith.constant 0 : i32
    %c0_i32_0 = arith.constant 0 : i32
    %c0_i32_1 = arith.constant 0 : i32
    %c0_i32_2 = arith.constant 0 : i32
    return %c0_i32, %c0_i32_0, %c0_i32_1 : i32, i32, i32
  }
}

module attributes {stable_mosaic.version = 11 : i64} {
  func.func @_gemm_bias_act_kernel(%arg0: i32, %arg1: memref<256x4xbf16, #tpu.memory_space<vmem>>, %arg2: memref<4x3xbf16, #tpu.memory_space<vmem>>, %arg3: memref<1x3xf32, #tpu.memory_space<vmem>>, %arg4: memref<256x3xf32, #tpu.memory_space<vmem>>) attributes {dimension_semantics = [#tpu.dimension_semantics<parallel>], iteration_bounds = array<i64: 2>, scalar_prefetch = 0 : i64, scratch_operands = 0 : i64, tpu.core_type = #tpu.core_type<tc>, window_params = [{transform_indices = @transform_0, window_bounds = array<i64: 256, 4>}, {pipeline_mode = #tpu.pipeline_mode<synchronous>, transform_indices = @transform_1, window_bounds = array<i64: 4, 3>}, {pipeline_mode = #tpu.pipeline_mode<synchronous>, transform_indices = @transform_2, window_bounds = array<i64: 1, 3>}, {transform_indices = @transform_3, window_bounds = array<i64: 256, 3>}]} {
    %c0 = arith.constant 0 : index
    %c0_0 = arith.constant 0 : index
    %0 = vector.load %arg1[%c0, %c0_0] : memref<256x4xbf16, #tpu.memory_space<vmem>>, vector<256x4xbf16>
    %c0_1 = arith.constant 0 : index
    %c0_2 = arith.constant 0 : index
    %1 = vector.load %arg2[%c0_1, %c0_2] : memref<4x3xbf16, #tpu.memory_space<vmem>>, vector<4x3xbf16>
    %cst = arith.constant dense<0.000000e+00> : vector<256x3xf32>
    %2 = tpu.matmul %0, %1, %cst {dimension_numbers = #tpu.dot_dimension_numbers<[1], [0], [0], [1], [0, 0, 1, 1], [], []>} : vector<256x4xbf16>, vector<4x3xbf16>, vector<256x3xf32> -> vector<256x3xf32>
    %c0_3 = arith.constant 0 : index
    %c0_4 = arith.constant 0 : index
    %3 = vector.load %arg3[%c0_3, %c0_4] : memref<1x3xf32, #tpu.memory_space<vmem>>, vector<1x3xf32>
    %4 = vector.broadcast %3 : vector<1x3xf32> to vector<256x3xf32>
    %5 = arith.addf %2, %4 : vector<256x3xf32>
    %6 = math.tanh %5 : vector<256x3xf32>
    %c0_5 = arith.constant 0 : index
    %c0_6 = arith.constant 0 : index
    %7 = vector.load %arg4[%c0_5, %c0_6] : memref<256x3xf32, #tpu.memory_space<vmem>>, vector<256x3xf32>
    tpu.vector_store %arg4[%c0_5, %c0_6], %6 {strides = array<i32>} : memref<256x3xf32, #tpu.memory_space<vmem>>, vector<256x3xf32>,
    return
  }
  func.func @transform_0(%arg0: i32) -> (i32, i32) {
    %c0_i32 = arith.constant 0 : i32
    %c0_i32_0 = arith.constant 0 : i32
    return %arg0, %c0_i32 : i32, i32
  }
  func.func @transform_1(%arg0: i32) -> (i32, i32) {
    %c0_i32 = arith.constant 0 : i32
    %c0_i32_0 = arith.constant 0 : i32
    %c0_i32_1 = arith.constant 0 : i32
    return %c0_i32, %c0_i32_0 : i32, i32
  }
  func.func @transform_2(%arg0: i32) -> (i32, i32) {
    %c0_i32 = arith.constant 0 : i32
    %c0_i32_0 = arith.constant 0 : i32
    %c0_i32_1 = arith.constant 0 : i32
    return %c0_i32, %c0_i32_0 : i32, i32
  }
  func.func @transform_3(%arg0: i32) -> (i32, i32) {
    %c0_i32 = arith.constant 0 : i32
    %c0_i32_0 = arith.constant 0 : i32
    return %arg0, %c0_i32 : i32, i32
  }
}

</mosaic_0001>

<bundles_post_ra>
// kernel: forward.8
= control target key start
LH: loop header
LB: loop body
LE: loop exit
PB: predicated region body
PF: predicated region fallthrough
CT: control target
= control target key end

     0   :  { %s784_s12 = smov 0   ;;  %s945_s0 = inlined_call_operand.vmem [shape: bf16[512,3], index: 0, kind: input, shape index: {}]   ;;  %s946_s1 = inlined_call_operand.vmem [shape: bf16[3,4], index: 1, kind: input, shape index: {}]   ;;  %s947_s2 = inlined_call_operand.vmem [shape: f32[1,4], index: 2, kind: input, shape index: {}]   ;;  %s948_s3 = inlined_call_operand.vmem [shape: f32[512,4], index: 3, kind: output, shape index: {}]  }
   0x1 LB: > { %s633_s13 = sadd.s32 4294967295, %s761_s12   ;;  %p637_p0 = scmp.ge.s32.totalorder %s761_s12, 1  ;;  %s761_s12 = sphi %s784_s12, %s13_s12  }
   0x2   : > { %p138_p1 = scmp.lt.s32.totalorder %s761_s12, 3 }
   0x4   : > { %p139_p2 = pnand %p637_p0, %p138_p1 }
   0x5   : > { %v207_v0 = vld [vmem:[%s946_s1] sm:$0x3] (!%p139_p2)  ;;  %vm344_vm0 = vcmask (!%p139_p2), 1040384   ;;  %vm345_vm1 = vcmask (!%p139_p2), 1041408   ;;  %s638_s16 = sshll.u32 (!%p139_p2), %s633_s13, 5  ;;  %v763_v1 = vmov (!%p139_p2), 65535  }
   0x6   : > { %142 = sbr.rel (%p139_p2) target bundleno = 263 (0x107), region = 32  ;;  %v346_v2 = vsel (!%p139_p2), %vm344_vm0, 4294967295, %v763_v1  ;;  %p163_p3 = scmp.lt.s32.totalorder (!%p139_p2), %s638_s16, 63  ;;  %vm295_vm2 = vcmask (!%p139_p2), 23552   ;;  %v838_v21 = vld [vmem:[%s947_s2] ss:$0 sm:$0xff] (!%p139_p2) }
   0x7   : > { %v347_v3 = vsel (!%p139_p2), %vm345_vm1, %v346_v2, 0  ;;  %vm544_vm3 = vcmask (!%p139_p2), 31744  }
   0x8   : > { %v349_v4 = vand.u32 (!%p139_p2), %v347_v3, %v207_v0 }
   0xa   : > { %694 = vmatprep.subr.bf16.mxu0 (!%p139_p2), %v349_v4  ;;  %728 = vmatprep.subr.bf16.mxu1 (!%p139_p2), %v349_v4 }
   0xb   : > { %695 = vmatpush3.bf16.msra.mxu0 (!%p139_p2), %v349_v4  ;;  %729 = vmatpush3.bf16.msra.mxu1 (!%p139_p2), %v349_v4 }
   0xd   : > { %s950_s16 = smov (!%p163_p3, %s638_s16), 63 }
   0xe   : > { %s639_s17 = sshll.u32 %s950_s16, 2  ;;  %s641_s23 = sshll.u32 %s950_s16, 3 }
   0xf   : > { %s801_s20 = scalar_lea.vmem %s945_s0, %s639_s17  ;;  %s845_s26 = scalar_lea.vmem %s948_s3, %s641_s23 }
  0x10   : > { %v739_v5 = vld [vmem:[%s801_s20] sm:$0xff]   ;;  %v741_v7 = vld [vmem:[%s801_s20 + $0x8] sm:$0xff]   ;;  %v743_v9 = vld [vmem:[%s801_s20 + $0x10] sm:$0xff]  }
  0x11   : > { %v740_v6 = vld [vmem:[%s801_s20 + $0x40] sm:$0xff]   ;;  %696 = vmatprep.mubr.msk.bf16.mxu0 %vm295_vm2, %v739_v5  ;;  %v742_v8 = vld [vmem:[%s801_s20 + $0x48] sm:$0xff]   ;;  %v744_v10 = vld [vmem:[%s801_s20 + $0x50] sm:$0xff]  }
  0x12   : > { %712 = vmatprep.mubr.msk.bf16.mxu1 %vm295_vm2, %v740_v6  ;;  %697 = vmatmul.mubr.msk.bf16.vlgmr.msra.gmra.mrb[0].mxu0 %vm295_vm2, %v741_v7  ;;  %v745_v11 = vld [vmem:[%s801_s20 + $0x18] sm:$0xff]   ;;  %v747_v13 = vld [vmem:[%s801_s20 + $0x20] sm:$0xff]   ;;  %v749_v15 = vld [vmem:[%s801_s20 + $0x28] sm:$0xff]  }
  0x13   : > { %713 = vmatmul.mubr.msk.bf16.vlgmr.msra.gmra.mrb[0].mxu1 %vm295_vm2, %v742_v8  ;;  %700 = vmatprep.mubr.msk.bf16.mxu0 %vm295_vm2, %v743_v9  ;;  %v746_v12 = vld [vmem:[%s801_s20 + $0x58] sm:$0xff]   ;;  %v748_v14 = vld [vmem:[%s801_s20 + $0x60] sm:$0xff]   ;;  %v750_v16 = vld [vmem:[%s801_s20 + $0x68] sm:$0xff]  }
  0x14   : > { %716 = vmatprep.mubr.msk.bf16.mxu1 %vm295_vm2, %v744_v10  ;;  %v751_v17 = vld [vmem:[%s801_s20 + $0x30] sm:$0xff]   ;;  %v753_v19 = vld [vmem:[%s801_s20 + $0x38] sm:$0xff]  }
  0x15   : > { %v752_v18 = vld [vmem:[%s801_s20 + $0x70] sm:$0xff]   ;;  %v754_v20 = vld [vmem:[%s801_s20 + $0x78] sm:$0xff]  }
  0x1a   : > { %701 = vmatmul.mubr.msk.bf16.gmra.mrb[4].mxu0 %vm295_vm2, %v745_v11 }
  0x1b   : > { %717 = vmatmul.mubr.msk.bf16.gmra.mrb[4].mxu1 %vm295_vm2, %v746_v12  ;;  %704 = vmatprep.mubr.msk.bf16.mxu0 %vm295_vm2, %v747_v13 }
  0x1c   : > { %720 = vmatprep.mubr.msk.bf16.mxu1 %vm295_vm2, %v748_v14 }
  0x22   : > { %705 = vmatmul.mubr.msk.bf16.gmra.mrb[8].mxu0 %vm295_vm2, %v749_v15 }
  0x23   : > { %721 = vmatmul.mubr.msk.bf16.gmra.mrb[8].mxu1 %vm295_vm2, %v750_v16  ;;  %708 = vmatprep.mubr.msk.bf16.mxu0 %vm295_vm2, %v751_v17 }
  0x24   : > { %724 = vmatprep.mubr.msk.bf16.mxu1 %vm295_vm2, %v752_v18 }
  0x2a   : > { %709 = vmatmul.mubr.msk.bf16.gmra.mrb[12].mxu0 %vm295_vm2, %v753_v19 }
  0x2b   : > { %725 = vmatmul.mubr.msk.bf16.gmra.mrb[12].mxu1 %vm295_vm2, %v754_v20 }
  0xe5   : > { %v698_v22 = vpop.f32.mrb[0].mxu0 }
  0xe6   : > { %v394_v23 = vadd.f32 %v698_v22, %v838_v21  ;;  %v714_v24 = vpop.f32.mrb[0].mxu1  ;;  %v385_v25 = vpop.f32.mrb[1].mxu0 }
  0xe7   : > { %v458_v26 = vadd.f32 %v714_v24, %v838_v21  ;;  %v386_v27 = vadd.f32 %v838_v21, %v385_v25  ;;  %v449_v28 = vpop.f32.mrb[1].mxu1  ;;  %v699_v29 = vpop.f32.mrb[2].mxu0 }
  0xe8   : > { %v514_v30 = vmax.f32 %v394_v23, 0.0  ;;  %v450_v31 = vadd.f32 %v838_v21, %v449_v28  ;;  %v397_v32 = vadd.f32 %v699_v29, %v838_v21  ;;  %v715_v33 = vpop.f32.mrb[2].mxu1  ;;  %v388_v34 = vpop.f32.mrb[3].mxu0 }
  0xe9   : > { %v530_v35 = vmax.f32 %v458_v26, 0.0  ;;  %v512_v36 = vmax.f32 %v386_v27, 0.0  ;;  %v461_v37 = vadd.f32 %v715_v33, %v838_v21  ;;  %v389_v38 = vadd.f32 %v838_v21, %v388_v34  ;;  %v452_v39 = vpop.f32.mrb[3].mxu1 }
  0xea   : > { %547 = vst.msk [vmem:[%s845_s26 + $0x10] sm:$0xff] %vm544_vm3, %v514_v30  ;;  %v528_v40 = vmax.f32 %v450_v31, 0.0  ;;  %v515_v41 = vmax.f32 %v397_v32, 0.0  ;;  %v453_v42 = vadd.f32 %v838_v21, %v452_v39 }
  0xeb   : > { %563 = vst.msk [vmem:[%s845_s26 + $0x90] sm:$0xff] %vm544_vm3, %v530_v35  ;;  %545 = vst.msk [vmem:[%s845_s26] sm:$0xff] %vm544_vm3, %v512_v36  ;;  %v531_v43 = vmax.f32 %v461_v37, 0.0  ;;  %v513_v44 = vmax.f32 %v389_v38, 0.0 }
  0xec   : > { %561 = vst.msk [vmem:[%s845_s26 + $0x80] sm:$0xff] %vm544_vm3, %v528_v40  ;;  %548 = vst.msk [vmem:[%s845_s26 + $0x18] sm:$0xff] %vm544_vm3, %v515_v41  ;;  %v529_v45 = vmax.f32 %v453_v42, 0.0 }
  0xed   : > { %564 = vst.msk [vmem:[%s845_s26 + $0x98] sm:$0xff] %vm544_vm3, %v531_v43  ;;  %546 = vst.msk [vmem:[%s845_s26 + $0x8] sm:$0xff] %vm544_vm3, %v513_v44  ;;  %v702_v46 = vpop.f32.mrb[4].mxu0 }
  0xee   : > { %562 = vst.msk [vmem:[%s845_s26 + $0x88] sm:$0xff] %vm544_vm3, %v529_v45  ;;  %v410_v47 = vadd.f32 %v702_v46, %v838_v21  ;;  %v718_v48 = vpop.f32.mrb[4].mxu1  ;;  %v401_v49 = vpop.f32.mrb[5].mxu0 }
  0xef   : > { %v474_v50 = vadd.f32 %v718_v48, %v838_v21  ;;  %v402_v51 = vadd.f32 %v838_v21, %v401_v49  ;;  %v465_v52 = vpop.f32.mrb[5].mxu1  ;;  %v703_v53 = vpop.f32.mrb[6].mxu0 }
  0xf0   : > { %v518_v54 = vmax.f32 %v410_v47, 0.0  ;;  %v466_v55 = vadd.f32 %v838_v21, %v465_v52  ;;  %v413_v56 = vadd.f32 %v703_v53, %v838_v21  ;;  %v719_v57 = vpop.f32.mrb[6].mxu1  ;;  %v404_v58 = vpop.f32.mrb[7].mxu0 }
  0xf1   : > { %v534_v59 = vmax.f32 %v474_v50, 0.0  ;;  %v516_v60 = vmax.f32 %v402_v51, 0.0  ;;  %v477_v61 = vadd.f32 %v719_v57, %v838_v21  ;;  %v405_v62 = vadd.f32 %v838_v21, %v404_v58  ;;  %v468_v63 = vpop.f32.mrb[7].mxu1 }
  0xf2   : > { %551 = vst.msk [vmem:[%s845_s26 + $0x30] sm:$0xff] %vm544_vm3, %v518_v54  ;;  %v532_v0 = vmax.f32 %v466_v55, 0.0  ;;  %v519_v1 = vmax.f32 %v413_v56, 0.0  ;;  %v469_v2 = vadd.f32 %v838_v21, %v468_v63 }
  0xf3   : > { %567 = vst.msk [vmem:[%s845_s26 + $0xb0] sm:$0xff] %vm544_vm3, %v534_v59  ;;  %549 = vst.msk [vmem:[%s845_s26 + $0x20] sm:$0xff] %vm544_vm3, %v516_v60  ;;  %v535_v3 = vmax.f32 %v477_v61, 0.0  ;;  %v517_v4 = vmax.f32 %v405_v62, 0.0 }
  0xf4   : > { %565 = vst.msk [vmem:[%s845_s26 + $0xa0] sm:$0xff] %vm544_vm3, %v532_v0  ;;  %552 = vst.msk [vmem:[%s845_s26 + $0x38] sm:$0xff] %vm544_vm3, %v519_v1  ;;  %v533_v5 = vmax.f32 %v469_v2, 0.0 }
  0xf5   : > { %568 = vst.msk [vmem:[%s845_s26 + $0xb8] sm:$0xff] %vm544_vm3, %v535_v3  ;;  %550 = vst.msk [vmem:[%s845_s26 + $0x28] sm:$0xff] %vm544_vm3, %v517_v4  ;;  %v706_v6 = vpop.f32.mrb[8].mxu0 }
  0xf6   : > { %566 = vst.msk [vmem:[%s845_s26 + $0xa8] sm:$0xff] %vm544_vm3, %v533_v5  ;;  %v426_v7 = vadd.f32 %v706_v6, %v838_v21  ;;  %v722_v8 = vpop.f32.mrb[8].mxu1  ;;  %v417_v9 = vpop.f32.mrb[9].mxu0 }
  0xf7   : > { %v490_v10 = vadd.f32 %v722_v8, %v838_v21  ;;  %v418_v11 = vadd.f32 %v838_v21, %v417_v9  ;;  %v481_v12 = vpop.f32.mrb[9].mxu1  ;;  %v707_v13 = vpop.f32.mrb[10].mxu0 }
  0xf8   : > { %v522_v14 = vmax.f32 %v426_v7, 0.0  ;;  %v482_v15 = vadd.f32 %v838_v21, %v481_v12  ;;  %v429_v16 = vadd.f32 %v707_v13, %v838_v21  ;;  %v723_v17 = vpop.f32.mrb[10].mxu1  ;;  %v420_v18 = vpop.f32.mrb[11].mxu0 }
  0xf9   : > { %v538_v19 = vmax.f32 %v490_v10, 0.0  ;;  %v520_v20 = vmax.f32 %v418_v11, 0.0  ;;  %v493_v22 = vadd.f32 %v723_v17, %v838_v21  ;;  %v421_v23 = vadd.f32 %v838_v21, %v420_v18  ;;  %v484_v24 = vpop.f32.mrb[11].mxu1 }
  0xfa   : > { %555 = vst.msk [vmem:[%s845_s26 + $0x50] sm:$0xff] %vm544_vm3, %v522_v14  ;;  %v536_v25 = vmax.f32 %v482_v15, 0.0  ;;  %v523_v26 = vmax.f32 %v429_v16, 0.0  ;;  %v485_v27 = vadd.f32 %v838_v21, %v484_v24 }
  0xfb   : > { %571 = vst.msk [vmem:[%s845_s26 + $0xd0] sm:$0xff] %vm544_vm3, %v538_v19  ;;  %553 = vst.msk [vmem:[%s845_s26 + $0x40] sm:$0xff] %vm544_vm3, %v520_v20  ;;  %v539_v28 = vmax.f32 %v493_v22, 0.0  ;;  %v521_v29 = vmax.f32 %v421_v23, 0.0 }
  0xfc   : > { %569 = vst.msk [vmem:[%s845_s26 + $0xc0] sm:$0xff] %vm544_vm3, %v536_v25  ;;  %556 = vst.msk [vmem:[%s845_s26 + $0x58] sm:$0xff] %vm544_vm3, %v523_v26  ;;  %v537_v30 = vmax.f32 %v485_v27, 0.0 }
  0xfd   : > { %572 = vst.msk [vmem:[%s845_s26 + $0xd8] sm:$0xff] %vm544_vm3, %v539_v28  ;;  %554 = vst.msk [vmem:[%s845_s26 + $0x48] sm:$0xff] %vm544_vm3, %v521_v29  ;;  %v710_v31 = vpop.f32.mrb[12].mxu0 }
  0xfe   : > { %570 = vst.msk [vmem:[%s845_s26 + $0xc8] sm:$0xff] %vm544_vm3, %v537_v30  ;;  %v442_v32 = vadd.f32 %v710_v31, %v838_v21  ;;  %v726_v33 = vpop.f32.mrb[12].mxu1  ;;  %v433_v34 = vpop.f32.mrb[13].mxu0 }
  0xff   : > { %v506_v35 = vadd.f32 %v726_v33, %v838_v21  ;;  %v434_v36 = vadd.f32 %v838_v21, %v433_v34  ;;  %v497_v37 = vpop.f32.mrb[13].mxu1  ;;  %v711_v38 = vpop.f32.mrb[14].mxu0 }
 0x100   : > { %v526_v39 = vmax.f32 %v442_v32, 0.0  ;;  %v498_v40 = vadd.f32 %v838_v21, %v497_v37  ;;  %v445_v41 = vadd.f32 %v711_v38, %v838_v21  ;;  %v727_v42 = vpop.f32.mrb[14].mxu1  ;;  %v436_v43 = vpop.f32.mrb[15].mxu0 }
 0x101   : > { %v542_v44 = vmax.f32 %v506_v35, 0.0  ;;  %v524_v45 = vmax.f32 %v434_v36, 0.0  ;;  %v509_v46 = vadd.f32 %v727_v42, %v838_v21  ;;  %v437_v47 = vadd.f32 %v838_v21, %v436_v43  ;;  %v500_v48 = vpop.f32.mrb[15].mxu1 }
 0x102   : > { %559 = vst.msk [vmem:[%s845_s26 + $0x70] sm:$0xff] %vm544_vm3, %v526_v39  ;;  %v540_v49 = vmax.f32 %v498_v40, 0.0  ;;  %v527_v50 = vmax.f32 %v445_v41, 0.0  ;;  %v501_v51 = vadd.f32 %v838_v21, %v500_v48 }
 0x103   : > { %575 = vst.msk [vmem:[%s845_s26 + $0xf0] sm:$0xff] %vm544_vm3, %v542_v44  ;;  %557 = vst.msk [vmem:[%s845_s26 + $0x60] sm:$0xff] %vm544_vm3, %v524_v45  ;;  %v543_v52 = vmax.f32 %v509_v46, 0.0  ;;  %v525_v53 = vmax.f32 %v437_v47, 0.0 }
 0x104   : > { %573 = vst.msk [vmem:[%s845_s26 + $0xe0] sm:$0xff] %vm544_vm3, %v540_v49  ;;  %560 = vst.msk [vmem:[%s845_s26 + $0x78] sm:$0xff] %vm544_vm3, %v527_v50  ;;  %v541_v54 = vmax.f32 %v501_v51, 0.0 }
 0x105   : > { %576 = vst.msk [vmem:[%s845_s26 + $0xf8] sm:$0xff] %vm544_vm3, %v543_v52  ;;  %558 = vst.msk [vmem:[%s845_s26 + $0x68] sm:$0xff] %vm544_vm3, %v525_v53 }
 0x106   : > { %574 = vst.msk [vmem:[%s845_s26 + $0xe8] sm:$0xff] %vm544_vm3, %v541_v54 }
 0x107 PF: > { %s13_s12 = sadd.s32 1, %s761_s12  }
 0x108   : > { %p10_p4 = scmp.ge.s32.totalorder %s13_s12, 4  }
 0x10a   :  { %12 = sbr.rel (!%p10_p4) target bundleno = 1 (0x1), region = 62 }

// kernel: forward.9
= control target key start
LH: loop header
LB: loop body
LE: loop exit
PB: predicated region body
PF: predicated region fallthrough
CT: control target
= control target key end

     0   :  { %vm104_vm0 = vcmask 293888   ;;  %vm129_vm1 = vcmask 1041408   ;;  %vm230_vm2 = vcmask 64512   ;;  %s782_s1 = inlined_call_operand.vmem [shape: bf16[1,36,8], index: 1, kind: input, shape index: {}]   ;;  %s783_s0 = inlined_call_operand.vmem [shape: bf16[1,128,36], index: 0, kind: input, shape index: {}]   ;;  %s784_s2 = inlined_call_operand.vmem [shape: f32[1,8], index: 2, kind: input, shape index: {}]   ;;  %s785_s3 = inlined_call_operand.vmem [shape: f32[1,8], index: 3, kind: input, shape index: {}]   ;;  %s786_s4 = inlined_call_operand.vmem [shape: f32[1,8], index: 4, kind: input, shape index: {}]   ;;  %s787_s5 = inlined_call_operand.vmem [shape: f32[1,128,8], index: 5, kind: output, shape index: {}]  }
   0x1   :  { %v476_v0 = vld [vmem:[%s782_s1] sm:$0xff]   ;;  %v477_v1 = vld [vmem:[%s782_s1 + $0x8] sm:$0xff]   ;;  %v478_v2 = vld [vmem:[%s782_s1 + $0x10] ss:$0 sps:$4 sm:$0x33]  }
   0x2   :  { %446 = vmatprep.subr.bf16.mxu0 %v476_v0  ;;  %v479_v3 = vld [vmem:[%s783_s0] sm:$0xff]   ;;  %468 = vmatprep.subr.bf16.mxu1 %v476_v0  ;;  %v131_v5 = vsel %vm129_vm1, %v478_v2, 0  ;;  %v480_v6 = vld [vmem:[%s783_s0 + $0x8] sm:$0xff]   ;;  %v481_v8 = vld [vmem:[%s783_s0 + $0x10] sm:$0xff]  }
   0x3   :  { %447 = vmatpush3.bf16.msra.mxu0 %v476_v0  ;;  %471 = vmatpush3.bf16.msra.mxu1 %v476_v0  ;;  %v483_v4 = vld [vmem:[%s783_s0 + $0x20] sm:$0xff]   ;;  %v484_v7 = vld [vmem:[%s783_s0 + $0x28] sm:$0xff]   ;;  %v485_v9 = vld [vmem:[%s783_s0 + $0x30] sm:$0xff]  }
   0x4   :  { %448 = vmatprep.subr.bf16.mxu0 %v477_v1  ;;  %452 = vmatprep.mubr.msk.bf16.mxu0 %vm104_vm0, %v479_v3  ;;  %v482_v10 = vld [vmem:[%s783_s0 + $0x18] sm:$0xff]   ;;  %v563_v12 = vld [vmem:[%s784_s2] ss:$0 sm:$0xff] }
   0x5   :  { %469 = vmatprep.subr.bf16.mxu1 %v477_v1  ;;  %460 = vmatprep.mubr.msk.bf16.mxu1 %vm104_vm0, %v483_v4  ;;  %v486_v11 = vld [vmem:[%s783_s0 + $0x38] sm:$0xff]  }
   0x7   :  { %449 = vmatpush3.bf16.msra.mxu0 %v477_v1  ;;  %472 = vmatpush3.bf16.msra.mxu1 %v477_v1 }
   0x8   :  { %474 = vmatprep.subr.msk.bf16.mxu0 %vm129_vm1, %v478_v2  ;;  %475 = vmatprep.subr.msk.bf16.mxu1 %vm129_vm1, %v478_v2 }
   0xb   :  { %451 = vmatpush3.bf16.msra.mxu0 %v131_v5  ;;  %473 = vmatpush3.bf16.msra.mxu1 %v131_v5 }
   0xe   :  { %453 = vmatmul.mubr.msk.bf16.vlgmr.msra.gmra.mrb[0].mxu0 %vm104_vm0, %v480_v6  ;;  %461 = vmatmul.mubr.msk.bf16.vlgmr.msra.gmra.mrb[0].mxu1 %vm104_vm0, %v484_v7 }
   0xf   :  { %456 = vmatprep.mubr.msk.bf16.mxu0 %vm104_vm0, %v481_v8  ;;  %464 = vmatprep.mubr.msk.bf16.mxu1 %vm104_vm0, %v485_v9 }
  0x16   :  { %457 = vmatmul.mubr.msk.bf16.gmra.mrb[4].mxu0 %vm104_vm0, %v482_v10  ;;  %465 = vmatmul.mubr.msk.bf16.gmra.mrb[4].mxu1 %vm104_vm0, %v486_v11 }
  0xe1   :  { %v454_v13 = vpop.f32.mrb[0].mxu0  ;;  %v462_v14 = vpop.f32.mrb[0].mxu1 }
  0xe2   :  { %v167_v15 = vpop.f32.mrb[1].mxu0  ;;  %v199_v16 = vpop.f32.mrb[1].mxu1  ;;  %v566_v17 = vadd.f32 %v454_v13, %v563_v12  ;;  %v641_v11 = vadd.f32 %v462_v14, %v563_v12 }
  0xe3   :  { %v569_v18 = vadd.f32 %v563_v12, %v167_v15  ;;  %v455_v19 = vpop.f32.mrb[2].mxu0  ;;  %v463_v20 = vpop.f32.mrb[2].mxu1  ;;  %v605_v50 = vadd.f32 %v563_v12, %v199_v16 }
  0xe4   :  { %v170_v21 = vpop.f32.mrb[3].mxu0  ;;  %v202_v22 = vpop.f32.mrb[3].mxu1  ;;  %v574_v24 = vadd.f32 %v455_v19, %v563_v12  ;;  %v271_v26 = vmul.f32 %v566_v17, %v566_v17  ;;  %v234_v31 = vsel %vm230_vm2, %v566_v17, 0.0  ;;  %v645_v19 = vadd.f32 %v463_v20, %v563_v12 }
  0xe5   :  { %v269_v23 = vmul.f32 %v569_v18, %v569_v18  ;;  %v577_v25 = vadd.f32 %v563_v12, %v170_v21  ;;  %v231_v27 = vsel %vm230_vm2, %v569_v18, 0.0  ;;  %v277_v2 = vmul.f32 %v605_v50, %v605_v50 }
  0xe6   :  { %v272_v33 = vmul.f32 %v574_v24, %v574_v24  ;;  %v288_v41 = vsel %vm230_vm2, %v271_v26, 0.0  ;;  %v236_v42 = vsel %vm230_vm2, %v574_v24, 0.0  ;;  %v633_v6 = vadd.f32 %v563_v12, %v202_v22 }
  0xe7   :  { %v232_v28 = vsel %vm230_vm2, %v577_v25, 0.0  ;;  %v270_v29 = vmul.f32 %v577_v25, %v577_v25  ;;  %v285_v32 = vsel %vm230_vm2, %v269_v23, 0.0  ;;  %v246_v9 = vsel %vm230_vm2, %v605_v50, 0.0 }
  0xe8   :  { %v233_v30 = vadd.f32 %v232_v28, %v231_v27  ;;  %v290_v52 = vsel %vm230_vm2, %v272_v33, 0.0  ;;  %v300_v16 = vsel %vm230_vm2, %v277_v2, 0.0  ;;  %v278_v23 = vmul.f32 %v633_v6, %v633_v6 }
  0xe9   :  { %v286_v34 = vsel %vm230_vm2, %v270_v29, 0.0  ;;  %v458_v35 = vpop.f32.mrb[4].mxu0  ;;  %v593_v36 = vpop.f32.mrb[4].mxu1  ;;  %v248_v14 = vsel %vm230_vm2, %v633_v6, 0.0  ;;  %v279_v28 = vmul.f32 %v641_v11, %v641_v11  ;;  %v250_v20 = vsel %vm230_vm2, %v641_v11, 0.0 }
  0xea   :  { %v235_v37 = vadd.f32 %v234_v31, %v233_v30  ;;  %v287_v38 = vadd.f32 %v286_v34, %v285_v32  ;;  %v183_v39 = vpop.f32.mrb[5].mxu0  ;;  %v215_v40 = vpop.f32.mrb[5].mxu1  ;;  %v602_v47 = vadd.f32 %v458_v35, %v563_v12  ;;  %v280_v31 = vmul.f32 %v645_v19, %v645_v19 }
  0xeb   :  { %v599_v43 = vadd.f32 %v563_v12, %v183_v39  ;;  %v459_v44 = vpop.f32.mrb[6].mxu0  ;;  %v467_v45 = vpop.f32.mrb[6].mxu1  ;;  %v651_v26 = vadd.f32 %v563_v12, %v215_v40  ;;  %v302_v33 = vsel %vm230_vm2, %v278_v23, 0.0  ;;  %v304_v40 = vsel %vm230_vm2, %v279_v28, 0.0 }
  0xec   :  { %v289_v46 = vadd.f32 %v288_v41, %v287_v38  ;;  %v237_v48 = vadd.f32 %v236_v42, %v235_v37  ;;  %v186_v49 = vpop.f32.mrb[7].mxu0  ;;  %v218_v51 = vpop.f32.mrb[7].mxu1  ;;  %v616_v58 = vadd.f32 %v459_v44, %v563_v12  ;;  %v275_v61 = vmul.f32 %v602_v47, %v602_v47 }
  0xed   :  { %v238_v53 = vsel %vm230_vm2, %v599_v43, 0.0  ;;  %v273_v54 = vmul.f32 %v599_v43, %v599_v43  ;;  %v613_v55 = vadd.f32 %v563_v12, %v186_v49  ;;  %v242_v1 = vsel %vm230_vm2, %v602_v47, 0.0 }
  0xee   :  { %v239_v56 = vadd.f32 %v238_v53, %v237_v48  ;;  %v291_v57 = vadd.f32 %v290_v52, %v289_v46  ;;  %v276_v3 = vmul.f32 %v616_v58, %v616_v58  ;;  %v244_v7 = vsel %vm230_vm2, %v616_v58, 0.0 }
  0xef   :  { %v292_v59 = vsel %vm230_vm2, %v273_v54, 0.0  ;;  %v240_v60 = vsel %vm230_vm2, %v613_v55, 0.0  ;;  %v274_v0 = vmul.f32 %v613_v55, %v613_v55  ;;  %v296_v10 = vsel %vm230_vm2, %v275_v61, 0.0 }
  0xf0   :  { %v293_v62 = vadd.f32 %v292_v59, %v291_v57  ;;  %v241_v63 = vadd.f32 %v240_v60, %v239_v56  ;;  %v298_v21 = vsel %vm230_vm2, %v276_v3, 0.0  ;;  %v281_v34 = vmul.f32 %v651_v26, %v651_v26 }
  0xf1   :  { %v294_v5 = vsel %vm230_vm2, %v274_v0, 0.0  ;;  %v665_v35 = vadd.f32 %v563_v12, %v218_v51  ;;  %v252_v37 = vsel %vm230_vm2, %v645_v19, 0.0  ;;  %v254_v39 = vsel %vm230_vm2, %v651_v26, 0.0 }
  0xf2   :  { %v243_v4 = vadd.f32 %v242_v1, %v241_v63  ;;  %v295_v8 = vadd.f32 %v294_v5, %v293_v62  ;;  %v674_v41 = vadd.f32 %v593_v36, %v563_v12  ;;  %v306_v44 = vsel %vm230_vm2, %v280_v31, 0.0 }
  0xf3   :  { %v308_v49 = vsel %vm230_vm2, %v281_v34, 0.0  ;;  %v679_v51 = vadd.f32 %v467_v45, %v563_v12  ;;  %v282_v52 = vmul.f32 %v665_v35, %v665_v35  ;;  %v256_v54 = vsel %vm230_vm2, %v665_v35, 0.0 }
  0xf4   :  { %v245_v13 = vadd.f32 %v244_v7, %v243_v4  ;;  %v297_v15 = vadd.f32 %v296_v10, %v295_v8  ;;  %v283_v36 = vmul.f32 %v674_v41, %v674_v41  ;;  %v258_v57 = vsel %vm230_vm2, %v674_v41, 0.0 }
  0xf5   :  { %v284_v60 = vmul.f32 %v679_v51, %v679_v51  ;;  %v310_v45 = vsel %vm230_vm2, %v282_v52, 0.0  ;;  %v260_v61 = vsel %vm230_vm2, %v679_v51, 0.0  ;;  %v336_v31 = vlaneseq }
  0xf6   :  { %v247_v22 = vadd.f32 %v246_v9, %v245_v13  ;;  %v299_v27 = vadd.f32 %v298_v21, %v297_v15  ;;  %v312_v63 = vsel %vm230_vm2, %v283_v36, 0.0 }
  0xf7   :  { %v314_v2 = vsel %vm230_vm2, %v284_v60, 0.0 }
  0xf8   :  { %v249_v29 = vadd.f32 %v248_v14, %v247_v22  ;;  %v301_v30 = vadd.f32 %v300_v16, %v299_v27 }
  0xfa   :  { %v251_v32 = vadd.f32 %v250_v20, %v249_v29  ;;  %v303_v38 = vadd.f32 %v302_v33, %v301_v30  ;;  %v328_v33 = vld [vmem:[%s785_s3] sm:$0x1] }
  0xfc   :  { %v253_v42 = vadd.f32 %v252_v37, %v251_v32  ;;  %v305_v46 = vadd.f32 %v304_v40, %v303_v38  ;;  %v337_v32 = vshrl.u32 %v336_v31, 7 }
  0xfe   :  { %v255_v48 = vadd.f32 %v254_v39, %v253_v42  ;;  %v307_v53 = vadd.f32 %v306_v44, %v305_v46  ;;  %v338_v34 = vsub.s32 0, %v337_v32  ;;  %v332_v39 = vld [vmem:[%s786_s4] sm:$0x1] }
 0x100   :  { %v257_v56 = vadd.f32 %v256_v54, %v255_v48  ;;  %v309_v59 = vadd.f32 %v308_v49, %v307_v53 }
 0x102   :  { %v259_v12 = vadd.f32 %v258_v57, %v257_v56  ;;  %v311_v62 = vadd.f32 %v310_v45, %v309_v59 }
 0x104   :  { %v261_v0 = vadd.f32 %v260_v61, %v259_v12  ;;  %v313_v1 = vadd.f32 %v312_v63, %v311_v62 }
 0x106   :  { %v262_v3 = vrot.slane %v261_v0, 4  ;;  %v315_v4 = vadd.f32 %v314_v2, %v313_v1 }
 0x108   :  { %v263_v5 = vadd.f32 %v262_v3, %v261_v0  ;;  %v316_v7 = vrot.slane %v315_v4, 4 }
 0x10a   :  { %v264_v8 = vrot.slane %v263_v5, 2  ;;  %v317_v9 = vadd.f32 %v316_v7, %v315_v4 }
 0x10c   :  { %v265_v10 = vadd.f32 %v264_v8, %v263_v5  ;;  %v318_v13 = vrot.slane %v317_v9, 2 }
 0x10e   :  { %v266_v15 = vrot.slane %v265_v10, 1  ;;  %v319_v16 = vadd.f32 %v318_v13, %v317_v9 }
 0x110   :  { %v267_v21 = vadd.f32 %v266_v15, %v265_v10  ;;  %v320_v22 = vrot.slane %v319_v16, 1 }
 0x112   :  { %v323_v23 = vmul.f32 0.0078125, %v267_v21  ;;  %v321_v27 = vadd.f32 %v320_v22, %v319_v16 }
 0x114   :  { %v325_v14 = vmul.f32 %v323_v23, %v323_v23  ;;  %v324_v28 = vmul.f32 0.0078125, %v321_v27 }
 0x116   :  { %v326_v29 = vsub.f32 %v324_v28, %v325_v14 }
 0x118   :  { %v327_v20 = vmax.f32 %v326_v29, 0.0 }
 0x11a   :  { %v329_v30 = vadd.f32 1e-05, %v327_v20 }
 0x11c   :  { %487 = vrsqrt.f32 %v329_v30 }
 0x126   :  { %v488_v37 = vpop.eup %487 }
 0x127   :  { %v331_v38 = vmul.f32 %v488_v37, %v328_v33 }
 0x129   :  { %v333_v40 = vmul.f32 %v331_v38, %v323_v23  ;;  %v339_v42 = vrot.slane %v331_v38, %v338_v34 }
 0x12b   :  { %v334_v44 = vsub.f32 %v332_v39, %v333_v40  ;;  %v341_v46 = vmul.f32 %v339_v42, %v569_v18  ;;  %v342_v48 = vmul.f32 %v339_v42, %v577_v25  ;;  %v345_v49 = vmul.f32 %v339_v42, %v599_v43 }
 0x12c   :  { %v346_v52 = vmul.f32 %v339_v42, %v613_v55  ;;  %v347_v53 = vmul.f32 %v339_v42, %v602_v47  ;;  %v348_v54 = vmul.f32 %v339_v42, %v616_v58  ;;  %v349_v36 = vmul.f32 %v339_v42, %v605_v50 }
 0x12d   :  { %v350_v56 = vmul.f32 %v339_v42, %v633_v6  ;;  %v351_v57 = vmul.f32 %v339_v42, %v641_v11  ;;  %v352_v59 = vmul.f32 %v339_v42, %v645_v19  ;;  %v353_v18 = vmul.f32 %v339_v42, %v651_v26 }
 0x12e   :  { %v354_v25 = vmul.f32 %v339_v42, %v665_v35  ;;  %v355_v43 = vmul.f32 %v339_v42, %v674_v41  ;;  %v343_v55 = vmul.f32 %v339_v42, %v566_v17  ;;  %v344_v47 = vmul.f32 %v339_v42, %v574_v24 }
 0x12f   :  { %v356_v58 = vmul.f32 %v339_v42, %v679_v51  ;;  %v361_v60 = vrot.slane %v334_v44, %v338_v34 }
 0x131   :  { %v363_v50 = vadd.f32 %v361_v60, %v341_v46  ;;  %v364_v12 = vadd.f32 %v361_v60, %v342_v48  ;;  %v365_v6 = vadd.f32 %v361_v60, %v343_v55  ;;  %v366_v45 = vadd.f32 %v361_v60, %v344_v47 }
 0x132   :  { %v367_v11 = vadd.f32 %v361_v60, %v345_v49  ;;  %v368_v61 = vadd.f32 %v361_v60, %v346_v52  ;;  %v369_v19 = vadd.f32 %v361_v60, %v347_v53  ;;  %v370_v62 = vadd.f32 %v361_v60, %v348_v54 }
 0x133   :  { %v371_v26 = vadd.f32 %v361_v60, %v349_v36  ;;  %v372_v63 = vadd.f32 %v361_v60, %v350_v56  ;;  %v373_v35 = vadd.f32 %v361_v60, %v351_v57  ;;  %v374_v0 = vadd.f32 %v361_v60, %v352_v59 }
 0x134   :  { %v375_v41 = vadd.f32 %v361_v60, %v353_v18  ;;  %v376_v1 = vadd.f32 %v361_v60, %v354_v25  ;;  %v377_v17 = vadd.f32 %v361_v60, %v355_v43  ;;  %v378_v2 = vadd.f32 %v361_v60, %v356_v58 }
 0x135   :  { %v379_v24 = vmax.f32 %v363_v50, 0.0  ;;  %v380_v3 = vmax.f32 %v364_v12, 0.0  ;;  %v381_v51 = vmax.f32 %v365_v6, 0.0  ;;  %v382_v4 = vmax.f32 %v366_v45, 0.0 }
 0x136   :  { %v383_v5 = vmax.f32 %v367_v11, 0.0  ;;  %v384_v7 = vmax.f32 %v368_v61, 0.0  ;;  %v385_v8 = vmax.f32 %v369_v19, 0.0  ;;  %v386_v9 = vmax.f32 %v370_v62, 0.0 }
 0x137   :  { %v387_v10 = vmax.f32 %v371_v26, 0.0  ;;  %v388_v13 = vmax.f32 %v372_v63, 0.0  ;;  %v389_v15 = vmax.f32 %v373_v35, 0.0  ;;  %v390_v16 = vmax.f32 %v374_v0, 0.0  ;;  %395 = vst.msk [vmem:[%s787_s5] sm:$0xff] %vm230_vm2, %v379_v24  ;;  %396 = vst.msk [vmem:[%s787_s5 + $0x8] sm:$0xff] %vm230_vm2, %v380_v3 }
 0x138   :  { %397 = vst.msk [vmem:[%s787_s5 + $0x10] sm:$0xff] %vm230_vm2, %v381_v51  ;;  %398 = vst.msk [vmem:[%s787_s5 + $0x18] sm:$0xff] %vm230_vm2, %v382_v4  ;;  %v391_v21 = vmax.f32 %v375_v41, 0.0  ;;  %v392_v22 = vmax.f32 %v376_v1, 0.0  ;;  %v393_v23 = vmax.f32 %v377_v17, 0.0  ;;  %v394_v27 = vmax.f32 %v378_v2, 0.0 }
 0x139   :  { %399 = vst.msk [vmem:[%s787_s5 + $0x20] sm:$0xff] %vm230_vm2, %v383_v5  ;;  %400 = vst.msk [vmem:[%s787_s5 + $0x28] sm:$0xff] %vm230_vm2, %v384_v7 }
 0x13a   :  { %401 = vst.msk [vmem:[%s787_s5 + $0x30] sm:$0xff] %vm230_vm2, %v385_v8  ;;  %402 = vst.msk [vmem:[%s787_s5 + $0x38] sm:$0xff] %vm230_vm2, %v386_v9 }
 0x13b   :  { %403 = vst.msk [vmem:[%s787_s5 + $0x40] sm:$0xff] %vm230_vm2, %v387_v10  ;;  %404 = vst.msk [vmem:[%s787_s5 + $0x48] sm:$0xff] %vm230_vm2, %v388_v13 }
 0x13c   :  { %405 = vst.msk [vmem:[%s787_s5 + $0x50] sm:$0xff] %vm230_vm2, %v389_v15  ;;  %406 = vst.msk [vmem:[%s787_s5 + $0x58] sm:$0xff] %vm230_vm2, %v390_v16 }
 0x13d   :  { %407 = vst.msk [vmem:[%s787_s5 + $0x60] sm:$0xff] %vm230_vm2, %v391_v21  ;;  %408 = vst.msk [vmem:[%s787_s5 + $0x68] sm:$0xff] %vm230_vm2, %v392_v22 }
 0x13e   :  { %409 = vst.msk [vmem:[%s787_s5 + $0x70] sm:$0xff] %vm230_vm2, %v393_v23  ;;  %410 = vst.msk [vmem:[%s787_s5 + $0x78] sm:$0xff] %vm230_vm2, %v394_v27 }

// kernel: forward.10
= control target key start
LH: loop header
LB: loop body
LE: loop exit
PB: predicated region body
PF: predicated region fallthrough
CT: control target
= control target key end

     0   :  { %vm78_vm0 = vcmask 588800   ;;  %vm85_vm1 = vcmask 1043456   ;;  %vm138_vm2 = vcmask 130048   ;;  %v184_v53 = vlaneseq  ;;  %s340_s1 = inlined_call_operand.vmem [shape: bf16[1,72,16], index: 1, kind: input, shape index: {}]   ;;  %s341_s0 = inlined_call_operand.vmem [shape: bf16[1,32,72], index: 0, kind: input, shape index: {}]   ;;  %s342_s2 = inlined_call_operand.vmem [shape: f32[1,16], index: 2, kind: input, shape index: {}]   ;;  %s343_s3 = inlined_call_operand.vmem [shape: f32[1,16], index: 3, kind: input, shape index: {}]   ;;  %s344_s4 = inlined_call_operand.vmem [shape: f32[1,16], index: 4, kind: input, shape index: {}]   ;;  %s345_s5 = inlined_call_operand.vmem [shape: f32[1,32,16], index: 5, kind: output, shape index: {}]  }
   0x1   :  { %v247_v0 = vld [vmem:[%s340_s1] sm:$0xff]   ;;  %v248_v1 = vld [vmem:[%s340_s1 + $0x8] sm:$0xff]   ;;  %v249_v2 = vld [vmem:[%s340_s1 + $0x10] sm:$0xff]  }
   0x2   :  { %232 = vmatprep.subr.bf16.mxu0 %v247_v0  ;;  %v252_v3 = vld [vmem:[%s341_s0] sm:$0xff]   ;;  %v250_v4 = vld [vmem:[%s340_s1 + $0x18] sm:$0xff]   ;;  %v253_v7 = vld [vmem:[%s341_s0 + $0x8] sm:$0xff]   ;;  %v185_v54 = vshrl.u32 %v184_v53, 7 }
   0x3   :  { %233 = vmatpush3.bf16.msra.mxu0 %v247_v0  ;;  %242 = vmatprep.mubr.msk.bf16.mxu0 %vm78_vm0, %v252_v3  ;;  %v251_v5 = vld [vmem:[%s340_s1 + $0x20] ss:$0 sps:$4 sm:$0xff]  }
   0x4   :  { %234 = vmatprep.subr.bf16.mxu0 %v248_v1  ;;  %v87_v6 = vsel %vm85_vm1, %v251_v5, 0  ;;  %v215_v8 = vld [vmem:[%s342_s2] ss:$0 sm:$0xff]  ;;  %v186_v56 = vsub.s32 0, %v185_v54 }
   0x5   :  { %v176_v55 = vld [vmem:[%s343_s3] sm:$0x1] }
   0x6   :  { %v180_v59 = vld [vmem:[%s344_s4] sm:$0x1] }
   0x7   :  { %235 = vmatpush3.bf16.msra.mxu0 %v248_v1 }
   0x8   :  { %236 = vmatprep.subr.bf16.mxu0 %v249_v2 }
   0xb   :  { %237 = vmatpush3.bf16.msra.mxu0 %v249_v2 }
   0xc   :  { %238 = vmatprep.subr.bf16.mxu0 %v250_v4 }
   0xf   :  { %239 = vmatpush3.bf16.msra.mxu0 %v250_v4 }
  0x10   :  { %246 = vmatprep.subr.msk.bf16.mxu0 %vm85_vm1, %v251_v5 }
  0x13   :  { %241 = vmatpush3.bf16.msra.mxu0 %v87_v6 }
  0x16   :  { %243 = vmatmul.mubr.msk.bf16.vlgmr.msra.gmra.mrb[0].mxu0 %vm78_vm0, %v253_v7 }
  0xe9   :  { %v244_v9 = vpop.f32.mrb[0].mxu0 }
  0xea   :  { %v123_v10 = vpop.f32.mrb[1].mxu0  ;;  %v132_v11 = vadd.f32 %v244_v9, %v215_v8 }
  0xeb   :  { %v124_v12 = vadd.f32 %v215_v8, %v123_v10  ;;  %v245_v13 = vpop.f32.mrb[2].mxu0 }
  0xec   :  { %v126_v14 = vpop.f32.mrb[3].mxu0  ;;  %v135_v16 = vadd.f32 %v245_v13, %v215_v8  ;;  %v155_v18 = vmul.f32 %v132_v11, %v132_v11  ;;  %v142_v23 = vsel %vm138_vm2, %v132_v11, 0.0 }
  0xed   :  { %v153_v15 = vmul.f32 %v124_v12, %v124_v12  ;;  %v127_v17 = vadd.f32 %v215_v8, %v126_v14  ;;  %v139_v19 = vsel %vm138_vm2, %v124_v12, 0.0 }
  0xee   :  { %v156_v25 = vmul.f32 %v135_v16, %v135_v16  ;;  %v160_v29 = vsel %vm138_vm2, %v155_v18, 0.0  ;;  %v144_v30 = vsel %vm138_vm2, %v135_v16, 0.0 }
  0xef   :  { %v140_v20 = vsel %vm138_vm2, %v127_v17, 0.0  ;;  %v154_v21 = vmul.f32 %v127_v17, %v127_v17  ;;  %v157_v24 = vsel %vm138_vm2, %v153_v15, 0.0 }
  0xf0   :  { %v141_v22 = vadd.f32 %v140_v20, %v139_v19  ;;  %v162_v33 = vsel %vm138_vm2, %v156_v25, 0.0 }
  0xf1   :  { %v158_v26 = vsel %vm138_vm2, %v154_v21, 0.0 }
  0xf2   :  { %v143_v27 = vadd.f32 %v142_v23, %v141_v22  ;;  %v159_v28 = vadd.f32 %v158_v26, %v157_v24 }
  0xf4   :  { %v145_v31 = vadd.f32 %v144_v30, %v143_v27  ;;  %v161_v32 = vadd.f32 %v160_v29, %v159_v28 }
  0xf6   :  { %v146_v34 = vrot.slane %v145_v31, 4  ;;  %v163_v35 = vadd.f32 %v162_v33, %v161_v32 }
  0xf8   :  { %v147_v36 = vadd.f32 %v146_v34, %v145_v31  ;;  %v164_v37 = vrot.slane %v163_v35, 4 }
  0xfa   :  { %v148_v38 = vrot.slane %v147_v36, 2  ;;  %v165_v39 = vadd.f32 %v164_v37, %v163_v35 }
  0xfc   :  { %v149_v40 = vadd.f32 %v148_v38, %v147_v36  ;;  %v166_v41 = vrot.slane %v165_v39, 2 }
  0xfe   :  { %v150_v42 = vrot.slane %v149_v40, 1  ;;  %v167_v43 = vadd.f32 %v166_v41, %v165_v39 }
 0x100   :  { %v151_v44 = vadd.f32 %v150_v42, %v149_v40  ;;  %v168_v45 = vrot.slane %v167_v43, 1 }
 0x102   :  { %v169_v46 = vadd.f32 %v168_v45, %v167_v43  ;;  %v171_v47 = vmul.f32 0.03125, %v151_v44 }
 0x104   :  { %v172_v48 = vmul.f32 0.03125, %v169_v46  ;;  %v173_v49 = vmul.f32 %v171_v47, %v171_v47 }
 0x106   :  { %v174_v50 = vsub.f32 %v172_v48, %v173_v49 }
 0x108   :  { %v175_v51 = vmax.f32 %v174_v50, 0.0 }
 0x10a   :  { %v177_v52 = vadd.f32 1e-05, %v175_v51 }
 0x10c   :  { %254 = vrsqrt.f32 %v177_v52 }
 0x116   :  { %v255_v57 = vpop.eup %254 }
 0x117   :  { %v179_v58 = vmul.f32 %v255_v57, %v176_v55 }
 0x119   :  { %v181_v60 = vmul.f32 %v179_v58, %v171_v47  ;;  %v187_v61 = vrot.slane %v179_v58, %v186_v56 }
 0x11b   :  { %v182_v62 = vsub.f32 %v180_v59, %v181_v60  ;;  %v189_v63 = vmul.f32 %v187_v61, %v124_v12  ;;  %v190_v0 = vmul.f32 %v187_v61, %v127_v17  ;;  %v191_v1 = vmul.f32 %v187_v61, %v132_v11 }
 0x11c   :  { %v192_v2 = vmul.f32 %v187_v61, %v135_v16 }
 0x11d   :  { %v197_v3 = vrot.slane %v182_v62, %v186_v56 }
 0x11f   :  { %v199_v4 = vadd.f32 %v197_v3, %v189_v63  ;;  %v200_v5 = vadd.f32 %v197_v3, %v190_v0  ;;  %v201_v6 = vadd.f32 %v197_v3, %v191_v1  ;;  %v202_v7 = vadd.f32 %v197_v3, %v192_v2 }
 0x121   :  { %v203_v8 = vmax.f32 %v199_v4, 0.0  ;;  %v204_v9 = vmax.f32 %v200_v5, 0.0  ;;  %v205_v10 = vmax.f32 %v201_v6, 0.0  ;;  %v206_v13 = vmax.f32 %v202_v7, 0.0 }
 0x123   :  { %207 = vst.msk [vmem:[%s345_s5] sm:$0xff] %vm138_vm2, %v203_v8  ;;  %208 = vst.msk [vmem:[%s345_s5 + $0x8] sm:$0xff] %vm138_vm2, %v204_v9 }
 0x124   :  { %209 = vst.msk [vmem:[%s345_s5 + $0x10] sm:$0xff] %vm138_vm2, %v205_v10  ;;  %210 = vst.msk [vmem:[%s345_s5 + $0x18] sm:$0xff] %vm138_vm2, %v206_v13 }

// kernel: forward.12
= control target key start
LH: loop header
LB: loop body
LE: loop exit
PB: predicated region body
PF: predicated region fallthrough
CT: control target
= control target key end

     0   :  { %v256_v0 = vmov 0.0   ;;  %vm257_vm0 = vmmov 0   ;;  %vm45_vm1 = vcmask 261120   ;;  %v258_v12 = vmov 0   ;;  %s331_s1 = inlined_call_operand.vmem [shape: bf16[32,64], index: 1, kind: input, shape index: {}]   ;;  %s332_s3 = inlined_call_operand.vmem [shape: bf16[64,256], index: 3, kind: input, shape index: {}]   ;;  %s333_s0 = inlined_call_operand.vmem [shape: bf16[2,32], index: 0, kind: input, shape index: {}]   ;;  %s334_s2 = inlined_call_operand.vmem [shape: f32[1,64], index: 2, kind: input, shape index: {}]   ;;  %s335_s4 = inlined_call_operand.vmem [shape: f32[1,256], index: 4, kind: input, shape index: {}]   ;;  %s336_s5 = inlined_call_operand.vmem [shape: f32[2,256], index: 5, kind: output, shape index: {}]  }
   0x1   :  { %231 = vmatprep.subr.bf16.mxu0 %v256_v0  ;;  %v242_v1 = vld [vmem:[%s331_s1] sm:$0xff]   ;;  %235 = vmatprep.mubr.msk.bf16.mxu0 %vm257_vm0, %v256_v0  ;;  %v243_v2 = vld [vmem:[%s331_s1 + $0x8] sm:$0xff]   ;;  %v247_v5 = vld [vmem:[%s332_s3 + $0x14] ss:$8 sps:$4 sm:$0xff]   ;;  %vm151_vm2 = vcmask 523264   ;;  %v101_v21 = vlaneseq }
   0x2   :  { %232 = vmatpush3.bf16.msra.mxu0 %v242_v1  ;;  %v244_v3 = vld [vmem:[%s332_s3 + $0x4] ss:$8 sps:$4 sm:$0xff]   ;;  %v246_v4 = vld [vmem:[%s332_s3] ss:$8 sps:$4 sm:$0xff]   ;;  %v249_v7 = vld [vmem:[%s332_s3 + $0x10] ss:$8 sps:$4 sm:$0xff]   ;;  %187 = vmatprep.mubr.bf16.mxu1 %v258_v12 }
   0x3   :  { %233 = vmatprep.subr.bf16.mxu0 %v256_v0  ;;  %v21_v6 = vld [vmem:[%s333_s0] sm:$0x1]  ;;  %155 = vmatprep.subr.bf16.mxu1 %v244_v3  ;;  %v250_v8 = vld [vmem:[%s332_s3 + $0x24] ss:$8 sps:$4 sm:$0xff]   ;;  %v253_v10 = vld [vmem:[%s332_s3 + $0x34] ss:$8 sps:$4 sm:$0xff]  }
   0x4   :  { %156 = vmatpush1.bf16.msra.mxu1 %v246_v4  ;;  %v252_v9 = vld [vmem:[%s332_s3 + $0x20] ss:$8 sps:$4 sm:$0xff]   ;;  %v255_v11 = vld [vmem:[%s332_s3 + $0x30] ss:$8 sps:$4 sm:$0xff]   ;;  %v102_v22 = vshrl.u32 %v101_v21, 7 }
   0x5   :  { %157 = vmatprep.subr.bf16.mxu1 %v247_v5  ;;  %v214_v13 = vld [vmem:[%s334_s2] ss:$0 sm:$0xff] }
   0x6   :  { %234 = vmatpush3.bf16.msra.mxu0 %v243_v2  ;;  %v103_v23 = vsub.s32 0, %v102_v22  ;;  %v99_v24 = vld [vmem:[%s335_s4] sm:$0x3]  ;;  %v107_v25 = vsub.s32 1, %v102_v22 }
   0x8   :  { %158 = vmatpush1.bf16.msra.mxu1 %v249_v7  ;;  %v104_v26 = vrot.slane %v99_v24, %v103_v23  ;;  %v108_v27 = vrot.slane %v99_v24, %v107_v25 }
   0x9   :  { %236 = vmatmul.mubr.msk.bf16.vlgmr.msra.gmra.mrb[0].mxu0 %vm45_vm1, %v21_v6  ;;  %159 = vmatprep.subr.bf16.mxu1 %v250_v8 }
   0xc   :  { %160 = vmatpush1.bf16.msra.mxu1 %v252_v9 }
   0xd   :  { %161 = vmatprep.subr.bf16.mxu1 %v253_v10 }
  0x10   :  { %162 = vmatpush1.bf16.msra.mxu1 %v255_v11 }
  0xdc   :  { %v83_v14 = vpop.f32.mrb[0].mxu0 }
  0xdd   :  { %v84_v15 = vadd.f32 %v214_v13, %v83_v14  ;;  %v237_v16 = vpop.f32.mrb[1].mxu0 }
  0xde   :  { %v86_v17 = vpop.f32.mrb[2].mxu0 }
  0xdf   :  { %v89_v18 = vmax.f32 %v84_v15, 0.0  ;;  %v238_v19 = vpop.f32.mrb[3].mxu0 }
  0xe1   :  { %v90_v20 = vpack.c.bf16 %v89_v18, %v89_v18 }
  0xe3   :  { %226 = vmatmul.mubr.msk.bf16.vlgmr.msra.gmra.mrb[0].mxu1 %vm151_vm2, %v90_v20 }
 0x1b6   :  { %v189_v28 = vpop.f32.mrb[0].mxu1 }
 0x1b7   :  { %v190_v29 = vadd.f32 %v189_v28, %v104_v26  ;;  %v191_v30 = vpop.f32.mrb[1].mxu1 }
 0x1b8   :  { %v192_v31 = vadd.f32 %v191_v30, %v108_v27  ;;  %v193_v32 = vpop.f32.mrb[2].mxu1 }
 0x1b9   :  { %v196_v33 = vmax.f32 %v190_v29, 0.0  ;;  %v194_v34 = vpop.f32.mrb[3].mxu1 }
 0x1ba   :  { %v197_v35 = vmax.f32 %v192_v31, 0.0 }
 0x1bc   :  { %v200_v36 = vcombine.low %v196_v33, %v197_v35 }
 0x1be   :  { %227 = vst.sshfl [vmem:[%s336_s5] sm:$0x33 pattern:$0x76325410] %v200_v36 }

// kernel: forward.11
= control target key start
LH: loop header
LB: loop body
LE: loop exit
PB: predicated region body
PF: predicated region fallthrough
CT: control target
= control target key end

     0   :  { %v481_v2 = vmov 0.0   ;;  %v79_v10 = vlaneseq  ;;  %v482_v15 = vmov 1966171168   ;;  %s614_s0 = inlined_call_operand.vmem [shape: bf16[2,256], index: 0, kind: input, shape index: {}]   ;;  %s615_s1 = inlined_call_operand.vmem [shape: bf16[256,64], index: 1, kind: input, shape index: {}]   ;;  %s616_s2 = inlined_call_operand.vmem [shape: f32[1,64], index: 2, kind: input, shape index: {}]   ;;  %s617_s3 = inlined_call_operand.vmem [shape: bf16[64,64], index: 3, kind: input, shape index: {}]   ;;  %s618_s4 = inlined_call_operand.vmem [shape: f32[1,64], index: 4, kind: input, shape index: {}]   ;;  %s619_s5 = inlined_call_operand.vmem [shape: f32[2,32], index: 5, kind: input, shape index: {}]   ;;  %s620_s6 = inlined_call_operand.vmem [shape: f32[2,32], index: 6, kind: output, shape index: {0}]   ;;  %s621_s7 = inlined_call_operand.hbm [shape: f32[2,32], index: 7, kind: output, shape index: {1}]  }
   0x1   :  { %v433_v0 = vld [vmem:[%s615_s1 + $0x40] sm:$0xff]   ;;  %415 = vmatprep.subr.bf16.mxu1 %v481_v2  ;;  %v435_v3 = vld [vmem:[%s615_s1 + $0x48] sm:$0xff]   ;;  %v437_v5 = vld [vmem:[%s615_s1 + $0x50] sm:$0xff]   ;;  %v77_v16 = vunpack.c.l.s4 %v482_v15 }
   0x2   :  { %v434_v1 = vld [vmem:[%s615_s1] sm:$0xff]   ;;  %388 = vmatprep.subr.bf16.mxu0 %v433_v0  ;;  %v436_v4 = vld [vmem:[%s615_s1 + $0x8] sm:$0xff]   ;;  %v438_v6 = vld [vmem:[%s615_s1 + $0x10] sm:$0xff]   ;;  %v80_v17 = vshrl.u32 %v79_v10, 7 }
   0x3   :  { %389 = vmatpush3.bf16.msra.mxu0 %v434_v1  ;;  %v439_v7 = vld [vmem:[%s615_s1 + $0x58] sm:$0xff]   ;;  %v441_v9 = vld [vmem:[%s615_s1 + $0x60] sm:$0xff]   ;;  %v443_v12 = vld [vmem:[%s615_s1 + $0x68] sm:$0xff]   ;;  %v78_v21 = vunpack.c.0.s8 %v77_v16 }
   0x4   :  { %390 = vmatprep.subr.bf16.mxu0 %v435_v3  ;;  %v440_v8 = vld [vmem:[%s615_s1 + $0x18] sm:$0xff]   ;;  %v442_v11 = vld [vmem:[%s615_s1 + $0x20] sm:$0xff]   ;;  %v444_v14 = vld [vmem:[%s615_s1 + $0x28] sm:$0xff]  }
   0x5   :  { %v364_v13 = vld.sshfl [vmem:[%s614_s0] sm:$0x11 pattern:$0x75316420]  ;;  %v450_v19 = vld [vmem:[%s617_s3 + $0x8] sm:$0xff]   ;;  %v445_v22 = vld [vmem:[%s615_s1 + $0x70] sm:$0xff]  }
   0x6   :  { %v449_v18 = vld [vmem:[%s617_s3] sm:$0xff]   ;;  %v75_v20 = vcombine.high %v364_v13, %v364_v13 }
   0x7   :  { %391 = vmatpush3.bf16.msra.mxu0 %v436_v4  ;;  %416 = vmatpush3.bf16.msra.mxu1 %v449_v18 }
   0x8   :  { %392 = vmatprep.subr.bf16.mxu0 %v437_v5  ;;  %417 = vmatprep.subr.bf16.mxu1 %v481_v2 }
   0xb   :  { %393 = vmatpush3.bf16.msra.mxu0 %v438_v6 }
   0xc   :  { %394 = vmatprep.subr.bf16.mxu0 %v439_v7 }
   0xf   :  { %395 = vmatpush3.bf16.msra.mxu0 %v440_v8 }
  0x10   :  { %396 = vmatprep.subr.bf16.mxu0 %v441_v9 }
  0x13   :  { %397 = vmatpush3.bf16.msra.mxu0 %v442_v11 }
  0x14   :  { %398 = vmatprep.subr.bf16.mxu0 %v443_v12 }
  0x15   :  { %13 = vsyncpa [#allocation3], 0  ;;  %v81_v23 = vsub.s32 %v78_v21, %v80_v17  ;;  %v446_v24 = vld [vmem:[%s615_s1 + $0x30] sm:$0xff]   ;;  %418 = vmatpush3.bf16.msra.mxu1 %v450_v19  ;;  %v447_v26 = vld [vmem:[%s615_s1 + $0x78] sm:$0xff]   ;;  %vm483_vm0 = vmmov 0   ;;  %vm269_vm1 = vcmask 523264  }
  0x16   :  { %419 = vmatprep.subr.bf16.mxu1 %v481_v2  ;;  %v448_v27 = vld [vmem:[%s615_s1 + $0x38] sm:$0xff]   ;;  %v451_v29 = vld [vmem:[%s617_s3 + $0x10] sm:$0xff]   ;;  %423 = vmatprep.mubr.msk.bf16.mxu1 %vm483_vm0, %v481_v2  ;;  %v363_v32 = vld [vmem:[%s616_s2] ss:$0 sm:$0xff]  ;;  %s484_s2 = smov 32   ;;  %vm326_vm2 = vcmask 254976  }
  0x17   :  { %399 = vmatpush3.bf16.msra.mxu0 %v444_v14  ;;  %v89_v25 = vrot.slane %v75_v20, %v81_v23  ;;  %v82_v28 = vrot.slane %v364_v13, %v81_v23  ;;  %v452_v30 = vld [vmem:[%s617_s3 + $0x18] sm:$0xff]   ;;  %v381_v40 = vld [vmem:[%s618_s4] ss:$0 sm:$0xff]  ;;  %s485_s4 = smov 96  }
  0x18   :  { %400 = vmatprep.subr.bf16.mxu0 %v445_v22  ;;  %v315_v47 = vld [vmem:[%s619_s5] sm:$0x3]  ;;  %s486_s5 = smov [#allocation2]  }
  0x19   :  { %220 = vmatprep.mubr.bf16.mxu0 %v89_v25  ;;  %420 = vmatpush3.bf16.msra.mxu1 %v451_v29  ;;  %s353_s23 = sshll.u32 %s486_s5, 4  ;;  %s354_s23 = int_to_ptr.vmem [resolvable:$true] %s353_s23 }
  0x1a   :  { %421 = vmatprep.subr.bf16.mxu1 %v481_v2  ;;  %s457_s26 = scalar_lea.vmem %s354_s23, 32  ;;  %p462_p1 = scmp.lt.s32.totalorder %s354_s23, %s354_s23 }
  0x1b   :  { %401 = vmatpush3.bf16.msra.mxu0 %v446_v24  ;;  %p458_p0 = scmp.ne.s32.totalorder %s354_s23, %s457_s26  ;;  %p463_p2 = scmp.lt.s32.totalorder %s457_s26, %s457_s26 }
  0x1c   :  { %402 = vmatprep.subr.bf16.mxu0 %v447_v26 }
  0x1d   :  { %422 = vmatpush3.bf16.msra.mxu1 %v452_v30  ;;  %p464_p3 = por %p463_p2, %p462_p1 }
  0x1f   :  { %403 = vmatpush3.bf16.msra.mxu0 %v448_v27  ;;  %p465_p4 = pnand %p464_p3, %p458_p0 }
  0x22   :  { %221 = vmatmul.mubr.bf16.vlgmr.msra.gmra.mrb[0].mxu0 %v82_v28 }
  0xf5   :  { %v404_v31 = vpop.f32.mrb[0].mxu0 }
  0xf6   :  { %v405_v33 = vpop.f32.mrb[1].mxu0 }
  0xf7   :  { %v406_v34 = vadd.f32 %v405_v33, %v404_v31  ;;  %v407_v35 = vpop.f32.mrb[2].mxu0 }
  0xf8   :  { %v408_v36 = vpop.f32.mrb[3].mxu0 }
  0xf9   :  { %v223_v37 = vadd.f32 %v406_v34, %v363_v32 }
  0xfb   :  { %v228_v38 = vmax.f32 %v223_v37, 0.0 }
  0xfd   :  { %v229_v39 = vpack.c.bf16 %v228_v38, %v228_v38 }
  0xff   :  { %424 = vmatmul.mubr.msk.bf16.vlgmr.msra.gmra.mrb[0].mxu1 %vm269_vm1, %v229_v39 }
 0x1d2   :  { %v307_v41 = vpop.f32.mrb[0].mxu1 }
 0x1d3   :  { %v308_v42 = vadd.f32 %v381_v40, %v307_v41  ;;  %v425_v43 = vpop.f32.mrb[1].mxu1 }
 0x1d4   :  { %v310_v44 = vpop.f32.mrb[2].mxu1 }
 0x1d5   :  { %v426_v45 = vpop.f32.mrb[3].mxu1  ;;  %v331_v46 = vmul.f32 %v308_v42, %v308_v42  ;;  %v328_v48 = vmul.f32 2.0, %v308_v42  ;;  %v313_v50 = vmul.f32 1.442695, %v308_v42 }
 0x1d7   :  { %333 = vrot.lane.b32.xlu0 %v331_v46, %s484_s2  ;;  %v329_v49 = vmul.f32 1.442695, %v328_v48 }
 0x1d9   :  { %453 = vpow2.f32 %v329_v49 }
 0x1da   :  { %455 = vpow2.f32 %v313_v50 }
 0x1db   :  { %317 = vrot.lane.b32.xlu0 %v315_v47, %s484_s2 }
 0x1e3   :  { %v454_v51 = vpop.eup %453 }
 0x1e4   :  { %v456_v55 = vpop.eup %455 }
 0x249   :  { %v334_v52 = vpop.permute.xlu0 %333 }
 0x24a   :  { %v336_v53 = vadd.f32 %v454_v51, %v334_v52 }
 0x24c   :  { %v337_v54 = vsub.f32 %v336_v53, %v328_v48 }
 0x24d   :  { %v318_v56 = vpop.permute.xlu0 %317 }
 0x24e   :  { %v387_v57 = vadd.f32 -1.0, %v337_v54  ;;  %v320_v58 = vmul.f32 %v456_v55, %v318_v56 }
 0x250   :  { %322 = vrot.lane.b32.xlu1 %v320_v58, %s485_s4  ;;  %v339_v59 = vmul.f32 0.5, %v387_v57 }
 0x254   :  { %341 = vrot.lane.b32.xlu1 %v339_v59, %s485_s4 }
 0x2c2   :  { %v323_v60 = vpop.permute.xlu1 %322 }
 0x2c3   :  { %v325_v61 = vadd.f32 %v323_v60, %v308_v42 }
 0x2c5   :  { %327 = vst.msk [vmem:[%s620_s6] sm:$0x3] %vm326_vm2, %v325_v61 }
 0x2c6   :  { %v342_v62 = vpop.permute.xlu1 %341 }
 0x2c7   :  { %344 = vst.msk [vmem:[#allocation2] sm:$0x3] %vm326_vm2, %v342_v62 }
 0x2c8   :  { %468 = shalt.err (!%p465_p4)
}
 0x2c9   :  { %s469_s29 = scalar_lea.hbm %s621_s7, 32 }
 0x2ca   :  { %p470_p5 = scmp.ne.s32.totalorder %s621_s7, %s469_s29  ;;  %p473_p6 = scmp.lt.u32.totalorder %s469_s29, %s621_s7 }
 0x2cc   :  { %p475_p7 = pnand %p473_p6, %p470_p5 }
 0x2ce   :  { %478 = shalt.err (!%p475_p7)
}
 0x2cf   :  { %356 = dma.vmem_to_hbm [thread:$0]  %s354_s23, 32, %s621_s7, [#allocation3]  }
 0x2d0   :  { %479 = dma.done.wait [#allocation3], 32  }
 0x2d1   :  { %480 = vsyncadd [#allocation3], 4294967264 }
 0x2d2   :  { %362 = vsyncpa [#allocation3], 1 }

// kernel: forward.13
= control target key start
LH: loop header
LB: loop body
LE: loop exit
PB: predicated region body
PF: predicated region fallthrough
CT: control target
= control target key end

     0   :  { %vm74_vm0 = vcmask 523264   ;;  %vm130_vm1 = vcmask 64512   ;;  %s1171_s1 = inlined_call_operand.vmem [shape: bf16[4,64,8], index: 1, kind: input, shape index: {}]   ;;  %s1172_s0 = inlined_call_operand.vmem [shape: bf16[4,32,64], index: 0, kind: input, shape index: {}]   ;;  %s1173_s2 = inlined_call_operand.vmem [shape: f32[1,8], index: 2, kind: input, shape index: {}]   ;;  %s1174_s3 = inlined_call_operand.vmem [shape: f32[1,8], index: 3, kind: input, shape index: {}]   ;;  %s1175_s4 = inlined_call_operand.vmem [shape: f32[1,8], index: 4, kind: input, shape index: {}]   ;;  %s1176_s5 = inlined_call_operand.vmem [shape: f32[4,32,8], index: 5, kind: output, shape index: {}]  }
   0x1   :  { %v816_v0 = vld [vmem:[%s1171_s1] sm:$0xff]   ;;  %v818_v2 = vld [vmem:[%s1171_s1 + $0x8] sm:$0xff]   ;;  %v820_v4 = vld [vmem:[%s1171_s1 + $0x10] sm:$0xff]  }
   0x2   :  { %v817_v1 = vld [vmem:[%s1171_s1 + $0x20] sm:$0xff]   ;;  %768 = vmatprep.subr.bf16.mxu0 %v816_v0  ;;  %v819_v3 = vld [vmem:[%s1171_s1 + $0x28] sm:$0xff]   ;;  %v821_v5 = vld [vmem:[%s1171_s1 + $0x30] sm:$0xff]  }
   0x3   :  { %780 = vmatprep.subr.bf16.mxu1 %v817_v1  ;;  %769 = vmatpush3.bf16.msra.mxu0 %v816_v0  ;;  %v822_v6 = vld [vmem:[%s1171_s1 + $0x18] sm:$0xff]   ;;  %v824_v8 = vld [vmem:[%s1172_s0] sm:$0xff]   ;;  %v825_v9 = vld [vmem:[%s1172_s0 + $0x10] sm:$0xff]  }
   0x4   :  { %781 = vmatpush3.bf16.msra.mxu1 %v817_v1  ;;  %770 = vmatprep.subr.bf16.mxu0 %v818_v2  ;;  %v823_v7 = vld [vmem:[%s1171_s1 + $0x38] sm:$0xff]   ;;  %v828_v10 = vld [vmem:[%s1171_s1 + $0x40] sm:$0xff]   ;;  %v826_v12 = vld [vmem:[%s1172_s0 + $0x8] sm:$0xff]  }
   0x5   :  { %782 = vmatprep.subr.bf16.mxu1 %v819_v3  ;;  %776 = vmatprep.mubr.msk.bf16.mxu0 %vm74_vm0, %v824_v8  ;;  %v829_v11 = vld [vmem:[%s1171_s1 + $0x60] sm:$0xff]   ;;  %v827_v13 = vld [vmem:[%s1172_s0 + $0x18] sm:$0xff]   ;;  %v830_v14 = vld [vmem:[%s1171_s1 + $0x48] sm:$0xff]  }
   0x6   :  { %788 = vmatprep.mubr.msk.bf16.mxu1 %vm74_vm0, %v825_v9  ;;  %v831_v15 = vld [vmem:[%s1171_s1 + $0x68] sm:$0xff]   ;;  %v832_v16 = vld [vmem:[%s1171_s1 + $0x50] sm:$0xff]   ;;  %v836_v18 = vld [vmem:[%s1172_s0 + $0x20] sm:$0xff]  }
   0x7   :  { %771 = vmatpush3.bf16.msra.mxu0 %v818_v2  ;;  %v833_v17 = vld [vmem:[%s1171_s1 + $0x70] sm:$0xff]   ;;  %v834_v20 = vld [vmem:[%s1171_s1 + $0x58] sm:$0xff]   ;;  %v838_v22 = vld [vmem:[%s1172_s0 + $0x28] sm:$0xff]  }
   0x8   :  { %783 = vmatpush3.bf16.msra.mxu1 %v819_v3  ;;  %772 = vmatprep.subr.bf16.mxu0 %v820_v4  ;;  %v837_v19 = vld [vmem:[%s1172_s0 + $0x30] sm:$0xff]   ;;  %v835_v21 = vld [vmem:[%s1171_s1 + $0x78] sm:$0xff]   ;;  %v955_v24 = vld [vmem:[%s1173_s2] ss:$0 sm:$0xff] }
   0x9   :  { %784 = vmatprep.subr.bf16.mxu1 %v821_v5  ;;  %v839_v23 = vld [vmem:[%s1172_s0 + $0x38] sm:$0xff]  }
   0xb   :  { %773 = vmatpush3.bf16.msra.mxu0 %v820_v4 }
   0xc   :  { %785 = vmatpush3.bf16.msra.mxu1 %v821_v5  ;;  %774 = vmatprep.subr.bf16.mxu0 %v822_v6 }
   0xd   :  { %786 = vmatprep.subr.bf16.mxu1 %v823_v7 }
   0xf   :  { %775 = vmatpush3.bf16.msra.mxu0 %v822_v6 }
  0x10   :  { %787 = vmatpush3.bf16.msra.mxu1 %v823_v7  ;;  %792 = vmatprep.subr.bf16.mxu0 %v828_v10 }
  0x11   :  { %804 = vmatprep.subr.bf16.mxu1 %v829_v11 }
  0x12   :  { %777 = vmatmul.mubr.msk.bf16.vlgmr.msra.gmra.mrb[0].mxu0 %vm74_vm0, %v826_v12 }
  0x13   :  { %789 = vmatmul.mubr.msk.bf16.vlgmr.msra.gmra.mrb[0].mxu1 %vm74_vm0, %v827_v13  ;;  %793 = vmatpush3.bf16.msra.mxu0 %v828_v10 }
  0x14   :  { %805 = vmatpush3.bf16.msra.mxu1 %v829_v11  ;;  %794 = vmatprep.subr.bf16.mxu0 %v830_v14 }
  0x15   :  { %806 = vmatprep.subr.bf16.mxu1 %v831_v15  ;;  %800 = vmatprep.mubr.msk.bf16.mxu0 %vm74_vm0, %v836_v18 }
  0x16   :  { %812 = vmatprep.mubr.msk.bf16.mxu1 %vm74_vm0, %v837_v19 }
  0x17   :  { %795 = vmatpush3.bf16.msra.mxu0 %v830_v14 }
  0x18   :  { %807 = vmatpush3.bf16.msra.mxu1 %v831_v15  ;;  %796 = vmatprep.subr.bf16.mxu0 %v832_v16 }
  0x19   :  { %808 = vmatprep.subr.bf16.mxu1 %v833_v17 }
  0x1b   :  { %797 = vmatpush3.bf16.msra.mxu0 %v832_v16 }
  0x1c   :  { %809 = vmatpush3.bf16.msra.mxu1 %v833_v17  ;;  %798 = vmatprep.subr.bf16.mxu0 %v834_v20 }
  0x1d   :  { %810 = vmatprep.subr.bf16.mxu1 %v835_v21 }
  0x1f   :  { %799 = vmatpush3.bf16.msra.mxu0 %v834_v20 }
  0x20   :  { %811 = vmatpush3.bf16.msra.mxu1 %v835_v21 }
  0x22   :  { %801 = vmatmul.mubr.msk.bf16.vlgmr.msra.gmra.mrb[4].mxu0 %vm74_vm0, %v838_v22 }
  0x23   :  { %813 = vmatmul.mubr.msk.bf16.vlgmr.msra.gmra.mrb[4].mxu1 %vm74_vm0, %v839_v23 }
  0xe5   :  { %v778_v25 = vpop.f32.mrb[0].mxu0 }
  0xe6   :  { %v790_v26 = vpop.f32.mrb[0].mxu1  ;;  %v115_v27 = vpop.f32.mrb[1].mxu0  ;;  %v958_v28 = vadd.f32 %v778_v25, %v955_v24 }
  0xe7   :  { %v961_v29 = vadd.f32 %v955_v24, %v115_v27  ;;  %v251_v30 = vpop.f32.mrb[1].mxu1  ;;  %v779_v31 = vpop.f32.mrb[2].mxu0  ;;  %v967_v35 = vadd.f32 %v790_v26, %v955_v24 }
  0xe8   :  { %v964_v32 = vadd.f32 %v955_v24, %v251_v30  ;;  %v791_v33 = vpop.f32.mrb[2].mxu1  ;;  %v118_v34 = vpop.f32.mrb[3].mxu0  ;;  %v134_v38 = vsel %vm130_vm1, %v958_v28, 0.0  ;;  %v976_v40 = vadd.f32 %v779_v31, %v955_v24  ;;  %v147_v45 = vmul.f32 %v958_v28, %v958_v28 }
  0xe9   :  { %v254_v36 = vpop.f32.mrb[3].mxu1  ;;  %v145_v39 = vmul.f32 %v961_v29, %v961_v29  ;;  %v981_v42 = vadd.f32 %v791_v33, %v955_v24  ;;  %v984_v43 = vadd.f32 %v955_v24, %v118_v34  ;;  %v282_v46 = vmul.f32 %v967_v35, %v967_v35 }
  0xea   :  { %v280_v37 = vmul.f32 %v964_v32, %v964_v32  ;;  %v266_v41 = vsel %vm130_vm1, %v964_v32, 0.0  ;;  %v987_v44 = vadd.f32 %v955_v24, %v254_v36  ;;  %v131_v47 = vsel %vm130_vm1, %v961_v29, 0.0 }
  0xeb   :  { %v132_v49 = vsel %vm130_vm1, %v984_v43, 0.0  ;;  %v146_v50 = vmul.f32 %v984_v43, %v984_v43  ;;  %v269_v53 = vsel %vm130_vm1, %v967_v35, 0.0  ;;  %v149_v54 = vsel %vm130_vm1, %v145_v39, 0.0 }
  0xec   :  { %v284_v48 = vsel %vm130_vm1, %v280_v37, 0.0  ;;  %v267_v51 = vsel %vm130_vm1, %v987_v44, 0.0  ;;  %v281_v52 = vmul.f32 %v987_v44, %v987_v44  ;;  %v133_v55 = vadd.f32 %v132_v49, %v131_v47 }
  0xed   :  { %v268_v56 = vadd.f32 %v267_v51, %v266_v41  ;;  %v148_v57 = vmul.f32 %v976_v40, %v976_v40  ;;  %v283_v58 = vmul.f32 %v981_v42, %v981_v42  ;;  %v150_v59 = vsel %vm130_vm1, %v146_v50, 0.0 }
  0xee   :  { %v285_v60 = vsel %vm130_vm1, %v281_v52, 0.0  ;;  %v135_v61 = vadd.f32 %v134_v38, %v133_v55  ;;  %v151_v62 = vadd.f32 %v150_v59, %v149_v54  ;;  %v152_v1 = vsel %vm130_vm1, %v147_v45, 0.0 }
  0xef   :  { %v270_v63 = vadd.f32 %v269_v53, %v268_v56  ;;  %v286_v0 = vadd.f32 %v285_v60, %v284_v48  ;;  %v287_v2 = vsel %vm130_vm1, %v282_v46, 0.0  ;;  %v136_v3 = vsel %vm130_vm1, %v976_v40, 0.0 }
  0xf0   :  { %v271_v4 = vsel %vm130_vm1, %v981_v42, 0.0  ;;  %v137_v5 = vadd.f32 %v136_v3, %v135_v61  ;;  %v153_v6 = vadd.f32 %v152_v1, %v151_v62  ;;  %v154_v9 = vsel %vm130_vm1, %v148_v57, 0.0 }
  0xf1   :  { %v272_v7 = vadd.f32 %v271_v4, %v270_v63  ;;  %v288_v8 = vadd.f32 %v287_v2, %v286_v0  ;;  %v289_v10 = vsel %vm130_vm1, %v283_v58, 0.0 }
  0xf2   :  { %v138_v11 = vrot.slane %v137_v5, 4  ;;  %v155_v12 = vadd.f32 %v154_v9, %v153_v6 }
  0xf3   :  { %v273_v13 = vrot.slane %v272_v7, 4  ;;  %v290_v14 = vadd.f32 %v289_v10, %v288_v8 }
  0xf4   :  { %v139_v18 = vadd.f32 %v138_v11, %v137_v5  ;;  %v156_v19 = vrot.slane %v155_v12, 4 }
  0xf5   :  { %v802_v15 = vpop.f32.mrb[4].mxu0  ;;  %v274_v20 = vadd.f32 %v273_v13, %v272_v7  ;;  %v291_v21 = vrot.slane %v290_v14, 4 }
  0xf6   :  { %v814_v16 = vpop.f32.mrb[4].mxu1  ;;  %v386_v17 = vpop.f32.mrb[5].mxu0  ;;  %v140_v27 = vrot.slane %v139_v18, 2  ;;  %v157_v30 = vadd.f32 %v156_v19, %v155_v12  ;;  %v1022_v36 = vadd.f32 %v802_v15, %v955_v24 }
  0xf7   :  { %v521_v22 = vpop.f32.mrb[5].mxu1  ;;  %v803_v23 = vpop.f32.mrb[6].mxu0  ;;  %v275_v31 = vrot.slane %v274_v20, 2  ;;  %v292_v33 = vadd.f32 %v291_v21, %v290_v14  ;;  %v1025_v37 = vadd.f32 %v814_v16, %v955_v24  ;;  %v1028_v38 = vadd.f32 %v955_v24, %v386_v17 }
  0xf8   :  { %v815_v25 = vpop.f32.mrb[6].mxu1  ;;  %v389_v26 = vpop.f32.mrb[7].mxu0  ;;  %v141_v39 = vadd.f32 %v140_v27, %v139_v18  ;;  %v158_v41 = vrot.slane %v157_v30, 2  ;;  %v1031_v47 = vadd.f32 %v955_v24, %v521_v22  ;;  %v404_v52 = vsel %vm130_vm1, %v1022_v36, 0.0 }
  0xf9   :  { %v524_v34 = vpop.f32.mrb[7].mxu1  ;;  %v276_v45 = vadd.f32 %v275_v31, %v274_v20  ;;  %v293_v46 = vrot.slane %v292_v33, 2  ;;  %v417_v53 = vmul.f32 %v1022_v36, %v1022_v36  ;;  %v539_v54 = vsel %vm130_vm1, %v1025_v37, 0.0 }
  0xfa   :  { %v142_v48 = vrot.slane %v141_v39, 1  ;;  %v159_v49 = vadd.f32 %v158_v41, %v157_v30  ;;  %v415_v55 = vmul.f32 %v1028_v38, %v1028_v38  ;;  %v536_v60 = vsel %vm130_vm1, %v1031_v47, 0.0 }
  0xfb   :  { %v277_v50 = vrot.slane %v276_v45, 1  ;;  %v294_v51 = vadd.f32 %v293_v46, %v292_v33  ;;  %v550_v61 = vmul.f32 %v1031_v47, %v1031_v47  ;;  %v1046_v62 = vadd.f32 %v803_v23, %v955_v24 }
  0xfc   :  { %v143_v56 = vadd.f32 %v142_v48, %v141_v39  ;;  %v160_v57 = vrot.slane %v159_v49, 1  ;;  %v1049_v63 = vadd.f32 %v955_v24, %v389_v26  ;;  %v1052_v3 = vadd.f32 %v955_v24, %v524_v34 }
  0xfd   :  { %v278_v58 = vadd.f32 %v277_v50, %v276_v45  ;;  %v295_v59 = vrot.slane %v294_v51, 1  ;;  %v552_v4 = vmul.f32 %v1025_v37, %v1025_v37  ;;  %v401_v5 = vsel %vm130_vm1, %v1028_v38, 0.0 }
  0xfe   :  { %v161_v0 = vadd.f32 %v160_v57, %v159_v49  ;;  %v1059_v6 = vadd.f32 %v815_v25, %v955_v24  ;;  %v402_v7 = vsel %vm130_vm1, %v1049_v63, 0.0  ;;  %v416_v10 = vmul.f32 %v1049_v63, %v1049_v63 }
  0xff   :  { %v279_v1 = vadd.f32 %v278_v58, %v143_v56  ;;  %v296_v2 = vadd.f32 %v295_v59, %v294_v51  ;;  %v403_v9 = vadd.f32 %v402_v7, %v401_v5  ;;  %v537_v11 = vsel %vm130_vm1, %v1052_v3, 0.0 }
 0x100   :  { %v419_v12 = vsel %vm130_vm1, %v415_v55, 0.0  ;;  %v554_v13 = vsel %vm130_vm1, %v550_v61, 0.0  ;;  %v538_v14 = vadd.f32 %v537_v11, %v536_v60  ;;  %v551_v24 = vmul.f32 %v1052_v3, %v1052_v3 }
 0x101   :  { %v297_v8 = vadd.f32 %v296_v2, %v161_v0  ;;  %v406_v15 = vsel %vm130_vm1, %v1046_v62, 0.0  ;;  %v418_v16 = vmul.f32 %v1046_v62, %v1046_v62  ;;  %v405_v17 = vadd.f32 %v404_v52, %v403_v9 }
 0x102   :  { %v420_v18 = vsel %vm130_vm1, %v416_v10, 0.0  ;;  %v553_v19 = vmul.f32 %v1059_v6, %v1059_v6  ;;  %v540_v21 = vadd.f32 %v539_v54, %v538_v14  ;;  %v555_v22 = vsel %vm130_vm1, %v551_v24, 0.0 }
 0x103   :  { %v421_v20 = vadd.f32 %v420_v18, %v419_v12  ;;  %v422_v23 = vsel %vm130_vm1, %v417_v53, 0.0  ;;  %v541_v25 = vsel %vm130_vm1, %v1059_v6, 0.0  ;;  %v407_v26 = vadd.f32 %v406_v15, %v405_v17 }
 0x104   :  { %v556_v27 = vadd.f32 %v555_v22, %v554_v13  ;;  %v557_v30 = vsel %vm130_vm1, %v552_v4, 0.0  ;;  %v542_v33 = vadd.f32 %v541_v25, %v540_v21  ;;  %v424_v34 = vsel %vm130_vm1, %v418_v16, 0.0 }
 0x105   :  { %v423_v31 = vadd.f32 %v422_v23, %v421_v20  ;;  %v408_v39 = vrot.slane %v407_v26, 4  ;;  %v559_v45 = vsel %vm130_vm1, %v553_v19, 0.0  ;;  %v581_v23 = vlaneseq }
 0x106   :  { %v558_v41 = vadd.f32 %v557_v30, %v556_v27  ;;  %v543_v48 = vrot.slane %v542_v33, 4 }
 0x107   :  { %v425_v46 = vadd.f32 %v424_v34, %v423_v31  ;;  %v409_v49 = vadd.f32 %v408_v39, %v407_v26  ;;  %v582_v25 = vshrl.u32 %v581_v23, 7 }
 0x108   :  { %v560_v50 = vadd.f32 %v559_v45, %v558_v41  ;;  %v544_v52 = vadd.f32 %v543_v48, %v542_v33 }
 0x109   :  { %v426_v51 = vrot.slane %v425_v46, 4  ;;  %v410_v53 = vrot.slane %v409_v49, 2  ;;  %v583_v26 = vsub.s32 0, %v582_v25 }
 0x10a   :  { %v561_v54 = vrot.slane %v560_v50, 4  ;;  %v545_v56 = vrot.slane %v544_v52, 2 }
 0x10b   :  { %v427_v55 = vadd.f32 %v426_v51, %v425_v46  ;;  %v411_v57 = vadd.f32 %v410_v53, %v409_v49 }
 0x10c   :  { %v562_v58 = vadd.f32 %v561_v54, %v560_v50  ;;  %v546_v60 = vadd.f32 %v545_v56, %v544_v52 }
 0x10d   :  { %v428_v59 = vrot.slane %v427_v55, 2  ;;  %v412_v61 = vrot.slane %v411_v57, 1 }
 0x10e   :  { %v563_v0 = vrot.slane %v562_v58, 2  ;;  %v547_v4 = vrot.slane %v546_v60, 1 }
 0x10f   :  { %v429_v2 = vadd.f32 %v428_v59, %v427_v55  ;;  %v413_v5 = vadd.f32 %v412_v61, %v411_v57 }
 0x110   :  { %v564_v7 = vadd.f32 %v563_v0, %v562_v58  ;;  %v548_v11 = vadd.f32 %v547_v4, %v546_v60 }
 0x111   :  { %v430_v9 = vrot.slane %v429_v2, 1  ;;  %v414_v10 = vadd.f32 %v413_v5, %v279_v1  ;;  %v573_v1 = vld [vmem:[%s1174_s3] sm:$0x1] }
 0x112   :  { %v565_v12 = vrot.slane %v564_v7, 1 }
 0x113   :  { %v431_v13 = vadd.f32 %v430_v9, %v429_v2  ;;  %v549_v14 = vadd.f32 %v548_v11, %v414_v10 }
 0x114   :  { %v566_v15 = vadd.f32 %v565_v12, %v564_v7 }
 0x115   :  { %v432_v24 = vadd.f32 %v431_v13, %v297_v8  ;;  %v568_v16 = vmul.f32 0.0078125, %v549_v14  ;;  %v577_v8 = vld [vmem:[%s1175_s4] sm:$0x1] }
 0x117   :  { %v567_v17 = vadd.f32 %v566_v15, %v432_v24  ;;  %v570_v18 = vmul.f32 %v568_v16, %v568_v16 }
 0x119   :  { %v569_v19 = vmul.f32 0.0078125, %v567_v17 }
 0x11b   :  { %v571_v20 = vsub.f32 %v569_v19, %v570_v18 }
 0x11d   :  { %v572_v21 = vmax.f32 %v571_v20, 0.0 }
 0x11f   :  { %v574_v22 = vadd.f32 1e-05, %v572_v21 }
 0x121   :  { %840 = vrsqrt.f32 %v574_v22 }
 0x12b   :  { %v841_v27 = vpop.eup %840 }
 0x12c   :  { %v576_v30 = vmul.f32 %v841_v27, %v573_v1 }
 0x12e   :  { %v578_v31 = vmul.f32 %v576_v30, %v568_v16  ;;  %v584_v33 = vrot.slane %v576_v30, %v583_v26 }
 0x130   :  { %v579_v34 = vsub.f32 %v577_v8, %v578_v31  ;;  %v586_v39 = vmul.f32 %v584_v33, %v961_v29  ;;  %v587_v41 = vmul.f32 %v584_v33, %v984_v43  ;;  %v588_v45 = vmul.f32 %v584_v33, %v958_v28 }
 0x131   :  { %v589_v46 = vmul.f32 %v584_v33, %v976_v40  ;;  %v608_v48 = vmul.f32 %v584_v33, %v964_v32  ;;  %v609_v49 = vmul.f32 %v584_v33, %v987_v44  ;;  %v610_v50 = vmul.f32 %v584_v33, %v967_v35 }
 0x132   :  { %v594_v51 = vrot.slane %v579_v34, %v583_v26  ;;  %v611_v52 = vmul.f32 %v584_v33, %v981_v42  ;;  %v625_v53 = vmul.f32 %v584_v33, %v1028_v38  ;;  %v626_v54 = vmul.f32 %v584_v33, %v1049_v63 }
 0x133   :  { %v627_v29 = vmul.f32 %v584_v33, %v1022_v36  ;;  %v628_v43 = vmul.f32 %v584_v33, %v1046_v62  ;;  %v642_v28 = vmul.f32 %v584_v33, %v1031_v47  ;;  %v643_v40 = vmul.f32 %v584_v33, %v1052_v3 }
 0x134   :  { %v596_v32 = vadd.f32 %v594_v51, %v586_v39  ;;  %v597_v55 = vadd.f32 %v594_v51, %v587_v41  ;;  %v598_v44 = vadd.f32 %v594_v51, %v588_v45  ;;  %v599_v56 = vadd.f32 %v594_v51, %v589_v46 }
 0x135   :  { %v612_v35 = vadd.f32 %v608_v48, %v594_v51  ;;  %v613_v57 = vadd.f32 %v609_v49, %v594_v51  ;;  %v614_v58 = vadd.f32 %v610_v50, %v594_v51  ;;  %v615_v42 = vadd.f32 %v611_v52, %v594_v51 }
 0x136   :  { %v600_v59 = vmax.f32 %v596_v32, 0.0  ;;  %v601_v38 = vmax.f32 %v597_v55, 0.0  ;;  %v602_v60 = vmax.f32 %v598_v44, 0.0  ;;  %v603_v63 = vmax.f32 %v599_v56, 0.0 }
 0x137   :  { %v616_v61 = vmax.f32 %v612_v35, 0.0  ;;  %v617_v36 = vmax.f32 %v613_v57, 0.0  ;;  %v618_v0 = vmax.f32 %v614_v58, 0.0  ;;  %v619_v62 = vmax.f32 %v615_v42, 0.0 }
 0x138   :  { %604 = vst.msk [vmem:[%s1176_s5] sm:$0xff] %vm130_vm1, %v600_v59  ;;  %605 = vst.msk [vmem:[%s1176_s5 + $0x8] sm:$0xff] %vm130_vm1, %v601_v38  ;;  %v629_v47 = vadd.f32 %v625_v53, %v594_v51  ;;  %v630_v3 = vadd.f32 %v626_v54, %v594_v51  ;;  %v631_v2 = vadd.f32 %v627_v29, %v594_v51 }
 0x139   :  { %606 = vst.msk [vmem:[%s1176_s5 + $0x10] sm:$0xff] %vm130_vm1, %v602_v60  ;;  %607 = vst.msk [vmem:[%s1176_s5 + $0x18] sm:$0xff] %vm130_vm1, %v603_v63  ;;  %v632_v4 = vadd.f32 %v628_v43, %v594_v51  ;;  %v644_v5 = vmul.f32 %v584_v33, %v1025_v37  ;;  %v645_v7 = vmul.f32 %v584_v33, %v1059_v6 }
 0x13a   :  { %732 = vst.msk [vmem:[%s1176_s5 + $0x20] sm:$0xff] %vm130_vm1, %v616_v61  ;;  %733 = vst.msk [vmem:[%s1176_s5 + $0x28] sm:$0xff] %vm130_vm1, %v617_v36  ;;  %v646_v9 = vadd.f32 %v642_v28, %v594_v51  ;;  %v647_v10 = vadd.f32 %v643_v40, %v594_v51  ;;  %v633_v11 = vmax.f32 %v629_v47, 0.0  ;;  %v634_v12 = vmax.f32 %v630_v3, 0.0 }
 0x13b   :  { %734 = vst.msk [vmem:[%s1176_s5 + $0x30] sm:$0xff] %vm130_vm1, %v618_v0  ;;  %735 = vst.msk [vmem:[%s1176_s5 + $0x38] sm:$0xff] %vm130_vm1, %v619_v62  ;;  %v635_v13 = vmax.f32 %v631_v2, 0.0  ;;  %v636_v14 = vmax.f32 %v632_v4, 0.0  ;;  %v648_v24 = vadd.f32 %v644_v5, %v594_v51  ;;  %v649_v15 = vadd.f32 %v645_v7, %v594_v51 }
 0x13c   :  { %v650_v16 = vmax.f32 %v646_v9, 0.0  ;;  %v651_v17 = vmax.f32 %v647_v10, 0.0  ;;  %736 = vst.msk [vmem:[%s1176_s5 + $0x40] sm:$0xff] %vm130_vm1, %v633_v11  ;;  %737 = vst.msk [vmem:[%s1176_s5 + $0x48] sm:$0xff] %vm130_vm1, %v634_v12 }
 0x13d   :  { %738 = vst.msk [vmem:[%s1176_s5 + $0x50] sm:$0xff] %vm130_vm1, %v635_v13  ;;  %739 = vst.msk [vmem:[%s1176_s5 + $0x58] sm:$0xff] %vm130_vm1, %v636_v14  ;;  %v652_v37 = vmax.f32 %v648_v24, 0.0  ;;  %v653_v6 = vmax.f32 %v649_v15, 0.0 }
 0x13e   :  { %740 = vst.msk [vmem:[%s1176_s5 + $0x60] sm:$0xff] %vm130_vm1, %v650_v16  ;;  %741 = vst.msk [vmem:[%s1176_s5 + $0x68] sm:$0xff] %vm130_vm1, %v651_v17 }
 0x13f   :  { %742 = vst.msk [vmem:[%s1176_s5 + $0x70] sm:$0xff] %vm130_vm1, %v652_v37  ;;  %743 = vst.msk [vmem:[%s1176_s5 + $0x78] sm:$0xff] %vm130_vm1, %v653_v6 }

// kernel: forward.15
= control target key start
LH: loop header
LB: loop body
LE: loop exit
PB: predicated region body
PF: predicated region fallthrough
CT: control target
= control target key end

     0   :  { %s845_s12 = smov 0   ;;  %s1006_s0 = inlined_call_operand.vmem [shape: bf16[512,4], index: 0, kind: input, shape index: {}]   ;;  %s1007_s1 = inlined_call_operand.vmem [shape: bf16[4,3], index: 1, kind: input, shape index: {}]   ;;  %s1008_s2 = inlined_call_operand.vmem [shape: f32[1,3], index: 2, kind: input, shape index: {}]   ;;  %s1009_s3 = inlined_call_operand.vmem [shape: f32[512,3], index: 3, kind: output, shape index: {}]  }
   0x1 LB: > { %s630_s13 = sadd.s32 4294967295, %s823_s12   ;;  %p634_p0 = scmp.ge.s32.totalorder %s823_s12, 1  ;;  %s823_s12 = sphi %s845_s12, %s13_s12  }
   0x2   : > { %p138_p1 = scmp.lt.s32.totalorder %s823_s12, 3 }
   0x4   : > { %p139_p2 = pnand %p634_p0, %p138_p1 }
   0x5   : > { %v207_v0 = vld [vmem:[%s1007_s1] sm:$0x3] (!%p139_p2)  ;;  %vm344_vm0 = vcmask (!%p139_p2), 1041408   ;;  %s635_s16 = sshll.u32 (!%p139_p2), %s630_s13, 5  ;;  %vm295_vm1 = vcmask (!%p139_p2), 31744   ;;  %vm541_vm2 = vcmask (!%p139_p2), 23552  }
   0x6   : > { %142 = sbr.rel (%p139_p2) target bundleno = 277 (0x115), region = 32  ;;  %727 = vmatprep.subr.msk.bf16.mxu0 (!%p139_p2), %vm344_vm0, %v207_v0  ;;  %728 = vmatprep.subr.msk.bf16.mxu1 (!%p139_p2), %vm344_vm0, %v207_v0  ;;  %v346_v1 = vsel (!%p139_p2), %vm344_vm0, %v207_v0, 0  ;;  %p163_p3 = scmp.lt.s32.totalorder (!%p139_p2), %s635_s16, 63  ;;  %v899_v18 = vld [vmem:[%s1008_s2] ss:$0 sm:$0xff] (!%p139_p2) }
   0x7   : > { %692 = vmatpush3.bf16.msra.mxu0 (!%p139_p2), %v346_v1  ;;  %726 = vmatpush3.bf16.msra.mxu1 (!%p139_p2), %v346_v1 }
   0xd   : > { %s1011_s16 = smov (!%p163_p3, %s635_s16), 63 }
   0xe   : > { %s636_s17 = sshll.u32 %s1011_s16, 2  ;;  %s638_s23 = sshll.u32 %s1011_s16, 3 }
   0xf   : > { %s862_s20 = scalar_lea.vmem %s1006_s0, %s636_s17  ;;  %s916_s26 = scalar_lea.vmem %s1009_s3, %s638_s23 }
  0x10   : > { %v737_v2 = vld [vmem:[%s862_s20] sm:$0xff]   ;;  %v739_v4 = vld [vmem:[%s862_s20 + $0x8] sm:$0xff]   ;;  %v741_v6 = vld [vmem:[%s862_s20 + $0x10] sm:$0xff]  }
  0x11   : > { %v738_v3 = vld [vmem:[%s862_s20 + $0x40] sm:$0xff]   ;;  %693 = vmatprep.mubr.msk.bf16.mxu0 %vm295_vm1, %v737_v2  ;;  %v740_v5 = vld [vmem:[%s862_s20 + $0x48] sm:$0xff]   ;;  %v742_v7 = vld [vmem:[%s862_s20 + $0x50] sm:$0xff]  }
  0x12   : > { %709 = vmatprep.mubr.msk.bf16.mxu1 %vm295_vm1, %v738_v3  ;;  %694 = vmatmul.mubr.msk.bf16.vlgmr.msra.gmra.mrb[0].mxu0 %vm295_vm1, %v739_v4  ;;  %v743_v8 = vld [vmem:[%s862_s20 + $0x18] sm:$0xff]   ;;  %v745_v10 = vld [vmem:[%s862_s20 + $0x20] sm:$0xff]   ;;  %v747_v12 = vld [vmem:[%s862_s20 + $0x28] sm:$0xff]  }
  0x13   : > { %710 = vmatmul.mubr.msk.bf16.vlgmr.msra.gmra.mrb[0].mxu1 %vm295_vm1, %v740_v5  ;;  %697 = vmatprep.mubr.msk.bf16.mxu0 %vm295_vm1, %v741_v6  ;;  %v744_v9 = vld [vmem:[%s862_s20 + $0x58] sm:$0xff]   ;;  %v746_v11 = vld [vmem:[%s862_s20 + $0x60] sm:$0xff]   ;;  %v748_v13 = vld [vmem:[%s862_s20 + $0x68] sm:$0xff]  }
  0x14   : > { %713 = vmatprep.mubr.msk.bf16.mxu1 %vm295_vm1, %v742_v7  ;;  %v749_v14 = vld [vmem:[%s862_s20 + $0x30] sm:$0xff]   ;;  %v751_v16 = vld [vmem:[%s862_s20 + $0x38] sm:$0xff]  }
  0x15   : > { %v750_v15 = vld [vmem:[%s862_s20 + $0x70] sm:$0xff]   ;;  %v752_v17 = vld [vmem:[%s862_s20 + $0x78] sm:$0xff]  }
  0x1a   : > { %698 = vmatmul.mubr.msk.bf16.gmra.mrb[4].mxu0 %vm295_vm1, %v743_v8 }
  0x1b   : > { %714 = vmatmul.mubr.msk.bf16.gmra.mrb[4].mxu1 %vm295_vm1, %v744_v9  ;;  %701 = vmatprep.mubr.msk.bf16.mxu0 %vm295_vm1, %v745_v10 }
  0x1c   : > { %717 = vmatprep.mubr.msk.bf16.mxu1 %vm295_vm1, %v746_v11 }
  0x22   : > { %702 = vmatmul.mubr.msk.bf16.gmra.mrb[8].mxu0 %vm295_vm1, %v747_v12 }
  0x23   : > { %718 = vmatmul.mubr.msk.bf16.gmra.mrb[8].mxu1 %vm295_vm1, %v748_v13  ;;  %705 = vmatprep.mubr.msk.bf16.mxu0 %vm295_vm1, %v749_v14 }
  0x24   : > { %721 = vmatprep.mubr.msk.bf16.mxu1 %vm295_vm1, %v750_v15 }
  0x2a   : > { %706 = vmatmul.mubr.msk.bf16.gmra.mrb[12].mxu0 %vm295_vm1, %v751_v16 }
  0x2b   : > { %722 = vmatmul.mubr.msk.bf16.gmra.mrb[12].mxu1 %vm295_vm1, %v752_v17 }
  0xe5   : > { %v695_v19 = vpop.f32.mrb[0].mxu0 }
  0xe6   : > { %v391_v20 = vadd.f32 %v695_v19, %v899_v18  ;;  %v711_v21 = vpop.f32.mrb[0].mxu1  ;;  %v382_v22 = vpop.f32.mrb[1].mxu0 }
  0xe7   : > { %v455_v23 = vadd.f32 %v711_v21, %v899_v18  ;;  %v383_v24 = vadd.f32 %v899_v18, %v382_v22  ;;  %v446_v25 = vpop.f32.mrb[1].mxu1  ;;  %v696_v26 = vpop.f32.mrb[2].mxu0 }
  0xe8   : > { %753 = vtanh.f32 %v391_v20  ;;  %v447_v27 = vadd.f32 %v899_v18, %v446_v25  ;;  %v394_v28 = vadd.f32 %v696_v26, %v899_v18  ;;  %v712_v29 = vpop.f32.mrb[2].mxu1  ;;  %v385_v30 = vpop.f32.mrb[3].mxu0 }
  0xe9   : > { %755 = vtanh.f32 %v455_v23  ;;  %v458_v31 = vadd.f32 %v712_v29, %v899_v18  ;;  %v449_v32 = vpop.f32.mrb[3].mxu1  ;;  %v386_v33 = vadd.f32 %v899_v18, %v385_v30 }
  0xea   : > { %757 = vtanh.f32 %v383_v24  ;;  %v450_v34 = vadd.f32 %v899_v18, %v449_v32 }
  0xeb   : > { %759 = vtanh.f32 %v447_v27 }
  0xec   : > { %761 = vtanh.f32 %v394_v28 }
  0xed   : > { %763 = vtanh.f32 %v458_v31  ;;  %v699_v35 = vpop.f32.mrb[4].mxu0 }
  0xee   : > { %765 = vtanh.f32 %v386_v33  ;;  %v407_v36 = vadd.f32 %v699_v35, %v899_v18  ;;  %v715_v37 = vpop.f32.mrb[4].mxu1  ;;  %v398_v38 = vpop.f32.mrb[5].mxu0 }
  0xef   : > { %767 = vtanh.f32 %v450_v34  ;;  %v471_v39 = vadd.f32 %v715_v37, %v899_v18  ;;  %v399_v40 = vadd.f32 %v899_v18, %v398_v38  ;;  %v462_v41 = vpop.f32.mrb[5].mxu1  ;;  %v700_v42 = vpop.f32.mrb[6].mxu0 }
  0xf0   : > { %769 = vtanh.f32 %v407_v36  ;;  %v463_v43 = vadd.f32 %v899_v18, %v462_v41  ;;  %v410_v44 = vadd.f32 %v700_v42, %v899_v18  ;;  %v716_v45 = vpop.f32.mrb[6].mxu1  ;;  %v401_v46 = vpop.f32.mrb[7].mxu0 }
  0xf1   : > { %771 = vtanh.f32 %v471_v39  ;;  %v474_v47 = vadd.f32 %v716_v45, %v899_v18  ;;  %v465_v48 = vpop.f32.mrb[7].mxu1  ;;  %v402_v50 = vadd.f32 %v899_v18, %v401_v46 }
  0xf2   : > { %v754_v49 = vpop.eup %753  ;;  %773 = vtanh.f32 %v399_v40  ;;  %v466_v52 = vadd.f32 %v899_v18, %v465_v48 }
  0xf3   : > { %v756_v51 = vpop.eup %755  ;;  %544 = vst.msk [vmem:[%s916_s26 + $0x10] sm:$0xff] %vm541_vm2, %v754_v49  ;;  %775 = vtanh.f32 %v463_v43 }
  0xf4   : > { %v758_v53 = vpop.eup %757  ;;  %560 = vst.msk [vmem:[%s916_s26 + $0x90] sm:$0xff] %vm541_vm2, %v756_v51  ;;  %777 = vtanh.f32 %v410_v44 }
  0xf5   : > { %v760_v54 = vpop.eup %759  ;;  %542 = vst.msk [vmem:[%s916_s26] sm:$0xff] %vm541_vm2, %v758_v53  ;;  %779 = vtanh.f32 %v474_v47  ;;  %v703_v55 = vpop.f32.mrb[8].mxu0 }
  0xf6   : > { %v762_v56 = vpop.eup %761  ;;  %558 = vst.msk [vmem:[%s916_s26 + $0x80] sm:$0xff] %vm541_vm2, %v760_v54  ;;  %781 = vtanh.f32 %v402_v50  ;;  %v423_v57 = vadd.f32 %v703_v55, %v899_v18  ;;  %v719_v58 = vpop.f32.mrb[8].mxu1 }
  0xf7   : > { %v414_v59 = vpop.f32.mrb[9].mxu0  ;;  %v764_v60 = vpop.eup %763  ;;  %545 = vst.msk [vmem:[%s916_s26 + $0x18] sm:$0xff] %vm541_vm2, %v762_v56  ;;  %783 = vtanh.f32 %v466_v52  ;;  %v487_v61 = vadd.f32 %v719_v58, %v899_v18 }
  0xf8   : > { %v415_v62 = vadd.f32 %v899_v18, %v414_v59  ;;  %v478_v63 = vpop.f32.mrb[9].mxu1  ;;  %v704_v0 = vpop.f32.mrb[10].mxu0  ;;  %561 = vst.msk [vmem:[%s916_s26 + $0x98] sm:$0xff] %vm541_vm2, %v764_v60  ;;  %785 = vtanh.f32 %v423_v57 }
  0xf9   : > { %v766_v1 = vpop.eup %765  ;;  %v479_v2 = vadd.f32 %v899_v18, %v478_v63  ;;  %v426_v3 = vadd.f32 %v704_v0, %v899_v18  ;;  %v720_v4 = vpop.f32.mrb[10].mxu1  ;;  %787 = vtanh.f32 %v487_v61 }
  0xfa   : > { %v417_v5 = vpop.f32.mrb[11].mxu0  ;;  %v768_v6 = vpop.eup %767  ;;  %543 = vst.msk [vmem:[%s916_s26 + $0x8] sm:$0xff] %vm541_vm2, %v766_v1  ;;  %v490_v7 = vadd.f32 %v720_v4, %v899_v18  ;;  %789 = vtanh.f32 %v415_v62 }
  0xfb   : > { %v481_v8 = vpop.f32.mrb[11].mxu1  ;;  %v770_v9 = vpop.eup %769  ;;  %559 = vst.msk [vmem:[%s916_s26 + $0x88] sm:$0xff] %vm541_vm2, %v768_v6  ;;  %v418_v10 = vadd.f32 %v899_v18, %v417_v5  ;;  %791 = vtanh.f32 %v479_v2 }
  0xfc   : > { %v772_v11 = vpop.eup %771  ;;  %548 = vst.msk [vmem:[%s916_s26 + $0x30] sm:$0xff] %vm541_vm2, %v770_v9  ;;  %v482_v12 = vadd.f32 %v899_v18, %v481_v8  ;;  %793 = vtanh.f32 %v426_v3 }
  0xfd   : > { %v774_v13 = vpop.eup %773  ;;  %564 = vst.msk [vmem:[%s916_s26 + $0xb0] sm:$0xff] %vm541_vm2, %v772_v11  ;;  %795 = vtanh.f32 %v490_v7  ;;  %v707_v15 = vpop.f32.mrb[12].mxu0 }
  0xfe   : > { %v776_v14 = vpop.eup %775  ;;  %546 = vst.msk [vmem:[%s916_s26 + $0x20] sm:$0xff] %vm541_vm2, %v774_v13  ;;  %797 = vtanh.f32 %v418_v10  ;;  %v439_v17 = vadd.f32 %v707_v15, %v899_v18  ;;  %v723_v19 = vpop.f32.mrb[12].mxu1 }
  0xff   : > { %v778_v16 = vpop.eup %777  ;;  %562 = vst.msk [vmem:[%s916_s26 + $0xa0] sm:$0xff] %vm541_vm2, %v776_v14  ;;  %v430_v20 = vpop.f32.mrb[13].mxu0  ;;  %799 = vtanh.f32 %v482_v12  ;;  %v503_v22 = vadd.f32 %v723_v19, %v899_v18 }
 0x100   : > { %v780_v21 = vpop.eup %779  ;;  %549 = vst.msk [vmem:[%s916_s26 + $0x38] sm:$0xff] %vm541_vm2, %v778_v16  ;;  %v431_v23 = vadd.f32 %v899_v18, %v430_v20  ;;  %v494_v24 = vpop.f32.mrb[13].mxu1  ;;  %801 = vtanh.f32 %v439_v17 }
 0x101   : > { %v708_v25 = vpop.f32.mrb[14].mxu0  ;;  %v782_v26 = vpop.eup %781  ;;  %565 = vst.msk [vmem:[%s916_s26 + $0xb8] sm:$0xff] %vm541_vm2, %v780_v21  ;;  %v495_v27 = vadd.f32 %v899_v18, %v494_v24  ;;  %803 = vtanh.f32 %v503_v22 }
 0x102   : > { %v442_v28 = vadd.f32 %v708_v25, %v899_v18  ;;  %v724_v29 = vpop.f32.mrb[14].mxu1  ;;  %v433_v30 = vpop.f32.mrb[15].mxu0  ;;  %547 = vst.msk [vmem:[%s916_s26 + $0x28] sm:$0xff] %vm541_vm2, %v782_v26  ;;  %805 = vtanh.f32 %v431_v23 }
 0x103   : > { %v784_v31 = vpop.eup %783  ;;  %v506_v32 = vadd.f32 %v724_v29, %v899_v18  ;;  %v497_v33 = vpop.f32.mrb[15].mxu1  ;;  %v434_v35 = vadd.f32 %v899_v18, %v433_v30  ;;  %807 = vtanh.f32 %v495_v27 }
 0x104   : > { %v786_v34 = vpop.eup %785  ;;  %563 = vst.msk [vmem:[%s916_s26 + $0xa8] sm:$0xff] %vm541_vm2, %v784_v31  ;;  %v498_v37 = vadd.f32 %v899_v18, %v497_v33  ;;  %809 = vtanh.f32 %v442_v28 }
 0x105   : > { %v788_v36 = vpop.eup %787  ;;  %552 = vst.msk [vmem:[%s916_s26 + $0x50] sm:$0xff] %vm541_vm2, %v786_v34  ;;  %811 = vtanh.f32 %v506_v32 }
 0x106   : > { %v790_v38 = vpop.eup %789  ;;  %568 = vst.msk [vmem:[%s916_s26 + $0xd0] sm:$0xff] %vm541_vm2, %v788_v36  ;;  %813 = vtanh.f32 %v434_v35 }
 0x107   : > { %v792_v39 = vpop.eup %791  ;;  %550 = vst.msk [vmem:[%s916_s26 + $0x40] sm:$0xff] %vm541_vm2, %v790_v38  ;;  %815 = vtanh.f32 %v498_v37 }
 0x108   : > { %v794_v40 = vpop.eup %793  ;;  %566 = vst.msk [vmem:[%s916_s26 + $0xc0] sm:$0xff] %vm541_vm2, %v792_v39 }
 0x109   : > { %v796_v41 = vpop.eup %795  ;;  %553 = vst.msk [vmem:[%s916_s26 + $0x58] sm:$0xff] %vm541_vm2, %v794_v40 }
 0x10a   : > { %v798_v18 = vpop.eup %797  ;;  %569 = vst.msk [vmem:[%s916_s26 + $0xd8] sm:$0xff] %vm541_vm2, %v796_v41 }
 0x10b   : > { %v800_v42 = vpop.eup %799  ;;  %551 = vst.msk [vmem:[%s916_s26 + $0x48] sm:$0xff] %vm541_vm2, %v798_v18 }
 0x10c   : > { %v802_v43 = vpop.eup %801  ;;  %567 = vst.msk [vmem:[%s916_s26 + $0xc8] sm:$0xff] %vm541_vm2, %v800_v42 }
 0x10d   : > { %v804_v44 = vpop.eup %803  ;;  %556 = vst.msk [vmem:[%s916_s26 + $0x70] sm:$0xff] %vm541_vm2, %v802_v43 }
 0x10e   : > { %v806_v45 = vpop.eup %805  ;;  %572 = vst.msk [vmem:[%s916_s26 + $0xf0] sm:$0xff] %vm541_vm2, %v804_v44 }
 0x10f   : > { %v808_v46 = vpop.eup %807  ;;  %554 = vst.msk [vmem:[%s916_s26 + $0x60] sm:$0xff] %vm541_vm2, %v806_v45 }
 0x110   : > { %v810_v47 = vpop.eup %809  ;;  %570 = vst.msk [vmem:[%s916_s26 + $0xe0] sm:$0xff] %vm541_vm2, %v808_v46 }
 0x111   : > { %v812_v48 = vpop.eup %811  ;;  %557 = vst.msk [vmem:[%s916_s26 + $0x78] sm:$0xff] %vm541_vm2, %v810_v47 }
 0x112   : > { %v814_v49 = vpop.eup %813  ;;  %573 = vst.msk [vmem:[%s916_s26 + $0xf8] sm:$0xff] %vm541_vm2, %v812_v48 }
 0x113   : > { %v816_v50 = vpop.eup %815  ;;  %555 = vst.msk [vmem:[%s916_s26 + $0x68] sm:$0xff] %vm541_vm2, %v814_v49 }
 0x114   : > { %571 = vst.msk [vmem:[%s916_s26 + $0xe8] sm:$0xff] %vm541_vm2, %v816_v50 }
 0x115 PF: > { %s13_s12 = sadd.s32 1, %s823_s12  }
 0x116   : > { %p10_p4 = scmp.ge.s32.totalorder %s13_s12, 4  }
 0x118   :  { %12 = sbr.rel (!%p10_p4) target bundleno = 1 (0x1), region = 62 }

// kernel: forward.14
= control target key start
LH: loop header
LB: loop body
LE: loop exit
PB: predicated region body
PF: predicated region fallthrough
CT: control target
= control target key end

     0   :  { %vm100_vm0 = vcmask 261120   ;;  %vm222_vm1 = vcmask 31744   ;;  %s3098_s1 = inlined_call_operand.vmem [shape: bf16[4,32,4], index: 1, kind: input, shape index: {}]   ;;  %s3099_s0 = inlined_call_operand.vmem [shape: bf16[4,128,32], index: 0, kind: input, shape index: {}]   ;;  %s3100_s2 = inlined_call_operand.vmem [shape: f32[1,4], index: 2, kind: input, shape index: {}]   ;;  %s3101_s3 = inlined_call_operand.vmem [shape: f32[1,4], index: 3, kind: input, shape index: {}]   ;;  %s3102_s4 = inlined_call_operand.vmem [shape: f32[1,4], index: 4, kind: input, shape index: {}]   ;;  %s3103_s5 = inlined_call_operand.vmem [shape: f32[4,128,4], index: 5, kind: output, shape index: {}]  }
   0x1   :  { %v1764_v0 = vld [vmem:[%s3098_s1] sm:$0xff]   ;;  %v1765_v1 = vld [vmem:[%s3098_s1 + $0x10] sm:$0xff]   ;;  %v1766_v2 = vld [vmem:[%s3098_s1 + $0x8] sm:$0xff]  }
   0x2   :  { %1684 = vmatprep.subr.bf16.mxu0 %v1764_v0  ;;  %1704 = vmatprep.subr.bf16.mxu1 %v1765_v1  ;;  %v1767_v3 = vld [vmem:[%s3098_s1 + $0x18] sm:$0xff]   ;;  %v1768_v4 = vld [vmem:[%s3099_s0] sm:$0xff]   ;;  %v1770_v6 = vld [vmem:[%s3099_s0 + $0x8] sm:$0xff]  }
   0x3   :  { %1685 = vmatpush3.bf16.msra.mxu0 %v1764_v0  ;;  %1705 = vmatpush3.bf16.msra.mxu1 %v1765_v1  ;;  %v1769_v5 = vld [vmem:[%s3099_s0 + $0x40] sm:$0xff]   ;;  %v1771_v7 = vld [vmem:[%s3099_s0 + $0x48] sm:$0xff]   ;;  %v1773_v9 = vld [vmem:[%s3098_s1 + $0x30] sm:$0xff]  }
   0x4   :  { %1686 = vmatprep.subr.bf16.mxu0 %v1766_v2  ;;  %1706 = vmatprep.subr.bf16.mxu1 %v1767_v3  ;;  %v1772_v8 = vld [vmem:[%s3098_s1 + $0x20] sm:$0xff]   ;;  %v1774_v10 = vld [vmem:[%s3099_s0 + $0x10] sm:$0xff]   ;;  %v1776_v12 = vld [vmem:[%s3099_s0 + $0x18] sm:$0xff]  }
   0x5   :  { %1688 = vmatprep.mubr.msk.bf16.mxu0 %vm100_vm0, %v1768_v4  ;;  %1708 = vmatprep.mubr.msk.bf16.mxu1 %vm100_vm0, %v1769_v5  ;;  %v1775_v11 = vld [vmem:[%s3099_s0 + $0x50] sm:$0xff]   ;;  %v1777_v13 = vld [vmem:[%s3099_s0 + $0x58] sm:$0xff]   ;;  %v1778_v14 = vld [vmem:[%s3099_s0 + $0x20] sm:$0xff]  }
   0x6   :  { %v1779_v15 = vld [vmem:[%s3099_s0 + $0x60] sm:$0xff]   ;;  %v1782_v16 = vld [vmem:[%s3098_s1 + $0x28] sm:$0xff]   ;;  %v1783_v17 = vld [vmem:[%s3098_s1 + $0x38] sm:$0xff]  }
   0x7   :  { %1687 = vmatpush3.bf16.msra.mxu0 %v1766_v2  ;;  %1707 = vmatpush3.bf16.msra.mxu1 %v1767_v3  ;;  %v1780_v18 = vld [vmem:[%s3099_s0 + $0x28] sm:$0xff]   ;;  %v1784_v20 = vld [vmem:[%s3099_s0 + $0x30] sm:$0xff]   ;;  %v1786_v22 = vld [vmem:[%s3099_s0 + $0x38] sm:$0xff]  }
   0x8   :  { %1724 = vmatprep.subr.bf16.mxu0 %v1772_v8  ;;  %1744 = vmatprep.subr.bf16.mxu1 %v1773_v9  ;;  %v1781_v19 = vld [vmem:[%s3099_s0 + $0x68] sm:$0xff]   ;;  %v1785_v21 = vld [vmem:[%s3099_s0 + $0x70] sm:$0xff]   ;;  %v1787_v23 = vld [vmem:[%s3099_s0 + $0x78] sm:$0xff]  }
   0x9   :  { %v1788_v24 = vld [vmem:[%s3099_s0 + $0x80] sm:$0xff]   ;;  %v1790_v26 = vld [vmem:[%s3099_s0 + $0x88] sm:$0xff]   ;;  %v1792_v28 = vld [vmem:[%s3099_s0 + $0x90] sm:$0xff]  }
   0xa   :  { %1689 = vmatmul.mubr.msk.bf16.vlgmr.msra.gmra.mrb[0].mxu0 %vm100_vm0, %v1770_v6  ;;  %1709 = vmatmul.mubr.msk.bf16.vlgmr.msra.gmra.mrb[0].mxu1 %vm100_vm0, %v1771_v7  ;;  %v1789_v25 = vld [vmem:[%s3099_s0 + $0xc0] sm:$0xff]   ;;  %v1791_v27 = vld [vmem:[%s3099_s0 + $0xc8] sm:$0xff]   ;;  %v1793_v29 = vld [vmem:[%s3099_s0 + $0xd0] sm:$0xff]  }
   0xb   :  { %1725 = vmatpush3.bf16.msra.mxu0 %v1772_v8  ;;  %1692 = vmatprep.mubr.msk.bf16.mxu0 %vm100_vm0, %v1774_v10  ;;  %v1794_v30 = vld [vmem:[%s3099_s0 + $0x98] sm:$0xff]   ;;  %v1796_v32 = vld [vmem:[%s3099_s0 + $0xa0] sm:$0xff]   ;;  %v1798_v34 = vld [vmem:[%s3099_s0 + $0xa8] sm:$0xff]  }
   0xc   :  { %1745 = vmatpush3.bf16.msra.mxu1 %v1773_v9  ;;  %1712 = vmatprep.mubr.msk.bf16.mxu1 %vm100_vm0, %v1775_v11  ;;  %v1795_v31 = vld [vmem:[%s3099_s0 + $0xd8] sm:$0xff]   ;;  %v1797_v33 = vld [vmem:[%s3099_s0 + $0xe0] sm:$0xff]   ;;  %v1799_v35 = vld [vmem:[%s3099_s0 + $0xe8] sm:$0xff]  }
   0xd   :  { %1726 = vmatprep.subr.bf16.mxu0 %v1782_v16  ;;  %1746 = vmatprep.subr.bf16.mxu1 %v1783_v17  ;;  %v1800_v36 = vld [vmem:[%s3099_s0 + $0xb0] sm:$0xff]   ;;  %v1802_v38 = vld [vmem:[%s3099_s0 + $0xb8] sm:$0xff]   ;;  %v1991_v40 = vld [vmem:[%s3100_s2] ss:$0 sm:$0xff] }
   0xe   :  { %v1801_v37 = vld [vmem:[%s3099_s0 + $0xf0] sm:$0xff]   ;;  %v1803_v39 = vld [vmem:[%s3099_s0 + $0xf8] sm:$0xff]  }
   0xf   :  { %1727 = vmatpush3.bf16.msra.mxu0 %v1782_v16 }
  0x10   :  { %1747 = vmatpush3.bf16.msra.mxu1 %v1783_v17 }
  0x12   :  { %1693 = vmatmul.mubr.msk.bf16.gmra.mrb[4].mxu0 %vm100_vm0, %v1776_v12  ;;  %1713 = vmatmul.mubr.msk.bf16.gmra.mrb[4].mxu1 %vm100_vm0, %v1777_v13 }
  0x13   :  { %1696 = vmatprep.mubr.msk.bf16.mxu0 %vm100_vm0, %v1778_v14  ;;  %1716 = vmatprep.mubr.msk.bf16.mxu1 %vm100_vm0, %v1779_v15 }
  0x1a   :  { %1697 = vmatmul.mubr.msk.bf16.gmra.mrb[8].mxu0 %vm100_vm0, %v1780_v18  ;;  %1717 = vmatmul.mubr.msk.bf16.gmra.mrb[8].mxu1 %vm100_vm0, %v1781_v19 }
  0x1b   :  { %1700 = vmatprep.mubr.msk.bf16.mxu0 %vm100_vm0, %v1784_v20  ;;  %1720 = vmatprep.mubr.msk.bf16.mxu1 %vm100_vm0, %v1785_v21 }
  0x22   :  { %1701 = vmatmul.mubr.msk.bf16.gmra.mrb[12].mxu0 %vm100_vm0, %v1786_v22  ;;  %1721 = vmatmul.mubr.msk.bf16.gmra.mrb[12].mxu1 %vm100_vm0, %v1787_v23 }
  0x23   :  { %1728 = vmatprep.mubr.msk.bf16.mxu0 %vm100_vm0, %v1788_v24  ;;  %1748 = vmatprep.mubr.msk.bf16.mxu1 %vm100_vm0, %v1789_v25 }
  0x2a   :  { %1729 = vmatmul.mubr.msk.bf16.vlgmr.msra.gmra.mrb[16].mxu0 %vm100_vm0, %v1790_v26  ;;  %1749 = vmatmul.mubr.msk.bf16.vlgmr.msra.gmra.mrb[16].mxu1 %vm100_vm0, %v1791_v27 }
  0x2b   :  { %1732 = vmatprep.mubr.msk.bf16.mxu0 %vm100_vm0, %v1792_v28  ;;  %1752 = vmatprep.mubr.msk.bf16.mxu1 %vm100_vm0, %v1793_v29 }
  0x32   :  { %1733 = vmatmul.mubr.msk.bf16.gmra.mrb[20].mxu0 %vm100_vm0, %v1794_v30  ;;  %1753 = vmatmul.mubr.msk.bf16.gmra.mrb[20].mxu1 %vm100_vm0, %v1795_v31 }
  0x33   :  { %1736 = vmatprep.mubr.msk.bf16.mxu0 %vm100_vm0, %v1796_v32  ;;  %1756 = vmatprep.mubr.msk.bf16.mxu1 %vm100_vm0, %v1797_v33 }
  0x3a   :  { %1737 = vmatmul.mubr.msk.bf16.gmra.mrb[24].mxu0 %vm100_vm0, %v1798_v34  ;;  %1757 = vmatmul.mubr.msk.bf16.gmra.mrb[24].mxu1 %vm100_vm0, %v1799_v35 }
  0x3b   :  { %1740 = vmatprep.mubr.msk.bf16.mxu0 %vm100_vm0, %v1800_v36  ;;  %1760 = vmatprep.mubr.msk.bf16.mxu1 %vm100_vm0, %v1801_v37 }
  0x42   :  { %1741 = vmatmul.mubr.msk.bf16.gmra.mrb[28].mxu0 %vm100_vm0, %v1802_v38  ;;  %1761 = vmatmul.mubr.msk.bf16.gmra.mrb[28].mxu1 %vm100_vm0, %v1803_v39 }
  0xdd   :  { %v1690_v41 = vpop.f32.mrb[0].mxu0  ;;  %v1710_v43 = vpop.f32.mrb[0].mxu1 }
  0xde   :  { %v1994_v42 = vadd.f32 %v1690_v41, %v1991_v40  ;;  %v159_v44 = vpop.f32.mrb[1].mxu0  ;;  %v1997_v45 = vadd.f32 %v1710_v43, %v1991_v40  ;;  %v447_v47 = vpop.f32.mrb[1].mxu1 }
  0xdf   :  { %v2000_v46 = vadd.f32 %v1991_v40, %v159_v44  ;;  %v1691_v48 = vpop.f32.mrb[2].mxu0  ;;  %v2005_v50 = vadd.f32 %v1991_v40, %v447_v47  ;;  %v1711_v51 = vpop.f32.mrb[2].mxu1 }
  0xe0   :  { %3138 = vst [vmem:[#allocation2_spill] sm:$0xff] %v1997_v45  ;;  %v263_v49 = vmul.f32 %v1994_v42, %v1994_v42  ;;  %v162_v52 = vpop.f32.mrb[3].mxu0  ;;  %v2008_v53 = vadd.f32 %v1691_v48, %v1991_v40  ;;  %v450_v54 = vpop.f32.mrb[3].mxu1  ;;  %v226_v55 = vsel %vm222_vm1, %v1994_v42, 0.0  ;;  %v513_v56 = vsel %vm222_vm1, %v1997_v45, 0.0 }
  0xe1   :  { %3139 = vst [vmem:[#allocation3_spill] sm:$0xff] %v2005_v50  ;;  %v548_v57 = vmul.f32 %v2005_v50, %v2005_v50  ;;  %v550_v58 = vmul.f32 %v1997_v45, %v1997_v45  ;;  %v223_v59 = vsel %vm222_vm1, %v2000_v46, 0.0  ;;  %v261_v60 = vmul.f32 %v2000_v46, %v2000_v46 }
  0xe2   :  { %v2023_v61 = vadd.f32 %v1711_v51, %v1991_v40  ;;  %v280_v62 = vsel %vm222_vm1, %v263_v49, 0.0  ;;  %v510_v63 = vsel %vm222_vm1, %v2005_v50, 0.0  ;;  %v2029_v0 = vadd.f32 %v1991_v40, %v162_v52 }
  0xe3   :  { %v2032_v1 = vadd.f32 %v1991_v40, %v450_v54  ;;  %v564_v2 = vsel %vm222_vm1, %v548_v57, 0.0  ;;  %v228_v3 = vsel %vm222_vm1, %v2008_v53, 0.0  ;;  %v264_v4 = vmul.f32 %v2008_v53, %v2008_v53 }
  0xe4   :  { %3140 = vst [vmem:[#allocation4_spill] sm:$0xff] %v2023_v61  ;;  %v551_v5 = vmul.f32 %v2023_v61, %v2023_v61  ;;  %v224_v7 = vsel %vm222_vm1, %v2029_v0, 0.0  ;;  %v262_v8 = vmul.f32 %v2029_v0, %v2029_v0  ;;  %v567_v13 = vsel %vm222_vm1, %v550_v58, 0.0 }
  0xe5   :  { %3141 = vst [vmem:[#allocation5_spill] sm:$0xff] %v2032_v1  ;;  %v1694_v6 = vpop.f32.mrb[4].mxu0  ;;  %v511_v9 = vsel %vm222_vm1, %v2032_v1, 0.0  ;;  %v549_v10 = vmul.f32 %v2032_v1, %v2032_v1  ;;  %v1714_v11 = vpop.f32.mrb[4].mxu1  ;;  %v277_v14 = vsel %vm222_vm1, %v261_v60, 0.0  ;;  %v225_v15 = vadd.f32 %v224_v7, %v223_v59 }
  0xe6   :  { %v175_v12 = vpop.f32.mrb[5].mxu0  ;;  %v512_v16 = vadd.f32 %v511_v9, %v510_v63  ;;  %v463_v17 = vpop.f32.mrb[5].mxu1  ;;  %v278_v19 = vsel %vm222_vm1, %v262_v8, 0.0  ;;  %v2054_v21 = vadd.f32 %v1694_v6, %v1991_v40  ;;  %v282_v30 = vsel %vm222_vm1, %v264_v4, 0.0 }
  0xe7   :  { %v1695_v18 = vpop.f32.mrb[6].mxu0  ;;  %v565_v20 = vsel %vm222_vm1, %v549_v10, 0.0  ;;  %v2057_v22 = vadd.f32 %v1991_v40, %v175_v12  ;;  %v1715_v23 = vpop.f32.mrb[6].mxu1  ;;  %v227_v25 = vadd.f32 %v226_v55, %v225_v15  ;;  %v279_v26 = vadd.f32 %v278_v19, %v277_v14 }
  0xe8   :  { %3142 = vst [vmem:[#allocation6_spill] sm:$0xff] %v2054_v21  ;;  %v178_v24 = vpop.f32.mrb[7].mxu0  ;;  %v514_v27 = vadd.f32 %v513_v56, %v512_v16  ;;  %v566_v28 = vadd.f32 %v565_v20, %v564_v2  ;;  %v466_v29 = vpop.f32.mrb[7].mxu1  ;;  %v515_v31 = vsel %vm222_vm1, %v2023_v61, 0.0  ;;  %v569_v32 = vsel %vm222_vm1, %v551_v5, 0.0 }
  0xe9   :  { %v2064_v33 = vadd.f32 %v1714_v11, %v1991_v40  ;;  %v281_v34 = vadd.f32 %v280_v62, %v279_v26  ;;  %v229_v36 = vadd.f32 %v228_v3, %v227_v25  ;;  %v230_v37 = vsel %vm222_vm1, %v2057_v22, 0.0 }
  0xea   :  { %v568_v35 = vadd.f32 %v567_v13, %v566_v28  ;;  %v234_v38 = vsel %vm222_vm1, %v2054_v21, 0.0  ;;  %v267_v39 = vmul.f32 %v2054_v21, %v2054_v21  ;;  %v265_v41 = vmul.f32 %v2057_v22, %v2057_v22 }
  0xeb   :  { %3143 = vst [vmem:[#allocation7_spill] sm:$0xff] %v2064_v33  ;;  %v2075_v43 = vadd.f32 %v1991_v40, %v463_v17  ;;  %v231_v44 = vadd.f32 %v230_v37, %v229_v36  ;;  %v283_v47 = vadd.f32 %v282_v30, %v281_v34  ;;  %v516_v48 = vadd.f32 %v515_v31, %v514_v27 }
  0xec   :  { %v570_v49 = vadd.f32 %v569_v32, %v568_v35  ;;  %v284_v52 = vsel %vm222_vm1, %v265_v41, 0.0  ;;  %v2083_v56 = vadd.f32 %v1695_v18, %v1991_v40  ;;  %v554_v59 = vmul.f32 %v2064_v33, %v2064_v33 }
  0xed   :  { %3144 = vst [vmem:[#allocation8_spill] sm:$0xff] %v2075_v43  ;;  %v1698_v51 = vpop.f32.mrb[8].mxu0  ;;  %v517_v54 = vsel %vm222_vm1, %v2075_v43, 0.0  ;;  %v552_v55 = vmul.f32 %v2075_v43, %v2075_v43  ;;  %v1718_v57 = vpop.f32.mrb[8].mxu1  ;;  %v2088_v62 = vadd.f32 %v1715_v23, %v1991_v40  ;;  %v2091_v63 = vadd.f32 %v1991_v40, %v178_v24 }
  0xee   :  { %3145 = vst [vmem:[#allocation9_spill] sm:$0xff] %v2083_v56  ;;  %v191_v58 = vpop.f32.mrb[9].mxu0  ;;  %v518_v60 = vadd.f32 %v517_v54, %v516_v48  ;;  %v479_v2 = vpop.f32.mrb[9].mxu1  ;;  %v288_v4 = vsel %vm222_vm1, %v267_v39, 0.0  ;;  %v521_v5 = vsel %vm222_vm1, %v2064_v33, 0.0  ;;  %v2098_v7 = vadd.f32 %v1991_v40, %v466_v29 }
  0xef   :  { %3146 = vst [vmem:[#allocation10_spill] sm:$0xff] %v2088_v62  ;;  %v1699_v3 = vpop.f32.mrb[10].mxu0  ;;  %v571_v6 = vsel %vm222_vm1, %v552_v55, 0.0  ;;  %v1719_v8 = vpop.f32.mrb[10].mxu1  ;;  %v285_v10 = vadd.f32 %v284_v52, %v283_v47  ;;  %v268_v12 = vmul.f32 %v2083_v56, %v2083_v56  ;;  %v232_v13 = vsel %vm222_vm1, %v2091_v63, 0.0 }
  0xf0   :  { %3147 = vst [vmem:[#allocation11_spill] sm:$0xff] %v2098_v7  ;;  %v194_v9 = vpop.f32.mrb[11].mxu0  ;;  %v572_v11 = vadd.f32 %v571_v6, %v570_v49  ;;  %v482_v14 = vpop.f32.mrb[11].mxu1  ;;  %v555_v15 = vmul.f32 %v2088_v62, %v2088_v62  ;;  %v233_v16 = vadd.f32 %v232_v13, %v231_v44  ;;  %v266_v17 = vmul.f32 %v2091_v63, %v2091_v63 }
  0xf1   :  { %v519_v18 = vsel %vm222_vm1, %v2098_v7, 0.0  ;;  %v575_v19 = vsel %vm222_vm1, %v554_v59, 0.0  ;;  %v236_v20 = vsel %vm222_vm1, %v2083_v56, 0.0  ;;  %v553_v24 = vmul.f32 %v2098_v7, %v2098_v7 }
  0xf2   :  { %v520_v23 = vadd.f32 %v519_v18, %v518_v60  ;;  %v235_v25 = vadd.f32 %v234_v38, %v233_v16  ;;  %v286_v26 = vsel %vm222_vm1, %v266_v17, 0.0  ;;  %v2117_v27 = vadd.f32 %v1698_v51, %v1991_v40 }
  0xf3   :  { %v2120_v28 = vadd.f32 %v1991_v40, %v191_v58  ;;  %v523_v29 = vsel %vm222_vm1, %v2088_v62, 0.0  ;;  %v287_v30 = vadd.f32 %v286_v26, %v285_v10  ;;  %v573_v32 = vsel %vm222_vm1, %v553_v24, 0.0 }
  0xf4   :  { %3148 = vst [vmem:[#allocation12_spill] sm:$0xff] %v2117_v27  ;;  %v522_v31 = vadd.f32 %v521_v5, %v520_v23  ;;  %v290_v35 = vsel %vm222_vm1, %v268_v12, 0.0  ;;  %v577_v36 = vsel %vm222_vm1, %v555_v15, 0.0  ;;  %v574_v37 = vadd.f32 %v573_v32, %v572_v11 }
  0xf5   :  { %3149 = vst [vmem:[#allocation13_spill] sm:$0xff] %v2120_v28  ;;  %v1702_v34 = vpop.f32.mrb[12].mxu0  ;;  %v2128_v38 = vadd.f32 %v1718_v57, %v1991_v40  ;;  %v1722_v39 = vpop.f32.mrb[12].mxu1  ;;  %v289_v44 = vadd.f32 %v288_v4, %v287_v30  ;;  %v237_v47 = vadd.f32 %v236_v20, %v235_v25  ;;  %v238_v48 = vsel %vm222_vm1, %v2120_v28, 0.0 }
  0xf6   :  { %v207_v41 = vpop.f32.mrb[13].mxu0  ;;  %v269_v49 = vmul.f32 %v2120_v28, %v2120_v28  ;;  %v2134_v51 = vpop.f32.mrb[13].mxu1  ;;  %v576_v54 = vadd.f32 %v575_v19, %v574_v37  ;;  %v242_v55 = vsel %vm222_vm1, %v2117_v27, 0.0  ;;  %v271_v57 = vmul.f32 %v2117_v27, %v2117_v27 }
  0xf7   :  { %3150 = vst [vmem:[#allocation14_spill] sm:$0xff] %v2128_v38  ;;  %v2136_v52 = vpop.f32.mrb[14].mxu0  ;;  %v2143_v58 = vadd.f32 %v1991_v40, %v479_v2  ;;  %v2145_v59 = vpop.f32.mrb[14].mxu1  ;;  %v239_v4 = vadd.f32 %v238_v48, %v237_v47  ;;  %v291_v5 = vadd.f32 %v290_v35, %v289_v44  ;;  %v524_v10 = vadd.f32 %v523_v29, %v522_v31 }
  0xf8   :  { %v2147_v60 = vpop.f32.mrb[15].mxu0  ;;  %v292_v6 = vsel %vm222_vm1, %v269_v49, 0.0  ;;  %v2150_v11 = vpop.f32.mrb[15].mxu1  ;;  %v578_v15 = vadd.f32 %v577_v36, %v576_v54  ;;  %v2157_v2 = vadd.f32 %v1699_v3, %v1991_v40  ;;  %v558_v16 = vmul.f32 %v2128_v38, %v2128_v38 }
  0xf9   :  { %3151 = vst [vmem:[#allocation15_spill] sm:$0xff] %v2143_v58  ;;  %v525_v12 = vsel %vm222_vm1, %v2143_v58, 0.0  ;;  %v556_v13 = vmul.f32 %v2143_v58, %v2143_v58  ;;  %v2162_v18 = vadd.f32 %v1719_v8, %v1991_v40  ;;  %v2165_v19 = vadd.f32 %v1991_v40, %v194_v9 }
  0xfa   :  { %3152 = vst [vmem:[#allocation16_spill] sm:$0xff] %v2157_v2  ;;  %v526_v17 = vadd.f32 %v525_v12, %v524_v10  ;;  %v296_v20 = vsel %vm222_vm1, %v271_v57, 0.0  ;;  %v529_v23 = vsel %vm222_vm1, %v2128_v38, 0.0  ;;  %v2172_v3 = vadd.f32 %v1991_v40, %v482_v14 }
  0xfb   :  { %3153 = vst [vmem:[#allocation17_spill] sm:$0xff] %v2162_v18  ;;  %3154 = vst [vmem:[#allocation18_spill] sm:$0xff] %v2165_v19  ;;  %v579_v24 = vsel %vm222_vm1, %v556_v13, 0.0  ;;  %v293_v25 = vadd.f32 %v292_v6, %v291_v5  ;;  %v272_v29 = vmul.f32 %v2157_v2, %v2157_v2  ;;  %v240_v8 = vsel %vm222_vm1, %v2165_v19, 0.0 }
  0xfc   :  { %3155 = vst [vmem:[#allocation19_spill] sm:$0xff] %v2172_v3  ;;  %v580_v26 = vadd.f32 %v579_v24, %v578_v15  ;;  %v559_v30 = vmul.f32 %v2162_v18, %v2162_v18  ;;  %v241_v31 = vadd.f32 %v240_v8, %v239_v4  ;;  %v270_v32 = vmul.f32 %v2165_v19, %v2165_v19 }
  0xfd   :  { %v2178_v9 = vpop.f32.mrb[16].mxu0  ;;  %v527_v14 = vsel %vm222_vm1, %v2172_v3, 0.0  ;;  %v2186_v35 = vpop.f32.mrb[16].mxu1  ;;  %v583_v37 = vsel %vm222_vm1, %v558_v16, 0.0  ;;  %v557_v47 = vmul.f32 %v2172_v3, %v2172_v3  ;;  %v2194_v48 = vadd.f32 %v1702_v34, %v1991_v40 }
  0xfe   :  { %v2188_v36 = vpop.f32.mrb[17].mxu0  ;;  %v528_v44 = vadd.f32 %v527_v14, %v526_v17  ;;  %v2196_v49 = vpop.f32.mrb[17].mxu1  ;;  %v243_v57 = vadd.f32 %v242_v55, %v241_v31  ;;  %v294_v4 = vsel %vm222_vm1, %v270_v32, 0.0  ;;  %v2202_v5 = vadd.f32 %v1722_v39, %v1991_v40 }
  0xff   :  { %3156 = vst [vmem:[#allocation20_spill] sm:$0xff] %v2194_v48  ;;  %v2198_v54 = vpop.f32.mrb[18].mxu0  ;;  %v2205_v6 = vadd.f32 %v1991_v40, %v207_v41  ;;  %v2207_v10 = vpop.f32.mrb[18].mxu1  ;;  %v244_v34 = vsel %vm222_vm1, %v2157_v2, 0.0  ;;  %v295_v13 = vadd.f32 %v294_v4, %v293_v25  ;;  %v581_v16 = vsel %vm222_vm1, %v557_v47, 0.0 }
 0x100   :  { %3157 = vst [vmem:[#allocation21_spill] sm:$0xff] %v2202_v5  ;;  %v2209_v12 = vpop.f32.mrb[19].mxu0  ;;  %v530_v15 = vadd.f32 %v529_v23, %v528_v44  ;;  %v2214_v55 = vpop.f32.mrb[19].mxu1  ;;  %v298_v17 = vsel %vm222_vm1, %v272_v29, 0.0  ;;  %v531_v39 = vsel %vm222_vm1, %v2162_v18, 0.0  ;;  %v585_v41 = vsel %vm222_vm1, %v559_v30, 0.0 }
 0x101   :  { %3158 = vst [vmem:[#allocation22_spill] sm:$0xff] %v2205_v6  ;;  %v582_v24 = vadd.f32 %v581_v16, %v580_v26  ;;  %v297_v8 = vadd.f32 %v296_v20, %v295_v13  ;;  %v245_v31 = vadd.f32 %v244_v34, %v243_v57  ;;  %v246_v32 = vsel %vm222_vm1, %v2205_v6, 0.0 }
 0x102   :  { %v273_v23 = vmul.f32 %v2205_v6, %v2205_v6  ;;  %v275_v14 = vmul.f32 %v2194_v48, %v2194_v48  ;;  %v562_v29 = vmul.f32 %v2202_v5, %v2202_v5  ;;  %v2230_v44 = vadd.f32 %v1991_v40, %v2134_v51 }
 0x103   :  { %v584_v25 = vadd.f32 %v583_v37, %v582_v24  ;;  %v247_v26 = vadd.f32 %v246_v32, %v245_v31  ;;  %v299_v20 = vadd.f32 %v298_v17, %v297_v8  ;;  %v532_v47 = vadd.f32 %v531_v39, %v530_v15 }
 0x104   :  { %3159 = vst [vmem:[#allocation23_spill] sm:$0xff] %v2230_v44  ;;  %v300_v30 = vsel %vm222_vm1, %v273_v23, 0.0  ;;  %v533_v37 = vsel %vm222_vm1, %v2230_v44, 0.0  ;;  %v560_v4 = vmul.f32 %v2230_v44, %v2230_v44  ;;  %v2241_v13 = vadd.f32 %v2136_v52, %v1991_v40 }
 0x105   :  { %v2233_v57 = vpop.f32.mrb[20].mxu0  ;;  %v586_v34 = vadd.f32 %v585_v41, %v584_v25  ;;  %v2243_v51 = vpop.f32.mrb[20].mxu1  ;;  %v301_v17 = vadd.f32 %v300_v30, %v299_v20  ;;  %v534_v24 = vadd.f32 %v533_v37, %v532_v47  ;;  %v2249_v15 = vadd.f32 %v2145_v59, %v1991_v40 }
 0x106   :  { %3160 = vst [vmem:[#allocation24_spill] sm:$0xff] %v2241_v13  ;;  %v2245_v16 = vpop.f32.mrb[21].mxu0  ;;  %v2253_v39 = vadd.f32 %v1991_v40, %v2147_v60  ;;  %v2255_v8 = vpop.f32.mrb[21].mxu1  ;;  %v250_v52 = vsel %vm222_vm1, %v2194_v48, 0.0  ;;  %v537_v31 = vsel %vm222_vm1, %v2202_v5, 0.0  ;;  %v587_v32 = vsel %vm222_vm1, %v560_v4, 0.0 }
 0x107   :  { %3161 = vst [vmem:[#allocation25_spill] sm:$0xff] %v2249_v15  ;;  %v2257_v41 = vpop.f32.mrb[22].mxu0  ;;  %v2266_v59 = vadd.f32 %v1991_v40, %v2150_v11  ;;  %v2268_v23 = vpop.f32.mrb[22].mxu1  ;;  %v304_v25 = vsel %vm222_vm1, %v275_v14, 0.0  ;;  %v591_v20 = vsel %vm222_vm1, %v562_v29, 0.0  ;;  %v276_v30 = vmul.f32 %v2241_v13, %v2241_v13 }
 0x108   :  { %3162 = vst [vmem:[#allocation26_spill] sm:$0xff] %v2253_v39  ;;  %v2270_v60 = vpop.f32.mrb[23].mxu0  ;;  %v248_v47 = vsel %vm222_vm1, %v2253_v39, 0.0  ;;  %v2278_v37 = vpop.f32.mrb[23].mxu1  ;;  %v588_v4 = vadd.f32 %v587_v32, %v586_v34  ;;  %v274_v11 = vmul.f32 %v2253_v39, %v2253_v39  ;;  %v563_v14 = vmul.f32 %v2249_v15, %v2249_v15 }
 0x109   :  { %3163 = vst [vmem:[#allocation27_spill] sm:$0xff] %v2266_v59  ;;  %v249_v5 = vadd.f32 %v248_v47, %v247_v26  ;;  %v535_v44 = vsel %vm222_vm1, %v2266_v59, 0.0  ;;  %v561_v18 = vmul.f32 %v2266_v59, %v2266_v59  ;;  %v2290_v38 = vadd.f32 %v2178_v9, %v1991_v40 }
 0x10a   :  { %v536_v29 = vadd.f32 %v535_v44, %v534_v24  ;;  %v252_v26 = vsel %vm222_vm1, %v2241_v13, 0.0  ;;  %v302_v32 = vsel %vm222_vm1, %v274_v11, 0.0  ;;  %v2297_v47 = vadd.f32 %v2186_v35, %v1991_v40 }
 0x10b   :  { %3164 = vst [vmem:[#allocation28_spill] sm:$0xff] %v2290_v38  ;;  %v251_v34 = vadd.f32 %v250_v52, %v249_v5  ;;  %v303_v3 = vadd.f32 %v302_v32, %v301_v17  ;;  %v589_v44 = vsel %vm222_vm1, %v561_v18, 0.0  ;;  %v2302_v24 = vadd.f32 %v1991_v40, %v2188_v36 }
 0x10c   :  { %3165 = vst [vmem:[#allocation29_spill] sm:$0xff] %v2297_v47  ;;  %v538_v58 = vadd.f32 %v537_v31, %v536_v29  ;;  %v306_v59 = vsel %vm222_vm1, %v276_v30, 0.0  ;;  %v539_v5 = vsel %vm222_vm1, %v2249_v15, 0.0  ;;  %v590_v11 = vadd.f32 %v589_v44, %v588_v4 }
 0x10d   :  { %3166 = vst [vmem:[#allocation30_spill] sm:$0xff] %v2302_v24  ;;  %v2304_v9 = vpop.f32.mrb[24].mxu0  ;;  %v253_v52 = vadd.f32 %v252_v26, %v251_v34  ;;  %v2309_v62 = vpop.f32.mrb[24].mxu1  ;;  %v593_v17 = vsel %vm222_vm1, %v563_v14, 0.0  ;;  %v305_v18 = vadd.f32 %v304_v25, %v303_v3  ;;  %v800_v36 = vsel %vm222_vm1, %v2290_v38, 0.0 }
 0x10e   :  { %v2311_v35 = vpop.f32.mrb[25].mxu0  ;;  %v540_v31 = vadd.f32 %v539_v5, %v538_v58  ;;  %v2316_v29 = vpop.f32.mrb[25].mxu1  ;;  %v592_v33 = vadd.f32 %v591_v20, %v590_v11  ;;  %v837_v4 = vmul.f32 %v2290_v38, %v2290_v38  ;;  %v1124_v26 = vmul.f32 %v2297_v47, %v2297_v47 }
 0x10f   :  { %v2318_v32 = vpop.f32.mrb[26].mxu0  ;;  %v254_v30 = vrot.slane %v253_v52, 4  ;;  %v2324_v34 = vpop.f32.mrb[26].mxu1  ;;  %v307_v58 = vadd.f32 %v306_v59, %v305_v18  ;;  %v835_v25 = vmul.f32 %v2302_v24, %v2302_v24  ;;  %v2332_v44 = vadd.f32 %v1991_v40, %v2196_v49 }
 0x110   :  { %v2326_v14 = vpop.f32.mrb[27].mxu0  ;;  %v541_v3 = vrot.slane %v540_v31, 4  ;;  %v2334_v20 = vpop.f32.mrb[27].mxu1  ;;  %v594_v11 = vadd.f32 %v593_v17, %v592_v33  ;;  %v1087_v38 = vsel %vm222_vm1, %v2297_v47, 0.0  ;;  %v797_v15 = vsel %vm222_vm1, %v2302_v24, 0.0 }
 0x111   :  { %3167 = vst [vmem:[#allocation31_spill] sm:$0xff] %v2332_v44  ;;  %v255_v5 = vadd.f32 %v254_v30, %v253_v52  ;;  %v308_v7 = vrot.slane %v307_v58, 4  ;;  %v1122_v18 = vmul.f32 %v2332_v44, %v2332_v44  ;;  %v2344_v43 = vadd.f32 %v2198_v54, %v1991_v40 }
 0x112   :  { %v542_v59 = vadd.f32 %v541_v3, %v540_v31  ;;  %v595_v61 = vrot.slane %v594_v11, 4  ;;  %v854_v52 = vsel %vm222_vm1, %v837_v4, 0.0  ;;  %v1141_v33 = vsel %vm222_vm1, %v1124_v26, 0.0 }
 0x113   :  { %v256_v49 = vrot.slane %v255_v5, 2  ;;  %v309_v17 = vadd.f32 %v308_v7, %v307_v58  ;;  %v851_v47 = vsel %vm222_vm1, %v835_v25, 0.0  ;;  %v2351_v31 = vadd.f32 %v2207_v10, %v1991_v40 }
 0x114   :  { %v543_v30 = vrot.slane %v542_v59, 2  ;;  %v596_v45 = vadd.f32 %v595_v61, %v594_v11  ;;  %v1084_v54 = vsel %vm222_vm1, %v2332_v44, 0.0  ;;  %v2359_v4 = vadd.f32 %v1991_v40, %v2209_v12 }
 0x115   :  { %v2353_v3 = vpop.f32.mrb[28].mxu0  ;;  %v257_v24 = vadd.f32 %v256_v49, %v255_v5  ;;  %v2361_v26 = vpop.f32.mrb[28].mxu1  ;;  %v310_v58 = vrot.slane %v309_v17, 2  ;;  %v1138_v10 = vsel %vm222_vm1, %v1122_v18, 0.0  ;;  %v838_v1 = vmul.f32 %v2344_v43, %v2344_v43 }
 0x116   :  { %3168 = vst [vmem:[#allocation32_spill] sm:$0xff] %v2359_v4  ;;  %v2363_v7 = vpop.f32.mrb[29].mxu0  ;;  %v544_v25 = vadd.f32 %v543_v30, %v542_v59  ;;  %v2368_v5 = vpop.f32.mrb[29].mxu1  ;;  %v597_v49 = vrot.slane %v596_v45, 2  ;;  %v798_v12 = vsel %vm222_vm1, %v2359_v4, 0.0  ;;  %v836_v44 = vmul.f32 %v2359_v4, %v2359_v4 }
 0x117   :  { %v2370_v61 = vpop.f32.mrb[30].mxu0  ;;  %v258_v11 = vrot.slane %v257_v24, 1  ;;  %v2376_v50 = vpop.f32.mrb[30].mxu1  ;;  %v311_v18 = vadd.f32 %v310_v58, %v309_v17  ;;  %v1125_v13 = vmul.f32 %v2351_v31, %v2351_v31  ;;  %v799_v48 = vadd.f32 %v798_v12, %v797_v15 }
 0x118   :  { %v2378_v59 = vpop.f32.mrb[31].mxu0  ;;  %v545_v30 = vrot.slane %v544_v25, 1  ;;  %v2382_v39 = vpop.f32.mrb[31].mxu1  ;;  %v598_v2 = vadd.f32 %v597_v49, %v596_v45  ;;  %v852_v27 = vsel %vm222_vm1, %v836_v44, 0.0  ;;  %v2387_v19 = vadd.f32 %v1991_v40, %v2214_v55 }
 0x119   :  { %v259_v6 = vadd.f32 %v258_v11, %v257_v24  ;;  %v312_v4 = vrot.slane %v311_v18, 1  ;;  %v801_v56 = vadd.f32 %v800_v36, %v799_v48  ;;  %v853_v21 = vadd.f32 %v852_v27, %v851_v47 }
 0x11a   :  { %v546_v28 = vadd.f32 %v545_v30, %v544_v25  ;;  %v599_v17 = vrot.slane %v598_v2, 1  ;;  %v1085_v58 = vsel %vm222_vm1, %v2387_v19, 0.0  ;;  %v1123_v15 = vmul.f32 %v2387_v19, %v2387_v19 }
 0x11b   :  { %v2395_v45 = vadd.f32 %v2233_v57, %v1991_v40  ;;  %v313_v24 = vadd.f32 %v312_v4, %v311_v18  ;;  %v855_v55 = vadd.f32 %v854_v52, %v853_v21  ;;  %v1086_v11 = vadd.f32 %v1085_v58, %v1084_v54 }
 0x11c   :  { %v2397_v44 = vadd.f32 %v546_v28, %v259_v6  ;;  %v600_v49 = vadd.f32 %v599_v17, %v598_v2  ;;  %v802_v27 = vsel %vm222_vm1, %v2344_v43, 0.0  ;;  %v856_v48 = vsel %vm222_vm1, %v838_v1, 0.0 }
 0x11d   :  { %v1139_v47 = vsel %vm222_vm1, %v1123_v15, 0.0  ;;  %v1088_v36 = vadd.f32 %v1087_v38, %v1086_v11  ;;  %v2405_v12 = vadd.f32 %v2243_v51, %v1991_v40  ;;  %v2409_v28 = vadd.f32 %v1991_v40, %v2245_v16 }
 0x11e   :  { %v1140_v25 = vadd.f32 %v1139_v47, %v1138_v10  ;;  %v2411_v21 = vadd.f32 %v600_v49, %v313_v24  ;;  %v1089_v2 = vsel %vm222_vm1, %v2351_v31, 0.0  ;;  %v1143_v6 = vsel %vm222_vm1, %v1125_v13, 0.0 }
 0x11f   :  { %v803_v1 = vadd.f32 %v802_v27, %v801_v56  ;;  %v841_v38 = vmul.f32 %v2395_v45, %v2395_v45  ;;  %v804_v51 = vsel %vm222_vm1, %v2409_v28, 0.0  ;;  %v857_v52 = vadd.f32 %v856_v48, %v855_v55 }
 0x120   :  { %v1142_v57 = vadd.f32 %v1141_v33, %v1140_v25  ;;  %v1128_v16 = vmul.f32 %v2405_v12, %v2405_v12  ;;  %v839_v4 = vmul.f32 %v2409_v28, %v2409_v28  ;;  %v2426_v10 = vadd.f32 %v1991_v40, %v2255_v8 }
 0x121   :  { %v805_v54 = vadd.f32 %v804_v51, %v803_v1  ;;  %v1090_v56 = vadd.f32 %v1089_v2, %v1088_v36  ;;  %v2430_v33 = vadd.f32 %v2257_v41, %v1991_v40  ;;  %v2434_v18 = vadd.f32 %v2268_v23, %v1991_v40 }
 0x122   :  { %v1144_v13 = vadd.f32 %v1143_v6, %v1142_v57  ;;  %v858_v30 = vsel %vm222_vm1, %v839_v4, 0.0  ;;  %v1091_v17 = vsel %vm222_vm1, %v2426_v10, 0.0  ;;  %v1126_v58 = vmul.f32 %v2426_v10, %v2426_v10 }
 0x123   :  { %v2443_v8 = vadd.f32 %v1991_v40, %v2270_v60  ;;  %v808_v41 = vsel %vm222_vm1, %v2395_v45, 0.0  ;;  %v862_v15 = vsel %vm222_vm1, %v841_v38, 0.0  ;;  %v1095_v23 = vsel %vm222_vm1, %v2405_v12, 0.0 }
 0x124   :  { %v859_v24 = vadd.f32 %v858_v30, %v857_v52  ;;  %v1145_v55 = vsel %vm222_vm1, %v1126_v58, 0.0  ;;  %v1092_v49 = vadd.f32 %v1091_v17, %v1090_v56  ;;  %v842_v27 = vmul.f32 %v2430_v33, %v2430_v33 }
 0x125   :  { %v806_v11 = vsel %vm222_vm1, %v2443_v8, 0.0  ;;  %v840_v48 = vmul.f32 %v2443_v8, %v2443_v8  ;;  %v1149_v47 = vsel %vm222_vm1, %v1128_v16, 0.0  ;;  %v1146_v36 = vadd.f32 %v1145_v55, %v1144_v13 }
 0x126   :  { %v807_v60 = vadd.f32 %v806_v11, %v805_v54  ;;  %v1129_v25 = vmul.f32 %v2434_v18, %v2434_v18  ;;  %v2462_v2 = vadd.f32 %v1991_v40, %v2278_v37  ;;  %v2467_v57 = vadd.f32 %v2304_v9, %v1991_v40 }
 0x127   :  { %v860_v1 = vsel %vm222_vm1, %v840_v48, 0.0  ;;  %v2471_v38 = vadd.f32 %v1991_v40, %v2311_v35  ;;  %v2479_v37 = vadd.f32 %v1991_v40, %v2316_v29  ;;  %v810_v54 = vsel %vm222_vm1, %v2430_v33, 0.0 }
 0x128   :  { %v809_v6 = vadd.f32 %v808_v41, %v807_v60  ;;  %v861_v51 = vadd.f32 %v860_v1, %v859_v24  ;;  %v1093_v52 = vsel %vm222_vm1, %v2462_v2, 0.0  ;;  %v1127_v16 = vmul.f32 %v2462_v2, %v2462_v2 }
 0x129   :  { %v864_v9 = vsel %vm222_vm1, %v842_v27, 0.0  ;;  %v1097_v35 = vsel %vm222_vm1, %v2434_v18, 0.0  ;;  %v1094_v4 = vadd.f32 %v1093_v52, %v1092_v49  ;;  %v812_v17 = vsel %vm222_vm1, %v2471_v38, 0.0 }
 0x12a   :  { %v863_v56 = vadd.f32 %v862_v15, %v861_v51  ;;  %v1147_v13 = vsel %vm222_vm1, %v1127_v16, 0.0  ;;  %v811_v30 = vadd.f32 %v810_v54, %v809_v6  ;;  %v1151_v58 = vsel %vm222_vm1, %v1129_v25, 0.0 }
 0x12b   :  { %v1096_v29 = vadd.f32 %v1095_v23, %v1094_v4  ;;  %v1148_v41 = vadd.f32 %v1147_v13, %v1146_v36  ;;  %v2492_v24 = vadd.f32 %v2309_v62, %v1991_v40  ;;  %v845_v55 = vmul.f32 %v2467_v57, %v2467_v57 }
 0x12c   :  { %v843_v15 = vmul.f32 %v2471_v38, %v2471_v38  ;;  %v865_v11 = vadd.f32 %v864_v9, %v863_v56  ;;  %v1099_v49 = vsel %vm222_vm1, %v2479_v37, 0.0  ;;  %v813_v60 = vadd.f32 %v812_v17, %v811_v30 }
 0x12d   :  { %v1150_v27 = vadd.f32 %v1149_v47, %v1148_v41  ;;  %v1098_v48 = vadd.f32 %v1097_v35, %v1096_v29  ;;  %v1130_v23 = vmul.f32 %v2479_v37, %v2479_v37  ;;  %v2505_v62 = vadd.f32 %v2318_v32, %v1991_v40 }
 0x12e   :  { %v866_v36 = vsel %vm222_vm1, %v843_v15, 0.0  ;;  %v2509_v25 = vadd.f32 %v1991_v40, %v2326_v14  ;;  %v2513_v6 = vadd.f32 %v1991_v40, %v2334_v20  ;;  %v2518_v52 = vadd.f32 %v2324_v34, %v1991_v40 }
 0x12f   :  { %v1100_v47 = vadd.f32 %v1099_v49, %v1098_v48  ;;  %v1152_v1 = vadd.f32 %v1151_v58, %v1150_v27  ;;  %v1153_v51 = vsel %vm222_vm1, %v1130_v23, 0.0  ;;  %v816_v32 = vsel %vm222_vm1, %v2467_v57, 0.0 }
 0x130   :  { %v1132_v16 = vmul.f32 %v2492_v24, %v2492_v24  ;;  %v867_v14 = vadd.f32 %v866_v36, %v865_v11  ;;  %v1103_v54 = vsel %vm222_vm1, %v2492_v24, 0.0  ;;  %v814_v20 = vsel %vm222_vm1, %v2509_v25, 0.0 }
 0x131   :  { %v844_v9 = vmul.f32 %v2509_v25, %v2509_v25  ;;  %v1101_v34 = vsel %vm222_vm1, %v2513_v6, 0.0  ;;  %v1154_v35 = vadd.f32 %v1153_v51, %v1152_v1  ;;  %v846_v4 = vmul.f32 %v2505_v62, %v2505_v62 }
 0x132   :  { %v815_v56 = vadd.f32 %v814_v20, %v813_v60  ;;  %v1102_v13 = vadd.f32 %v1101_v34, %v1100_v47  ;;  %v870_v30 = vsel %vm222_vm1, %v845_v55, 0.0  ;;  %v1133_v17 = vmul.f32 %v2518_v52, %v2518_v52 }
 0x133   :  { %v868_v58 = vsel %vm222_vm1, %v844_v9, 0.0  ;;  %v1131_v29 = vmul.f32 %v2513_v6, %v2513_v6  ;;  %v1157_v41 = vsel %vm222_vm1, %v1132_v16, 0.0  ;;  %v2543_v49 = vadd.f32 %v1991_v40, %v2363_v7 }
 0x134   :  { %v817_v15 = vadd.f32 %v816_v32, %v815_v56  ;;  %v869_v11 = vadd.f32 %v868_v58, %v867_v14  ;;  %v818_v27 = vsel %vm222_vm1, %v2505_v62, 0.0  ;;  %v1105_v55 = vsel %vm222_vm1, %v2518_v52, 0.0 }
 0x135   :  { %v1104_v60 = vadd.f32 %v1103_v54, %v1102_v13  ;;  %v1155_v48 = vsel %vm222_vm1, %v1131_v29, 0.0  ;;  %v872_v23 = vsel %vm222_vm1, %v846_v4, 0.0  ;;  %v1159_v51 = vsel %vm222_vm1, %v1133_v17, 0.0 }
 0x136   :  { %v871_v36 = vadd.f32 %v870_v30, %v869_v11  ;;  %v1156_v47 = vadd.f32 %v1155_v48, %v1154_v35  ;;  %v819_v1 = vadd.f32 %v818_v27, %v817_v15  ;;  %v820_v7 = vsel %vm222_vm1, %v2543_v49, 0.0 }
 0x137   :  { %v847_v32 = vmul.f32 %v2543_v49, %v2543_v49  ;;  %v2558_v16 = vadd.f32 %v1991_v40, %v2368_v5  ;;  %v2562_v54 = vadd.f32 %v2353_v3, %v1991_v40  ;;  %v2566_v20 = vadd.f32 %v2361_v26, %v1991_v40 }
 0x138   :  { %v1158_v14 = vadd.f32 %v1157_v41, %v1156_v47  ;;  %v873_v9 = vadd.f32 %v872_v23, %v871_v36  ;;  %v1106_v35 = vadd.f32 %v1105_v55, %v1104_v60  ;;  %v821_v56 = vadd.f32 %v820_v7, %v819_v1 }
 0x139   :  { %3169 = vst [vmem:[#allocation33_spill] sm:$0xff] %v2566_v20  ;;  %v874_v34 = vsel %vm222_vm1, %v847_v32, 0.0  ;;  %v1107_v4 = vsel %vm222_vm1, %v2558_v16, 0.0  ;;  %v1134_v5 = vmul.f32 %v2558_v16, %v2558_v16  ;;  %v2575_v3 = vadd.f32 %v2370_v61, %v1991_v40 }
 0x13a   :  { %v1160_v13 = vadd.f32 %v1159_v51, %v1158_v14  ;;  %v2579_v26 = vadd.f32 %v2376_v50, %v1991_v40  ;;  %v1108_v30 = vadd.f32 %v1107_v4, %v1106_v35  ;;  %v2584_v58 = vadd.f32 %v1991_v40, %v2378_v59 }
 0x13b   :  { %v1161_v17 = vsel %vm222_vm1, %v1134_v5, 0.0  ;;  %v2588_v29 = vadd.f32 %v1991_v40, %v2382_v39  ;;  %v824_v41 = vsel %vm222_vm1, %v2562_v54, 0.0  ;;  %v849_v61 = vmul.f32 %v2562_v54, %v2562_v54 }
 0x13c   :  { %3170 = vst [vmem:[#allocation34_spill] sm:$0xff] %v2579_v26  ;;  %v875_v15 = vadd.f32 %v874_v34, %v873_v9  ;;  %v1162_v50 = vadd.f32 %v1161_v17, %v1160_v13  ;;  %v822_v11 = vsel %vm222_vm1, %v2584_v58, 0.0  ;;  %v848_v27 = vmul.f32 %v2584_v58, %v2584_v58 }
 0x13d   :  { %3171 = vst [vmem:[#allocation35_spill] sm:$0xff] %v2588_v29  ;;  %v1109_v59 = vsel %vm222_vm1, %v2588_v29, 0.0  ;;  %v1136_v40 = vmul.f32 %v2566_v20, %v2566_v20  ;;  %v823_v39 = vadd.f32 %v822_v11, %v821_v56  ;;  %v1135_v60 = vmul.f32 %v2588_v29, %v2588_v29 }
 0x13e   :  { %v1110_v55 = vadd.f32 %v1109_v59, %v1108_v30  ;;  %v1111_v48 = vsel %vm222_vm1, %v2566_v20, 0.0  ;;  %v850_v23 = vmul.f32 %v2575_v3, %v2575_v3  ;;  %v1137_v36 = vmul.f32 %v2579_v26, %v2579_v26 }
 0x13f   :  { %v876_v47 = vsel %vm222_vm1, %v848_v27, 0.0  ;;  %v825_v1 = vadd.f32 %v824_v41, %v823_v39  ;;  %v1163_v32 = vsel %vm222_vm1, %v1135_v60, 0.0  ;;  %v878_v14 = vsel %vm222_vm1, %v849_v61, 0.0 }
 0x140   :  { %v877_v51 = vadd.f32 %v876_v47, %v875_v15  ;;  %v1112_v7 = vadd.f32 %v1111_v48, %v1110_v55  ;;  %v826_v9 = vsel %vm222_vm1, %v2575_v3, 0.0  ;;  %v1113_v34 = vsel %vm222_vm1, %v2579_v26, 0.0 }
 0x141   :  { %v1164_v35 = vadd.f32 %v1163_v32, %v1162_v50  ;;  %v1165_v4 = vsel %vm222_vm1, %v1136_v40, 0.0  ;;  %v827_v5 = vadd.f32 %v826_v9, %v825_v1  ;;  %v880_v30 = vsel %vm222_vm1, %v850_v23, 0.0 }
 0x142   :  { %v879_v56 = vadd.f32 %v878_v14, %v877_v51  ;;  %v1114_v13 = vadd.f32 %v1113_v34, %v1112_v7  ;;  %v1167_v41 = vsel %vm222_vm1, %v1137_v36, 0.0 }
 0x143   :  { %v1166_v17 = vadd.f32 %v1165_v4, %v1164_v35  ;;  %v828_v15 = vrot.slane %v827_v5, 4 }
 0x144   :  { %v881_v11 = vadd.f32 %v880_v30, %v879_v56  ;;  %v1115_v61 = vrot.slane %v1114_v13, 4 }
 0x145   :  { %v1168_v27 = vadd.f32 %v1167_v41, %v1166_v17  ;;  %v829_v59 = vadd.f32 %v828_v15, %v827_v5 }
 0x146   :  { %v882_v39 = vrot.slane %v881_v11, 4  ;;  %v1116_v55 = vadd.f32 %v1115_v61, %v1114_v13 }
 0x147   :  { %v1169_v60 = vrot.slane %v1168_v27, 4  ;;  %v830_v48 = vrot.slane %v829_v59, 2 }
 0x148   :  { %v883_v50 = vadd.f32 %v882_v39, %v881_v11  ;;  %v1117_v47 = vrot.slane %v1116_v55, 2 }
 0x149   :  { %v1170_v40 = vadd.f32 %v1169_v60, %v1168_v27  ;;  %v831_v1 = vadd.f32 %v830_v48, %v829_v59  ;;  %v1189_v60 = vlaneseq }
 0x14a   :  { %v884_v51 = vrot.slane %v883_v50, 2  ;;  %v1118_v7 = vadd.f32 %v1117_v47, %v1116_v55 }
 0x14b   :  { %v1171_v32 = vrot.slane %v1170_v40, 2  ;;  %v832_v23 = vrot.slane %v831_v1, 1  ;;  %v1190_v48 = vshrl.u32 %v1189_v60, 7  ;;  %v3182_v60 = vld [vmem:[#allocation3_spill] sm:$0xff] }
 0x14c   :  { %v885_v14 = vadd.f32 %v884_v51, %v883_v50  ;;  %v1119_v9 = vrot.slane %v1118_v7, 1 }
 0x14d   :  { %v1172_v36 = vadd.f32 %v1171_v32, %v1170_v40  ;;  %v833_v34 = vadd.f32 %v832_v23, %v831_v1  ;;  %v1191_v50 = vsub.s32 0, %v1190_v48 }
 0x14e   :  { %v886_v35 = vrot.slane %v885_v14, 1  ;;  %v1120_v13 = vadd.f32 %v1119_v9, %v1118_v7 }
 0x14f   :  { %v1173_v4 = vrot.slane %v1172_v36, 1  ;;  %v834_v5 = vadd.f32 %v833_v34, %v2397_v44  ;;  %v1181_v44 = vld [vmem:[%s3101_s3] sm:$0x1] }
 0x150   :  { %v887_v56 = vadd.f32 %v886_v35, %v885_v14  ;;  %v3172_v35 = vld [vmem:[#allocation6_spill] sm:$0xff] }
 0x151   :  { %v1121_v17 = vadd.f32 %v1120_v13, %v834_v5  ;;  %v1174_v41 = vadd.f32 %v1173_v4, %v1172_v36  ;;  %v3173_v5 = vld [vmem:[#allocation9_spill] sm:$0xff]  ;;  %v3175_v13 = vld [vmem:[#allocation18_spill] sm:$0xff] }
 0x152   :  { %v888_v30 = vadd.f32 %v887_v56, %v2411_v21  ;;  %v1185_v21 = vld [vmem:[%s3102_s4] sm:$0x1]  ;;  %v3174_v56 = vld [vmem:[#allocation13_spill] sm:$0xff] }
 0x153   :  { %v1176_v11 = vmul.f32 0.001953125, %v1121_v17  ;;  %v3177_v17 = vld [vmem:[#allocation16_spill] sm:$0xff] }
 0x154   :  { %v1175_v15 = vadd.f32 %v1174_v41, %v888_v30  ;;  %v3176_v30 = vld [vmem:[#allocation12_spill] sm:$0xff]  ;;  %v3178_v41 = vld [vmem:[#allocation22_spill] sm:$0xff] }
 0x155   :  { %v1178_v27 = vmul.f32 %v1176_v11, %v1176_v11 }
 0x156   :  { %v1177_v61 = vmul.f32 0.001953125, %v1175_v15  ;;  %v3179_v15 = vld [vmem:[#allocation26_spill] sm:$0xff] }
 0x158   :  { %v1179_v59 = vsub.f32 %v1177_v61, %v1178_v27  ;;  %v3180_v61 = vld [vmem:[#allocation20_spill] sm:$0xff] }
 0x15a   :  { %v1180_v39 = vmax.f32 %v1179_v59, 0.0  ;;  %v3181_v59 = vld [vmem:[#allocation24_spill] sm:$0xff] }
 0x15c   :  { %v1182_v55 = vadd.f32 1e-05, %v1180_v39 }
 0x15e   :  { %1804 = vrsqrt.f32 %v1182_v55 }
 0x168   :  { %v1805_v47 = vpop.eup %1804 }
 0x169   :  { %v1184_v40 = vmul.f32 %v1805_v47, %v1181_v44  ;;  %v3183_v44 = vld [vmem:[#allocation5_spill] sm:$0xff] }
 0x16b   :  { %v1186_v1 = vmul.f32 %v1184_v40, %v1176_v11  ;;  %v2628_v51 = vrot.slane %v1184_v40, %v1191_v50  ;;  %v3184_v40 = vld [vmem:[#allocation2_spill] sm:$0xff] }
 0x16d   :  { %v1187_v7 = vsub.f32 %v1185_v21, %v1186_v1  ;;  %v1194_v32 = vmul.f32 %v2628_v51, %v2000_v46  ;;  %v1195_v23 = vmul.f32 %v2628_v51, %v2029_v0  ;;  %v1196_v14 = vmul.f32 %v2628_v51, %v1994_v42  ;;  %v3185_v1 = vld [vmem:[#allocation4_spill] sm:$0xff] }
 0x16e   :  { %v1197_v9 = vmul.f32 %v2628_v51, %v2008_v53  ;;  %v1198_v36 = vmul.f32 %v2628_v51, %v2057_v22  ;;  %v1199_v34 = vmul.f32 %v2628_v51, %v2091_v63  ;;  %v1200_v4 = vmul.f32 %v2628_v51, %v3172_v35 }
 0x16f   :  { %v1201_v46 = vmul.f32 %v2628_v51, %v3173_v5  ;;  %v1202_v0 = vmul.f32 %v2628_v51, %v3174_v56  ;;  %v1203_v42 = vmul.f32 %v2628_v51, %v3175_v13  ;;  %v1204_v53 = vmul.f32 %v2628_v51, %v3176_v30  ;;  %v3186_v5 = vld [vmem:[#allocation8_spill] sm:$0xff] }
 0x170   :  { %v1205_v22 = vmul.f32 %v2628_v51, %v3177_v17  ;;  %v1206_v63 = vmul.f32 %v2628_v51, %v3178_v41  ;;  %v1207_v11 = vmul.f32 %v2628_v51, %v3179_v15  ;;  %v1208_v27 = vmul.f32 %v2628_v51, %v3180_v61 }
 0x171   :  { %v1209_v39 = vmul.f32 %v2628_v51, %v3181_v59  ;;  %v2662_v55 = vrot.slane %v1187_v7, %v1191_v50  ;;  %v2666_v48 = vmul.f32 %v2628_v51, %v3182_v60  ;;  %v2670_v47 = vmul.f32 %v2628_v51, %v3183_v44  ;;  %v3187_v7 = vld [vmem:[#allocation11_spill] sm:$0xff] }
 0x172   :  { %v2674_v21 = vmul.f32 %v2628_v51, %v3184_v40  ;;  %v2678_v35 = vmul.f32 %v2628_v51, %v3185_v1  ;;  %v2682_v50 = vmul.f32 %v2628_v51, %v3186_v5  ;;  %v2686_v56 = vmul.f32 %v2628_v51, %v3187_v7 }
 0x173   :  { %v1216_v13 = vadd.f32 %v2662_v55, %v1194_v32  ;;  %v1217_v30 = vadd.f32 %v2662_v55, %v1195_v23  ;;  %v1218_v17 = vadd.f32 %v2662_v55, %v1196_v14  ;;  %v1219_v41 = vadd.f32 %v2662_v55, %v1197_v9 }
 0x174   :  { %v1220_v15 = vadd.f32 %v2662_v55, %v1198_v36  ;;  %v1221_v61 = vadd.f32 %v2662_v55, %v1199_v34  ;;  %v1222_v59 = vadd.f32 %v2662_v55, %v1200_v4  ;;  %v1223_v60 = vadd.f32 %v2662_v55, %v1201_v46 }
 0x175   :  { %v1224_v44 = vadd.f32 %v2662_v55, %v1202_v0  ;;  %v1225_v40 = vadd.f32 %v2662_v55, %v1203_v42  ;;  %v1226_v32 = vadd.f32 %v2662_v55, %v1204_v53  ;;  %v1227_v23 = vadd.f32 %v2662_v55, %v1205_v22 }
 0x176   :  { %v1228_v14 = vadd.f32 %v2662_v55, %v1206_v63  ;;  %v1229_v9 = vadd.f32 %v2662_v55, %v1207_v11  ;;  %v1230_v36 = vadd.f32 %v2662_v55, %v1208_v27  ;;  %v1231_v34 = vadd.f32 %v2662_v55, %v1209_v39 }
 0x177   :  { %v1232_v1 = vmax.f32 %v1216_v13, 0.0  ;;  %v1233_v4 = vmax.f32 %v1217_v30, 0.0  ;;  %v1234_v5 = vmax.f32 %v1218_v17, 0.0  ;;  %v1235_v46 = vmax.f32 %v1219_v41, 0.0  ;;  %v3189_v30 = vld [vmem:[#allocation10_spill] sm:$0xff]  ;;  %v3190_v17 = vld [vmem:[#allocation15_spill] sm:$0xff] }
 0x178   :  { %v1236_v7 = vmax.f32 %v1220_v15, 0.0  ;;  %v1237_v0 = vmax.f32 %v1221_v61, 0.0  ;;  %v1238_v26 = vmax.f32 %v1222_v59, 0.0  ;;  %v1239_v42 = vmax.f32 %v1223_v60, 0.0  ;;  %v3191_v15 = vld [vmem:[#allocation19_spill] sm:$0xff]  ;;  %v3193_v60 = vld [vmem:[#allocation17_spill] sm:$0xff] }
 0x179   :  { %v1240_v20 = vmax.f32 %v1224_v44, 0.0  ;;  %v1241_v53 = vmax.f32 %v1225_v40, 0.0  ;;  %v1242_v29 = vmax.f32 %v1226_v32, 0.0  ;;  %v1243_v22 = vmax.f32 %v1227_v23, 0.0  ;;  %1248 = vst.msk [vmem:[%s3103_s5] sm:$0xff] %vm222_vm1, %v1232_v1  ;;  %1249 = vst.msk [vmem:[%s3103_s5 + $0x8] sm:$0xff] %vm222_vm1, %v1233_v4 }
 0x17a   :  { %1250 = vst.msk [vmem:[%s3103_s5 + $0x10] sm:$0xff] %vm222_vm1, %v1234_v5  ;;  %1251 = vst.msk [vmem:[%s3103_s5 + $0x18] sm:$0xff] %vm222_vm1, %v1235_v46  ;;  %v1244_v63 = vmax.f32 %v1228_v14, 0.0  ;;  %v1245_v11 = vmax.f32 %v1229_v9, 0.0  ;;  %v1246_v27 = vmax.f32 %v1230_v36, 0.0  ;;  %v1247_v39 = vmax.f32 %v1231_v34, 0.0 }
 0x17b   :  { %1252 = vst.msk [vmem:[%s3103_s5 + $0x20] sm:$0xff] %vm222_vm1, %v1236_v7  ;;  %1253 = vst.msk [vmem:[%s3103_s5 + $0x28] sm:$0xff] %vm222_vm1, %v1237_v0  ;;  %v1272_v41 = vmul.f32 %v2628_v51, %v3190_v17  ;;  %v1273_v61 = vmul.f32 %v2628_v51, %v3191_v15  ;;  %v1275_v44 = vmul.f32 %v2628_v51, %v3193_v60  ;;  %v3194_v40 = vld [vmem:[#allocation23_spill] sm:$0xff]  ;;  %v3196_v9 = vld [vmem:[#allocation21_spill] sm:$0xff] }
 0x17c   :  { %1254 = vst.msk [vmem:[%s3103_s5 + $0x30] sm:$0xff] %vm222_vm1, %v1238_v26  ;;  %1255 = vst.msk [vmem:[%s3103_s5 + $0x38] sm:$0xff] %vm222_vm1, %v1239_v42  ;;  %v3188_v26 = vld [vmem:[#allocation7_spill] sm:$0xff]  ;;  %v1276_v32 = vmul.f32 %v2628_v51, %v3194_v40  ;;  %v1278_v36 = vmul.f32 %v2628_v51, %v3196_v9  ;;  %v3197_v34 = vld [vmem:[#allocation25_spill] sm:$0xff]  ;;  %v1280_v4 = vadd.f32 %v2666_v48, %v2662_v55 }
 0x17d   :  { %1256 = vst.msk [vmem:[%s3103_s5 + $0x40] sm:$0xff] %vm222_vm1, %v1240_v20  ;;  %1257 = vst.msk [vmem:[%s3103_s5 + $0x48] sm:$0xff] %vm222_vm1, %v1241_v53  ;;  %v1270_v13 = vmul.f32 %v2628_v51, %v3188_v26  ;;  %v1271_v20 = vmul.f32 %v2628_v51, %v3189_v30  ;;  %v3195_v23 = vld [vmem:[#allocation27_spill] sm:$0xff]  ;;  %v1279_v1 = vmul.f32 %v2628_v51, %v3197_v34  ;;  %v3199_v9 = vld [vmem:[#allocation32_spill] sm:$0xff] }
 0x17e   :  { %1258 = vst.msk [vmem:[%s3103_s5 + $0x50] sm:$0xff] %vm222_vm1, %v1242_v29  ;;  %1259 = vst.msk [vmem:[%s3103_s5 + $0x58] sm:$0xff] %vm222_vm1, %v1243_v22  ;;  %v3192_v29 = vld [vmem:[#allocation14_spill] sm:$0xff]  ;;  %v1277_v14 = vmul.f32 %v2628_v51, %v3195_v23  ;;  %v1281_v5 = vadd.f32 %v2670_v47, %v2662_v55  ;;  %v1282_v46 = vadd.f32 %v2674_v21, %v2662_v55  ;;  %v3200_v34 = vld [vmem:[#allocation28_spill] sm:$0xff] }
 0x17f   :  { %1260 = vst.msk [vmem:[%s3103_s5 + $0x60] sm:$0xff] %vm222_vm1, %v1244_v63  ;;  %1261 = vst.msk [vmem:[%s3103_s5 + $0x68] sm:$0xff] %vm222_vm1, %v1245_v11  ;;  %v1274_v59 = vmul.f32 %v2628_v51, %v3192_v29  ;;  %v1283_v7 = vadd.f32 %v2678_v35, %v2662_v55  ;;  %v1284_v0 = vadd.f32 %v2682_v50, %v2662_v55  ;;  %v3198_v23 = vld [vmem:[#allocation30_spill] sm:$0xff] }
 0x180   :  { %1262 = vst.msk [vmem:[%s3103_s5 + $0x70] sm:$0xff] %vm222_vm1, %v1246_v27  ;;  %1263 = vst.msk [vmem:[%s3103_s5 + $0x78] sm:$0xff] %vm222_vm1, %v1247_v39  ;;  %v1285_v42 = vadd.f32 %v2686_v56, %v2662_v55  ;;  %v1286_v53 = vadd.f32 %v1270_v13, %v2662_v55  ;;  %v1287_v22 = vadd.f32 %v1271_v20, %v2662_v55  ;;  %v1296_v27 = vmax.f32 %v1280_v4, 0.0 }
 0x181   :  { %v1288_v48 = vadd.f32 %v1272_v41, %v2662_v55  ;;  %v1289_v47 = vadd.f32 %v1273_v61, %v2662_v55  ;;  %v1290_v63 = vadd.f32 %v1274_v59, %v2662_v55  ;;  %v1291_v21 = vadd.f32 %v1275_v44, %v2662_v55 }
 0x182   :  { %v1292_v35 = vadd.f32 %v1276_v32, %v2662_v55  ;;  %v1293_v11 = vadd.f32 %v1277_v14, %v2662_v55  ;;  %v1294_v50 = vadd.f32 %v1278_v36, %v2662_v55  ;;  %v1295_v56 = vadd.f32 %v1279_v1, %v2662_v55  ;;  %1596 = vst.msk [vmem:[%s3103_s5 + $0x80] sm:$0xff] %vm222_vm1, %v1296_v27 }
 0x183   :  { %v1297_v39 = vmax.f32 %v1281_v5, 0.0  ;;  %v1298_v26 = vmax.f32 %v1282_v46, 0.0  ;;  %v1299_v13 = vmax.f32 %v1283_v7, 0.0  ;;  %v1300_v30 = vmax.f32 %v1284_v0, 0.0 }
 0x184   :  { %v1301_v20 = vmax.f32 %v1285_v42, 0.0  ;;  %v1302_v17 = vmax.f32 %v1286_v53, 0.0  ;;  %v1303_v41 = vmax.f32 %v1287_v22, 0.0  ;;  %v1304_v15 = vmax.f32 %v1288_v48, 0.0 }
 0x185   :  { %v1305_v61 = vmax.f32 %v1289_v47, 0.0  ;;  %1597 = vst.msk [vmem:[%s3103_s5 + $0x88] sm:$0xff] %vm222_vm1, %v1297_v39  ;;  %v1306_v29 = vmax.f32 %v1290_v63, 0.0  ;;  %v1307_v59 = vmax.f32 %v1291_v21, 0.0  ;;  %v1308_v60 = vmax.f32 %v1292_v35, 0.0  ;;  %1598 = vst.msk [vmem:[%s3103_s5 + $0x90] sm:$0xff] %vm222_vm1, %v1298_v26 }
 0x186   :  { %v1309_v44 = vmax.f32 %v1293_v11, 0.0  ;;  %1599 = vst.msk [vmem:[%s3103_s5 + $0x98] sm:$0xff] %vm222_vm1, %v1299_v13  ;;  %1600 = vst.msk [vmem:[%s3103_s5 + $0xa0] sm:$0xff] %vm222_vm1, %v1300_v30  ;;  %v1310_v40 = vmax.f32 %v1294_v50, 0.0  ;;  %v1311_v32 = vmax.f32 %v1295_v56, 0.0  ;;  %v1329_v14 = vmul.f32 %v2628_v51, %v3198_v23  ;;  %v3201_v23 = vld [vmem:[#allocation31_spill] sm:$0xff] }
 0x187   :  { %1601 = vst.msk [vmem:[%s3103_s5 + $0xa8] sm:$0xff] %vm222_vm1, %v1301_v20  ;;  %1602 = vst.msk [vmem:[%s3103_s5 + $0xb0] sm:$0xff] %vm222_vm1, %v1302_v17  ;;  %v1330_v36 = vmul.f32 %v2628_v51, %v3199_v9  ;;  %v1331_v1 = vmul.f32 %v2628_v51, %v3200_v34  ;;  %v1332_v4 = vmul.f32 %v2628_v51, %v2344_v43 }
 0x188   :  { %1603 = vst.msk [vmem:[%s3103_s5 + $0xb8] sm:$0xff] %vm222_vm1, %v1303_v41  ;;  %1604 = vst.msk [vmem:[%s3103_s5 + $0xc0] sm:$0xff] %vm222_vm1, %v1304_v15  ;;  %v1333_v5 = vmul.f32 %v2628_v51, %v2409_v28  ;;  %v1334_v46 = vmul.f32 %v2628_v51, %v2443_v8  ;;  %v1335_v7 = vmul.f32 %v2628_v51, %v2395_v45 }
 0x189   :  { %1605 = vst.msk [vmem:[%s3103_s5 + $0xc8] sm:$0xff] %vm222_vm1, %v1305_v61  ;;  %1606 = vst.msk [vmem:[%s3103_s5 + $0xd0] sm:$0xff] %vm222_vm1, %v1306_v29  ;;  %v1336_v43 = vmul.f32 %v2628_v51, %v2430_v33  ;;  %v1337_v28 = vmul.f32 %v2628_v51, %v2471_v38  ;;  %v1338_v8 = vmul.f32 %v2628_v51, %v2509_v25 }
 0x18a   :  { %1607 = vst.msk [vmem:[%s3103_s5 + $0xd8] sm:$0xff] %vm222_vm1, %v1307_v59  ;;  %1608 = vst.msk [vmem:[%s3103_s5 + $0xe0] sm:$0xff] %vm222_vm1, %v1308_v60  ;;  %v1339_v0 = vmul.f32 %v2628_v51, %v2467_v57  ;;  %v1340_v42 = vmul.f32 %v2628_v51, %v2505_v62  ;;  %v1341_v53 = vmul.f32 %v2628_v51, %v2543_v49 }
 0x18b   :  { %1609 = vst.msk [vmem:[%s3103_s5 + $0xe8] sm:$0xff] %vm222_vm1, %v1309_v44  ;;  %1610 = vst.msk [vmem:[%s3103_s5 + $0xf0] sm:$0xff] %vm222_vm1, %v1310_v40  ;;  %v1342_v45 = vmul.f32 %v2628_v51, %v2584_v58  ;;  %v1343_v33 = vmul.f32 %v2628_v51, %v2562_v54  ;;  %v1344_v38 = vmul.f32 %v2628_v51, %v2575_v3 }
 0x18c   :  { %1611 = vst.msk [vmem:[%s3103_s5 + $0xf8] sm:$0xff] %vm222_vm1, %v1311_v32  ;;  %v1345_v25 = vadd.f32 %v1329_v14, %v2662_v55  ;;  %v1346_v22 = vadd.f32 %v1330_v36, %v2662_v55  ;;  %v1347_v57 = vadd.f32 %v1331_v1, %v2662_v55  ;;  %v1348_v62 = vadd.f32 %v1332_v4, %v2662_v55 }
 0x18d   :  { %v1349_v48 = vadd.f32 %v1333_v5, %v2662_v55  ;;  %v1350_v49 = vadd.f32 %v1334_v46, %v2662_v55  ;;  %v1351_v58 = vadd.f32 %v1335_v7, %v2662_v55  ;;  %v1352_v47 = vadd.f32 %v1336_v43, %v2662_v55 }
 0x18e   :  { %v1353_v54 = vadd.f32 %v1337_v28, %v2662_v55  ;;  %v1354_v3 = vadd.f32 %v1338_v8, %v2662_v55  ;;  %v1355_v63 = vadd.f32 %v1339_v0, %v2662_v55  ;;  %v1356_v21 = vadd.f32 %v1340_v42, %v2662_v55  ;;  %v3203_v28 = vld [vmem:[#allocation35_spill] sm:$0xff]  ;;  %v3204_v8 = vld [vmem:[#allocation33_spill] sm:$0xff]  ;;  %v3205_v0 = vld [vmem:[#allocation34_spill] sm:$0xff] }
 0x18f   :  { %v1357_v35 = vadd.f32 %v1341_v53, %v2662_v55  ;;  %v1358_v11 = vadd.f32 %v1342_v45, %v2662_v55  ;;  %v1359_v50 = vadd.f32 %v1343_v33, %v2662_v55  ;;  %v1360_v56 = vadd.f32 %v1344_v38, %v2662_v55 }
 0x190   :  { %v1361_v27 = vmax.f32 %v1345_v25, 0.0  ;;  %v1362_v39 = vmax.f32 %v1346_v22, 0.0  ;;  %v1363_v26 = vmax.f32 %v1347_v57, 0.0  ;;  %v1364_v13 = vmax.f32 %v1348_v62, 0.0 }
 0x191   :  { %v1365_v30 = vmax.f32 %v1349_v48, 0.0  ;;  %v1366_v20 = vmax.f32 %v1350_v49, 0.0  ;;  %v1367_v17 = vmax.f32 %v1351_v58, 0.0  ;;  %v1368_v41 = vmax.f32 %v1352_v47, 0.0 }
 0x192   :  { %v1369_v15 = vmax.f32 %v1353_v54, 0.0  ;;  %v1370_v61 = vmax.f32 %v1354_v3, 0.0  ;;  %1612 = vst.msk [vmem:[%s3103_s5 + $0x100] sm:$0xff] %vm222_vm1, %v1361_v27  ;;  %1613 = vst.msk [vmem:[%s3103_s5 + $0x108] sm:$0xff] %vm222_vm1, %v1362_v39  ;;  %v1371_v29 = vmax.f32 %v1355_v63, 0.0  ;;  %v1372_v59 = vmax.f32 %v1356_v21, 0.0 }
 0x193   :  { %v1373_v60 = vmax.f32 %v1357_v35, 0.0  ;;  %v1374_v44 = vmax.f32 %v1358_v11, 0.0  ;;  %1614 = vst.msk [vmem:[%s3103_s5 + $0x110] sm:$0xff] %vm222_vm1, %v1363_v26  ;;  %1615 = vst.msk [vmem:[%s3103_s5 + $0x118] sm:$0xff] %vm222_vm1, %v1364_v13  ;;  %v1375_v40 = vmax.f32 %v1359_v50, 0.0  ;;  %v1376_v32 = vmax.f32 %v1360_v56, 0.0 }
 0x194   :  { %1616 = vst.msk [vmem:[%s3103_s5 + $0x120] sm:$0xff] %vm222_vm1, %v1365_v30  ;;  %1617 = vst.msk [vmem:[%s3103_s5 + $0x128] sm:$0xff] %vm222_vm1, %v1366_v20  ;;  %v1394_v14 = vmul.f32 %v2628_v51, %v3201_v23  ;;  %v1395_v9 = vmul.f32 %v2628_v51, %v2387_v19  ;;  %v3202_v19 = vld [vmem:[#allocation29_spill] sm:$0xff]  ;;  %v1397_v34 = vmul.f32 %v2628_v51, %v2351_v31 }
 0x195   :  { %1618 = vst.msk [vmem:[%s3103_s5 + $0x130] sm:$0xff] %vm222_vm1, %v1367_v17  ;;  %1619 = vst.msk [vmem:[%s3103_s5 + $0x138] sm:$0xff] %vm222_vm1, %v1368_v41  ;;  %v1396_v36 = vmul.f32 %v2628_v51, %v3202_v19  ;;  %v1398_v1 = vmul.f32 %v2628_v51, %v2426_v10  ;;  %v1399_v4 = vmul.f32 %v2628_v51, %v2462_v2 }
 0x196   :  { %1620 = vst.msk [vmem:[%s3103_s5 + $0x140] sm:$0xff] %vm222_vm1, %v1369_v15  ;;  %1621 = vst.msk [vmem:[%s3103_s5 + $0x148] sm:$0xff] %vm222_vm1, %v1370_v61  ;;  %v1400_v5 = vmul.f32 %v2628_v51, %v2405_v12  ;;  %v1401_v31 = vmul.f32 %v2628_v51, %v2434_v18  ;;  %v1402_v10 = vmul.f32 %v2628_v51, %v2479_v37 }
 0x197   :  { %1622 = vst.msk [vmem:[%s3103_s5 + $0x150] sm:$0xff] %vm222_vm1, %v1371_v29  ;;  %1623 = vst.msk [vmem:[%s3103_s5 + $0x158] sm:$0xff] %vm222_vm1, %v1372_v59  ;;  %v1403_v2 = vmul.f32 %v2628_v51, %v2513_v6  ;;  %v1404_v46 = vmul.f32 %v2628_v51, %v2492_v24  ;;  %v1405_v7 = vmul.f32 %v2628_v51, %v2518_v52 }
 0x198   :  { %1624 = vst.msk [vmem:[%s3103_s5 + $0x160] sm:$0xff] %vm222_vm1, %v1373_v60  ;;  %1625 = vst.msk [vmem:[%s3103_s5 + $0x168] sm:$0xff] %vm222_vm1, %v1374_v44  ;;  %v1406_v43 = vmul.f32 %v2628_v51, %v2558_v16  ;;  %v1407_v12 = vmul.f32 %v2628_v51, %v3203_v28  ;;  %v1408_v18 = vmul.f32 %v2628_v51, %v3204_v8 }
 0x199   :  { %1626 = vst.msk [vmem:[%s3103_s5 + $0x170] sm:$0xff] %vm222_vm1, %v1375_v40  ;;  %1627 = vst.msk [vmem:[%s3103_s5 + $0x178] sm:$0xff] %vm222_vm1, %v1376_v32  ;;  %v1409_v37 = vmul.f32 %v2628_v51, %v3205_v0  ;;  %v1410_v6 = vadd.f32 %v1394_v14, %v2662_v55  ;;  %v1411_v42 = vadd.f32 %v1395_v9, %v2662_v55 }
 0x19a   :  { %v1412_v24 = vadd.f32 %v1396_v36, %v2662_v55  ;;  %v1413_v52 = vadd.f32 %v1397_v34, %v2662_v55  ;;  %v1414_v53 = vadd.f32 %v1398_v1, %v2662_v55  ;;  %v1415_v16 = vadd.f32 %v1399_v4, %v2662_v55 }
 0x19b   :  { %v1416_v45 = vadd.f32 %v1400_v5, %v2662_v55  ;;  %v1417_v33 = vadd.f32 %v1401_v31, %v2662_v55  ;;  %v1418_v38 = vadd.f32 %v1402_v10, %v2662_v55  ;;  %v1419_v51 = vadd.f32 %v1403_v2, %v2662_v55 }
 0x19c   :  { %v1420_v25 = vadd.f32 %v1404_v46, %v2662_v55  ;;  %v1421_v22 = vadd.f32 %v1405_v7, %v2662_v55  ;;  %v1422_v57 = vadd.f32 %v1406_v43, %v2662_v55  ;;  %v1423_v62 = vadd.f32 %v1407_v12, %v2662_v55 }
 0x19d   :  { %v1424_v48 = vadd.f32 %v1408_v18, %v2662_v55  ;;  %v1425_v49 = vadd.f32 %v1409_v37, %v2662_v55  ;;  %v1426_v58 = vmax.f32 %v1410_v6, 0.0  ;;  %v1427_v47 = vmax.f32 %v1411_v42, 0.0 }
 0x19e   :  { %v1428_v54 = vmax.f32 %v1412_v24, 0.0  ;;  %v1429_v3 = vmax.f32 %v1413_v52, 0.0  ;;  %v1430_v63 = vmax.f32 %v1414_v53, 0.0  ;;  %v1431_v21 = vmax.f32 %v1415_v16, 0.0 }
 0x19f   :  { %v1432_v35 = vmax.f32 %v1416_v45, 0.0  ;;  %v1433_v11 = vmax.f32 %v1417_v33, 0.0  ;;  %v1434_v50 = vmax.f32 %v1418_v38, 0.0  ;;  %v1435_v56 = vmax.f32 %v1419_v51, 0.0  ;;  %1628 = vst.msk [vmem:[%s3103_s5 + $0x180] sm:$0xff] %vm222_vm1, %v1426_v58  ;;  %1629 = vst.msk [vmem:[%s3103_s5 + $0x188] sm:$0xff] %vm222_vm1, %v1427_v47 }
 0x1a0   :  { %v1436_v55 = vmax.f32 %v1420_v25, 0.0  ;;  %v1437_v27 = vmax.f32 %v1421_v22, 0.0  ;;  %v1438_v39 = vmax.f32 %v1422_v57, 0.0  ;;  %v1439_v26 = vmax.f32 %v1423_v62, 0.0  ;;  %1630 = vst.msk [vmem:[%s3103_s5 + $0x190] sm:$0xff] %vm222_vm1, %v1428_v54  ;;  %1631 = vst.msk [vmem:[%s3103_s5 + $0x198] sm:$0xff] %vm222_vm1, %v1429_v3 }
 0x1a1   :  { %1632 = vst.msk [vmem:[%s3103_s5 + $0x1a0] sm:$0xff] %vm222_vm1, %v1430_v63  ;;  %1633 = vst.msk [vmem:[%s3103_s5 + $0x1a8] sm:$0xff] %vm222_vm1, %v1431_v21  ;;  %v1440_v13 = vmax.f32 %v1424_v48, 0.0  ;;  %v1441_v30 = vmax.f32 %v1425_v49, 0.0 }
 0x1a2   :  { %1634 = vst.msk [vmem:[%s3103_s5 + $0x1b0] sm:$0xff] %vm222_vm1, %v1432_v35  ;;  %1635 = vst.msk [vmem:[%s3103_s5 + $0x1b8] sm:$0xff] %vm222_vm1, %v1433_v11 }
 0x1a3   :  { %1636 = vst.msk [vmem:[%s3103_s5 + $0x1c0] sm:$0xff] %vm222_vm1, %v1434_v50  ;;  %1637 = vst.msk [vmem:[%s3103_s5 + $0x1c8] sm:$0xff] %vm222_vm1, %v1435_v56 }
 0x1a4   :  { %1638 = vst.msk [vmem:[%s3103_s5 + $0x1d0] sm:$0xff] %vm222_vm1, %v1436_v55  ;;  %1639 = vst.msk [vmem:[%s3103_s5 + $0x1d8] sm:$0xff] %vm222_vm1, %v1437_v27 }
 0x1a5   :  { %1640 = vst.msk [vmem:[%s3103_s5 + $0x1e0] sm:$0xff] %vm222_vm1, %v1438_v39  ;;  %1641 = vst.msk [vmem:[%s3103_s5 + $0x1e8] sm:$0xff] %vm222_vm1, %v1439_v26 }
 0x1a6   :  { %1642 = vst.msk [vmem:[%s3103_s5 + $0x1f0] sm:$0xff] %vm222_vm1, %v1440_v13  ;;  %1643 = vst.msk [vmem:[%s3103_s5 + $0x1f8] sm:$0xff] %vm222_vm1, %v1441_v30 }

</bundles_post_ra>
